<compile_context>
chip_gen: v7x
topology: tpu7x:2x2x1
jax: 0.10.0
libtpu: 0.0.40
codegen_flags: <defaults>
</compile_context>

<pallas_src>
import functools
import math

import jax
import jax.numpy as jnp
from jax.experimental import pallas as pl
from jax.experimental.pallas import tpu as pltpu


def _pick_tile(n, candidates=(512, 256, 128, 64, 32, 16, 8)):
    for t in candidates:
        if n % t == 0:
            return t
    return n  # full-extent block (legal; disables pipelining)


# ----------------------------- Pallas kernels ------------------------------

def _linear_kernel(x_ref, w_ref, b_ref, o_ref, *, activation):
    x = x_ref[...].astype(jnp.bfloat16)
    acc = jnp.dot(x, w_ref[...], preferred_element_type=jnp.float32)
    acc = acc + b_ref[...].astype(jnp.float32)
    if activation == "relu":
        acc = jnp.maximum(acc, 0.0)
    o_ref[...] = acc.astype(o_ref.dtype)


def linear(x, w, b, activation=None, out_dtype=jnp.float32):
    """x: (M, K) float, w: (K, N) bf16, b: (N,) f32 -> (M, N)."""
    M, K = x.shape
    N = w.shape[1]
    tm = _pick_tile(M)
    kern = functools.partial(_linear_kernel, activation=activation)
    cost = pl.CostEstimate(
        flops=int(2 * M * K * N),
        transcendentals=0,
        bytes_accessed=int(M * K * x.dtype.itemsize + K * N * 2 + M * N * 4),
    )
    return pl.pallas_call(
        kern,
        out_shape=jax.ShapeDtypeStruct((M, N), out_dtype),
        grid=(M // tm,),
        in_specs=[
            pl.BlockSpec((tm, K), lambda i: (i, 0)),
            pl.BlockSpec((K, N), lambda i: (0, 0)),
            pl.BlockSpec((1, N), lambda i: (0, 0)),
        ],
        out_specs=pl.BlockSpec((tm, N), lambda i: (i, 0)),
        compiler_params=pltpu.CompilerParams(dimension_semantics=("parallel",)),
        cost_estimate=cost,
    )(x, w, b.reshape(1, N))


def _layernorm_kernel(x_ref, g_ref, b_ref, o_ref):
    x = x_ref[...].astype(jnp.float32)
    mean = jnp.mean(x, axis=-1, keepdims=True)
    var = jnp.mean(jnp.square(x - mean), axis=-1, keepdims=True)
    inv = jax.lax.rsqrt(var + 1e-5)
    y = (x - mean) * inv * g_ref[...].astype(jnp.float32) + b_ref[...].astype(jnp.float32)
    o_ref[...] = y.astype(o_ref.dtype)


def layernorm(x, gamma, beta):
    """x: (M, C), LayerNorm over last dim (eps=1e-5, elementwise affine)."""
    M, C = x.shape
    tm = _pick_tile(M)
    return pl.pallas_call(
        _layernorm_kernel,
        out_shape=jax.ShapeDtypeStruct((M, C), jnp.float32),
        grid=(M // tm,),
        in_specs=[
            pl.BlockSpec((tm, C), lambda i: (i, 0)),
            pl.BlockSpec((1, C), lambda i: (0, 0)),
            pl.BlockSpec((1, C), lambda i: (0, 0)),
        ],
        out_specs=pl.BlockSpec((tm, C), lambda i: (i, 0)),
        compiler_params=pltpu.CompilerParams(dimension_semantics=("parallel",)),
    )(x, gamma.reshape(1, C), beta.reshape(1, C))


def _qkv_attn_kernel(x_ref, w_ref, b_ref, o_ref, *, nhead):
    """Fused QKV projection + multi-head softmax attention for one batch element.

    x block (L, C) f32 -> qkv (L, 3C) in VMEM -> per-head attention ->
    lane-dense (L, C) bf16 output block.  1/sqrt(dh) is pre-folded into the
    q columns of w_ref / b_ref.
    """
    L, C = x_ref.shape
    dh = C // nhead
    x = x_ref[...].astype(jnp.bfloat16)
    qkv = jnp.dot(x, w_ref[...], preferred_element_type=jnp.float32)
    qkv = (qkv + b_ref[...].astype(jnp.float32)).astype(jnp.bfloat16)   # (L, 3C)

    outs = []
    for h in range(nhead):
        q = qkv[:, h * dh:(h + 1) * dh]                                 # (L, dh)
        k = qkv[:, C + h * dh:C + (h + 1) * dh]
        v = qkv[:, 2 * C + h * dh:2 * C + (h + 1) * dh]
        s = jnp.einsum("qd,kd->qk", q, k, preferred_element_type=jnp.float32)
        m = jnp.max(s, axis=-1, keepdims=True)
        p = jnp.exp(s - m)
        denom = jnp.sum(p, axis=-1, keepdims=True)
        p = p * pl.reciprocal(denom, approx=True)
        outs.append(jnp.dot(p.astype(jnp.bfloat16), v,
                            preferred_element_type=jnp.float32))
    o_ref[...] = jnp.concatenate(outs, axis=-1).astype(o_ref.dtype)


def qkv_attention(x2d, w, b, batch, seq_len, nhead):
    """x2d: (B*L, C) f32 batch-major rows, w: (C, 3C) bf16, b: (3C,) f32.
    Returns (B*L, C) bf16 attention output in the same row layout."""
    M, C = x2d.shape
    kern = functools.partial(_qkv_attn_kernel, nhead=nhead)
    cost = pl.CostEstimate(
        flops=int(2 * M * C * 3 * C + 4 * M * seq_len * C),
        transcendentals=int(nhead * M * seq_len),
        bytes_accessed=int(M * C * 4 + C * 3 * C * 2 + M * C * 2),
    )
    return pl.pallas_call(
        kern,
        out_shape=jax.ShapeDtypeStruct((M, C), jnp.bfloat16),
        grid=(batch,),
        in_specs=[
            pl.BlockSpec((seq_len, C), lambda bb: (bb, 0)),
            pl.BlockSpec((C, 3 * C), lambda bb: (0, 0)),
            pl.BlockSpec((1, 3 * C), lambda bb: (0, 0)),
        ],
        out_specs=pl.BlockSpec((seq_len, C), lambda bb: (bb, 0)),
        compiler_params=pltpu.CompilerParams(
            dimension_semantics=("parallel",),
            vmem_limit_bytes=32 * 1024 * 1024,
        ),
        cost_estimate=cost,
    )(x2d, w, b.reshape(1, 3 * C))


def _proj_res_ln_kernel(x_ref, res_ref, w_ref, b_ref, g_ref, bb_ref, o_ref):
    """o = LayerNorm(res + x @ W + b) — fused out_proj + residual + LN1."""
    x = x_ref[...].astype(jnp.bfloat16)
    proj = jnp.dot(x, w_ref[...], preferred_element_type=jnp.float32)
    y = res_ref[...].astype(jnp.float32) + proj + b_ref[...].astype(jnp.float32)
    mean = jnp.mean(y, axis=-1, keepdims=True)
    var = jnp.mean(jnp.square(y - mean), axis=-1, keepdims=True)
    inv = jax.lax.rsqrt(var + 1e-5)
    o = (y - mean) * inv * g_ref[...].astype(jnp.float32) + bb_ref[...].astype(jnp.float32)
    o_ref[...] = o.astype(o_ref.dtype)


def proj_residual_layernorm(x, resid, w, b, gamma, beta):
    M, K = x.shape
    N = w.shape[1]
    tm = _pick_tile(M)
    cost = pl.CostEstimate(
        flops=int(2 * M * K * N),
        transcendentals=0,
        bytes_accessed=int(M * K * x.dtype.itemsize + M * N * 4 + K * N * 2 + M * N * 4),
    )
    return pl.pallas_call(
        _proj_res_ln_kernel,
        out_shape=jax.ShapeDtypeStruct((M, N), jnp.float32),
        grid=(M // tm,),
        in_specs=[
            pl.BlockSpec((tm, K), lambda i: (i, 0)),
            pl.BlockSpec((tm, N), lambda i: (i, 0)),
            pl.BlockSpec((K, N), lambda i: (0, 0)),
            pl.BlockSpec((1, N), lambda i: (0, 0)),
            pl.BlockSpec((1, N), lambda i: (0, 0)),
            pl.BlockSpec((1, N), lambda i: (0, 0)),
        ],
        out_specs=pl.BlockSpec((tm, N), lambda i: (i, 0)),
        compiler_params=pltpu.CompilerParams(dimension_semantics=("parallel",)),
        cost_estimate=cost,
    )(x, resid, w, b.reshape(1, N), gamma.reshape(1, N), beta.reshape(1, N))


def _ffn_res_ln_kernel(x_ref, w1_ref, b1_ref, w2_ref, b2_ref, g_ref, bb_ref,
                       o_ref, acc_ref):
    """o = LayerNorm(x + relu(x@W1+b1)@W2 + b2), F-dim tiled over grid axis 1."""
    fj = pl.program_id(1)

    @pl.when(fj == 0)
    def _():
        acc_ref[...] = jnp.zeros_like(acc_ref)

    x = x_ref[...]                                   # single load, reused below
    h = jnp.dot(x.astype(jnp.bfloat16), w1_ref[...],
                preferred_element_type=jnp.float32)
    h = jnp.maximum(h + b1_ref[...].astype(jnp.float32), 0.0)
    acc_ref[...] += jnp.dot(h.astype(jnp.bfloat16), w2_ref[...],
                            preferred_element_type=jnp.float32)

    @pl.when(fj == pl.num_programs(1) - 1)
    def _():
        y = x.astype(jnp.float32) + acc_ref[...] + b2_ref[...].astype(jnp.float32)
        mean = jnp.mean(y, axis=-1, keepdims=True)
        var = jnp.mean(jnp.square(y - mean), axis=-1, keepdims=True)
        inv = jax.lax.rsqrt(var + 1e-5)
        o = (y - mean) * inv * g_ref[...].astype(jnp.float32) + bb_ref[...].astype(jnp.float32)
        o_ref[...] = o.astype(o_ref.dtype)


def ffn_residual_layernorm(x, w1, b1, w2, b2, gamma, beta):
    M, C = x.shape
    F = w1.shape[1]
    tm = _pick_tile(M, candidates=(256, 128, 64, 32, 16, 8))   # VMEM-aware cap
    tf = _pick_tile(F, candidates=(512, 256, 128, 64, 32, 16, 8))
    cost = pl.CostEstimate(
        flops=int(4 * M * C * F),
        transcendentals=0,
        bytes_accessed=int(M * C * 4 + 2 * C * F * 2 + M * C * 4),
    )
    return pl.pallas_call(
        _ffn_res_ln_kernel,
        out_shape=jax.ShapeDtypeStruct((M, C), jnp.float32),
        grid=(M // tm, F // tf),
        in_specs=[
            pl.BlockSpec((tm, C), lambda i, j: (i, 0)),
            pl.BlockSpec((C, tf), lambda i, j: (0, j)),
            pl.BlockSpec((1, tf), lambda i, j: (0, j)),
            pl.BlockSpec((tf, C), lambda i, j: (j, 0)),
            pl.BlockSpec((1, C), lambda i, j: (0, 0)),
            pl.BlockSpec((1, C), lambda i, j: (0, 0)),
            pl.BlockSpec((1, C), lambda i, j: (0, 0)),
        ],
        out_specs=pl.BlockSpec((tm, C), lambda i, j: (i, 0)),
        scratch_shapes=[pltpu.VMEM((tm, C), jnp.float32)],
        compiler_params=pltpu.CompilerParams(
            dimension_semantics=("parallel", "arbitrary"),
            vmem_limit_bytes=32 * 1024 * 1024,
        ),
        cost_estimate=cost,
    )(x, w1, b1.reshape(1, F), w2, b2.reshape(1, C),
      gamma.reshape(1, C), beta.reshape(1, C))


# ------------------------------ Model pieces -------------------------------

def conv3d_3x3(x, wk, b):
    """Conv3d(kernel=3, pad=1, stride=1) via bf16 im2col + Pallas matmul.
    x: (B, Cin, D, H, W) f32, wk: (27*Cin, Cout) bf16 tap-major, b: (Cout,) f32.
    Returns (B*D*H*W, Cout) f32, rows batch-major in (d, h, w) row-major order."""
    B, Cin, D, H, W = x.shape
    xp = jnp.pad(x, ((0, 0), (0, 0), (1, 1), (1, 1), (1, 1)))
    xp = jnp.transpose(xp, (0, 2, 3, 4, 1)).astype(jnp.bfloat16)  # (B,D+2,H+2,W+2,Cin)
    patches = []
    for kd in range(3):
        for kh in range(3):
            for kw in range(3):
                patches.append(xp[:, kd:kd + D, kh:kh + H, kw:kw + W, :])
    patches = jnp.stack(patches, axis=-2).reshape(B * D * H * W, 27 * Cin)
    return linear(patches, wk, b, out_dtype=jnp.float32)


def encoder_layer(x2d, batch, seq_len, nhead, p):
    """One nn.TransformerEncoderLayer (post-LN, relu FFN). x2d: (B*L, C) f32."""
    attn = qkv_attention(x2d, p["in_proj_w"], p["in_proj_b"],
                         batch, seq_len, nhead)                     # (B*L, C) bf16
    x2d = proj_residual_layernorm(attn, x2d, p["out_proj_w"], p["out_proj_b"],
                                  p["ln1_g"], p["ln1_b"])
    x2d = ffn_residual_layernorm(x2d, p["ff1_w"], p["ff1_b"],
                                 p["ff2_w"], p["ff2_b"],
                                 p["ln2_g"], p["ln2_b"])
    return x2d


def swin3d_encoder_forward(x, params):
    """Matches Swin3DEncoder.forward: conv3d -> LayerNorm -> transformer
    encoder (4 layers + final norm) -> (B, D*H*W, C)."""
    B, Cin, D, H, W = x.shape
    C = params["norm_g"].shape[0]        # concrete (array shape), jit-safe
    nhead = 8
    L = D * H * W

    # conv output already in batch-major (B*L, C) row layout == final layout.
    y2d = conv3d_3x3(x, params["conv_wk"], params["conv_b"])        # (B*L, C)
    x2d = layernorm(y2d, params["norm_g"], params["norm_b"])

    # Per-row ops are order-independent and attention mixes only within a batch
    # element, so batch-major rows give results identical to PyTorch's (L,B,C).
    for layer_p in params["layers"]:
        x2d = encoder_layer(x2d, B, L, nhead, layer_p)

    # nn.Transformer attaches a final LayerNorm to its encoder.
    x2d = layernorm(x2d, params["enc_norm_g"], params["enc_norm_b"])
    return x2d.reshape(B, L, C)


# ------------------------------ Param init ---------------------------------

def init_params(key, in_channels, embed_dim, num_layers=4):
    """PyTorch-layout f32 parameters."""
    ff_dim = embed_dim * 4

    def nrm(k, shape, scale=0.02):
        return scale * jax.random.normal(k, shape, dtype=jnp.float32)

    keys = jax.random.split(key, 1 + 4 * num_layers)
    ki = iter(keys)
    params = {
        "conv_w": nrm(next(ki), (embed_dim, in_channels, 3, 3, 3)),
        "conv_b": jnp.zeros((embed_dim,), jnp.float32),
        "norm_g": jnp.ones((embed_dim,), jnp.float32),
        "norm_b": jnp.zeros((embed_dim,), jnp.float32),
        "enc_norm_g": jnp.ones((embed_dim,), jnp.float32),
        "enc_norm_b": jnp.zeros((embed_dim,), jnp.float32),
        "layers": [],
    }
    for _ in range(num_layers):
        params["layers"].append({
            "in_proj_w": nrm(next(ki), (3 * embed_dim, embed_dim)),
            "in_proj_b": jnp.zeros((3 * embed_dim,), jnp.float32),
            "out_proj_w": nrm(next(ki), (embed_dim, embed_dim)),
            "out_proj_b": jnp.zeros((embed_dim,), jnp.float32),
            "ln1_g": jnp.ones((embed_dim,), jnp.float32),
            "ln1_b": jnp.zeros((embed_dim,), jnp.float32),
            "ff1_w": nrm(next(ki), (ff_dim, embed_dim)),
            "ff1_b": jnp.zeros((ff_dim,), jnp.float32),
            "ff2_w": nrm(next(ki), (embed_dim, ff_dim)),
            "ff2_b": jnp.zeros((embed_dim,), jnp.float32),
            "ln2_g": jnp.ones((embed_dim,), jnp.float32),
            "ln2_b": jnp.zeros((embed_dim,), jnp.float32),
        })
    return params


def prepare_params(p, nhead=8):
    """PyTorch-layout params -> kernel layout (weights bf16, (in, out)),
    with 1/sqrt(dh) folded into the q part of the in_proj weight / bias."""
    Cout, Cin = p["conv_w"].shape[0], p["conv_w"].shape[1]
    C = Cout
    dh = C // nhead
    scale = 1.0 / math.sqrt(dh)
    sc = jnp.concatenate([jnp.full((C,), scale, jnp.float32),
                          jnp.ones((2 * C,), jnp.float32)])
    out = {
        # tap-major (kd,kh,kw,Cin) x Cout — matches im2col patch ordering.
        "conv_wk": jnp.transpose(p["conv_w"], (2, 3, 4, 1, 0))
                      .reshape(27 * Cin, Cout).astype(jnp.bfloat16),
        "conv_b": p["conv_b"],
        "norm_g": p["norm_g"], "norm_b": p["norm_b"],
        "enc_norm_g": p["enc_norm_g"], "enc_norm_b": p["enc_norm_b"],
        "layers": [],
    }
    for lp in p["layers"]:
        out["layers"].append({
            "in_proj_w": (lp["in_proj_w"] * sc[:, None]).T.astype(jnp.bfloat16),
            "in_proj_b": lp["in_proj_b"] * sc,
            "out_proj_w": lp["out_proj_w"].T.astype(jnp.bfloat16),
            "out_proj_b": lp["out_proj_b"],
            "ln1_g": lp["ln1_g"], "ln1_b": lp["ln1_b"],
            "ff1_w": lp["ff1_w"].T.astype(jnp.bfloat16),
            "ff1_b": lp["ff1_b"],
            "ff2_w": lp["ff2_w"].T.astype(jnp.bfloat16),
            "ff2_b": lp["ff2_b"],
            "ln2_g": lp["ln2_g"], "ln2_b": lp["ln2_b"],
        })
    return out


# --------------------------------- Main -------------------------------------

if __name__ == "__main__":
    B, Cin, D, H, W = 2, 2, 4, 4, 4
    embed_dim = 32

    key = jax.random.PRNGKey(0)
    k_x, k_p = jax.random.split(key)
    x = jax.random.normal(k_x, (B, Cin, D, H, W), dtype=jnp.float32)
    params = prepare_params(init_params(k_p, Cin, embed_dim))

    fwd = jax.jit(swin3d_encoder_forward)
    out = jax.block_until_ready(fwd(x, params))

    assert out.shape == (B, D * H * W, embed_dim), out.shape
    assert bool(jnp.all(jnp.isfinite(out)))
    print("KERNEL_OK")
</pallas_src>

<mosaic_0001>
module attributes {stable_mosaic.version = 11 : i64} {
  func.func @_linear_kernel(%arg0: i32, %arg1: memref<128x54xbf16, #tpu.memory_space<vmem>>, %arg2: memref<54x32xbf16, #tpu.memory_space<vmem>>, %arg3: memref<1x32xf32, #tpu.memory_space<vmem>>, %arg4: memref<128x32xf32, #tpu.memory_space<vmem>>) attributes {dimension_semantics = [#tpu.dimension_semantics<parallel>], iteration_bounds = array<i64: 1>, scalar_prefetch = 0 : i64, scratch_operands = 0 : i64, tpu.core_type = #tpu.core_type<tc>, window_params = [{transform_indices = @transform_0, window_bounds = array<i64: 128, 54>}, {pipeline_mode = #tpu.pipeline_mode<synchronous>, transform_indices = @transform_1, window_bounds = array<i64: 54, 32>}, {pipeline_mode = #tpu.pipeline_mode<synchronous>, transform_indices = @transform_2, window_bounds = array<i64: 1, 32>}, {transform_indices = @transform_3, window_bounds = array<i64: 128, 32>}]} {
    %c0 = arith.constant 0 : index
    %c0_0 = arith.constant 0 : index
    %0 = vector.load %arg1[%c0, %c0_0] : memref<128x54xbf16, #tpu.memory_space<vmem>>, vector<128x54xbf16>
    %c0_1 = arith.constant 0 : index
    %c0_2 = arith.constant 0 : index
    %1 = vector.load %arg2[%c0_1, %c0_2] : memref<54x32xbf16, #tpu.memory_space<vmem>>, vector<54x32xbf16>
    %cst = arith.constant dense<0.000000e+00> : vector<128x32xf32>
    %2 = tpu.matmul %0, %1, %cst {dimension_numbers = #tpu.dot_dimension_numbers<[1], [0], [0], [1], [0, 0, 1, 1], [], []>} : vector<128x54xbf16>, vector<54x32xbf16>, vector<128x32xf32> -> vector<128x32xf32>
    %c0_3 = arith.constant 0 : index
    %c0_4 = arith.constant 0 : index
    %3 = vector.load %arg3[%c0_3, %c0_4] : memref<1x32xf32, #tpu.memory_space<vmem>>, vector<1x32xf32>
    %4 = vector.broadcast %3 : vector<1x32xf32> to vector<128x32xf32>
    %5 = arith.addf %2, %4 : vector<128x32xf32>
    %c0_5 = arith.constant 0 : index
    %c0_6 = arith.constant 0 : index
    %6 = vector.load %arg4[%c0_5, %c0_6] : memref<128x32xf32, #tpu.memory_space<vmem>>, vector<128x32xf32>
    tpu.vector_store %arg4[%c0_5, %c0_6], %5 {strides = array<i32>} : memref<128x32xf32, #tpu.memory_space<vmem>>, vector<128x32xf32>,
    return
  }
  func.func @transform_0(%arg0: i32) -> (i32, i32) {
    %c0_i32 = arith.constant 0 : i32
    %c0_i32_0 = arith.constant 0 : i32
    return %arg0, %c0_i32 : i32, i32
  }
  func.func @transform_1(%arg0: i32) -> (i32, i32) {
    %c0_i32 = arith.constant 0 : i32
    %c0_i32_0 = arith.constant 0 : i32
    %c0_i32_1 = arith.constant 0 : i32
    return %c0_i32, %c0_i32_0 : i32, i32
  }
  func.func @transform_2(%arg0: i32) -> (i32, i32) {
    %c0_i32 = arith.constant 0 : i32
    %c0_i32_0 = arith.constant 0 : i32
    %c0_i32_1 = arith.constant 0 : i32
    return %c0_i32, %c0_i32_0 : i32, i32
  }
  func.func @transform_3(%arg0: i32) -> (i32, i32) {
    %c0_i32 = arith.constant 0 : i32
    %c0_i32_0 = arith.constant 0 : i32
    return %arg0, %c0_i32 : i32, i32
  }
}

module attributes {stable_mosaic.version = 11 : i64} {
  func.func @_layernorm_kernel(%arg0: i32, %arg1: memref<128x32xf32, #tpu.memory_space<vmem>>, %arg2: memref<1x32xf32, #tpu.memory_space<vmem>>, %arg3: memref<1x32xf32, #tpu.memory_space<vmem>>, %arg4: memref<128x32xf32, #tpu.memory_space<vmem>>) attributes {dimension_semantics = [#tpu.dimension_semantics<parallel>], iteration_bounds = array<i64: 1>, scalar_prefetch = 0 : i64, scratch_operands = 0 : i64, tpu.core_type = #tpu.core_type<tc>, window_params = [{transform_indices = @transform_0, window_bounds = array<i64: 128, 32>}, {pipeline_mode = #tpu.pipeline_mode<synchronous>, transform_indices = @transform_1, window_bounds = array<i64: 1, 32>}, {pipeline_mode = #tpu.pipeline_mode<synchronous>, transform_indices = @transform_2, window_bounds = array<i64: 1, 32>}, {transform_indices = @transform_3, window_bounds = array<i64: 128, 32>}]} {
    %c0 = arith.constant 0 : index
    %c0_0 = arith.constant 0 : index
    %0 = vector.load %arg1[%c0, %c0_0] : memref<128x32xf32, #tpu.memory_space<vmem>>, vector<128x32xf32>
    %cst = arith.constant dense<0.000000e+00> : vector<128xf32>
    %1 = vector.multi_reduction <add>, %0, %cst [1] : vector<128x32xf32> to vector<128xf32>
    %2 = vector.shape_cast %1 : vector<128xf32> to vector<128x1xf32>
    %cst_1 = arith.constant 3.200000e+01 : f32
    %3 = vector.broadcast %cst_1 : f32 to vector<128x1xf32>
    %4 = arith.divf %2, %3 : vector<128x1xf32>
    %5 = vector.broadcast %4 : vector<128x1xf32> to vector<128x32xf32>
    %6 = arith.subf %0, %5 : vector<128x32xf32>
    %7 = arith.mulf %6, %6 : vector<128x32xf32>
    %cst_2 = arith.constant dense<0.000000e+00> : vector<128xf32>
    %8 = vector.multi_reduction <add>, %7, %cst_2 [1] : vector<128x32xf32> to vector<128xf32>
    %9 = vector.shape_cast %8 : vector<128xf32> to vector<128x1xf32>
    %cst_3 = arith.constant 3.200000e+01 : f32
    %10 = vector.broadcast %cst_3 : f32 to vector<128x1xf32>
    %11 = arith.divf %9, %10 : vector<128x1xf32>
    %cst_4 = arith.constant 9.99999974E-6 : f32
    %12 = vector.broadcast %cst_4 : f32 to vector<128x1xf32>
    %13 = arith.addf %11, %12 : vector<128x1xf32>
    %14 = math.rsqrt %13 : vector<128x1xf32>
    %15 = vector.broadcast %4 : vector<128x1xf32> to vector<128x32xf32>
    %16 = arith.subf %0, %15 : vector<128x32xf32>
    %17 = vector.broadcast %14 : vector<128x1xf32> to vector<128x32xf32>
    %18 = arith.mulf %16, %17 : vector<128x32xf32>
    %c0_5 = arith.constant 0 : index
    %c0_6 = arith.constant 0 : index
    %19 = vector.load %arg2[%c0_5, %c0_6] : memref<1x32xf32, #tpu.memory_space<vmem>>, vector<1x32xf32>
    %20 = vector.broadcast %19 : vector<1x32xf32> to vector<128x32xf32>
    %21 = arith.mulf %18, %20 : vector<128x32xf32>
    %c0_7 = arith.constant 0 : index
    %c0_8 = arith.constant 0 : index
    %22 = vector.load %arg3[%c0_7, %c0_8] : memref<1x32xf32, #tpu.memory_space<vmem>>, vector<1x32xf32>
    %23 = vector.broadcast %22 : vector<1x32xf32> to vector<128x32xf32>
    %24 = arith.addf %21, %23 : vector<128x32xf32>
    %c0_9 = arith.constant 0 : index
    %c0_10 = arith.constant 0 : index
    %25 = vector.load %arg4[%c0_9, %c0_10] : memref<128x32xf32, #tpu.memory_space<vmem>>, vector<128x32xf32>
    tpu.vector_store %arg4[%c0_9, %c0_10], %24 {strides = array<i32>} : memref<128x32xf32, #tpu.memory_space<vmem>>, vector<128x32xf32>,
    return
  }
  func.func @transform_0(%arg0: i32) -> (i32, i32) {
    %c0_i32 = arith.constant 0 : i32
    %c0_i32_0 = arith.constant 0 : i32
    return %arg0, %c0_i32 : i32, i32
  }
  func.func @transform_1(%arg0: i32) -> (i32, i32) {
    %c0_i32 = arith.constant 0 : i32
    %c0_i32_0 = arith.constant 0 : i32
    %c0_i32_1 = arith.constant 0 : i32
    return %c0_i32, %c0_i32_0 : i32, i32
  }
  func.func @transform_2(%arg0: i32) -> (i32, i32) {
    %c0_i32 = arith.constant 0 : i32
    %c0_i32_0 = arith.constant 0 : i32
    %c0_i32_1 = arith.constant 0 : i32
    return %c0_i32, %c0_i32_0 : i32, i32
  }
  func.func @transform_3(%arg0: i32) -> (i32, i32) {
    %c0_i32 = arith.constant 0 : i32
    %c0_i32_0 = arith.constant 0 : i32
    return %arg0, %c0_i32 : i32, i32
  }
}

module attributes {stable_mosaic.version = 11 : i64} {
  func.func @_proj_res_ln_kernel(%arg0: i32, %arg1: memref<128x32xbf16, #tpu.memory_space<vmem>>, %arg2: memref<128x32xf32, #tpu.memory_space<vmem>>, %arg3: memref<32x32xbf16, #tpu.memory_space<vmem>>, %arg4: memref<1x32xf32, #tpu.memory_space<vmem>>, %arg5: memref<1x32xf32, #tpu.memory_space<vmem>>, %arg6: memref<1x32xf32, #tpu.memory_space<vmem>>, %arg7: memref<128x32xf32, #tpu.memory_space<vmem>>) attributes {dimension_semantics = [#tpu.dimension_semantics<parallel>], iteration_bounds = array<i64: 1>, scalar_prefetch = 0 : i64, scratch_operands = 0 : i64, tpu.core_type = #tpu.core_type<tc>, window_params = [{transform_indices = @transform_0, window_bounds = array<i64: 128, 32>}, {transform_indices = @transform_1, window_bounds = array<i64: 128, 32>}, {pipeline_mode = #tpu.pipeline_mode<synchronous>, transform_indices = @transform_2, window_bounds = array<i64: 32, 32>}, {pipeline_mode = #tpu.pipeline_mode<synchronous>, transform_indices = @transform_3, window_bounds = array<i64: 1, 32>}, {pipeline_mode = #tpu.pipeline_mode<synchronous>, transform_indices = @transform_4, window_bounds = array<i64: 1, 32>}, {pipeline_mode = #tpu.pipeline_mode<synchronous>, transform_indices = @transform_5, window_bounds = array<i64: 1, 32>}, {transform_indices = @transform_6, window_bounds = array<i64: 128, 32>}]} {
    %c0 = arith.constant 0 : index
    %c0_0 = arith.constant 0 : index
    %0 = vector.load %arg1[%c0, %c0_0] : memref<128x32xbf16, #tpu.memory_space<vmem>>, vector<128x32xbf16>
    %c0_1 = arith.constant 0 : index
    %c0_2 = arith.constant 0 : index
    %1 = vector.load %arg3[%c0_1, %c0_2] : memref<32x32xbf16, #tpu.memory_space<vmem>>, vector<32x32xbf16>
    %cst = arith.constant dense<0.000000e+00> : vector<128x32xf32>
    %2 = tpu.matmul %0, %1, %cst {dimension_numbers = #tpu.dot_dimension_numbers<[1], [0], [0], [1], [0, 0, 1, 1], [], []>} : vector<128x32xbf16>, vector<32x32xbf16>, vector<128x32xf32> -> vector<128x32xf32>
    %c0_3 = arith.constant 0 : index
    %c0_4 = arith.constant 0 : index
    %3 = vector.load %arg2[%c0_3, %c0_4] : memref<128x32xf32, #tpu.memory_space<vmem>>, vector<128x32xf32>
    %4 = arith.addf %3, %2 : vector<128x32xf32>
    %c0_5 = arith.constant 0 : index
    %c0_6 = arith.constant 0 : index
    %5 = vector.load %arg4[%c0_5, %c0_6] : memref<1x32xf32, #tpu.memory_space<vmem>>, vector<1x32xf32>
    %6 = vector.broadcast %5 : vector<1x32xf32> to vector<128x32xf32>
    %7 = arith.addf %4, %6 : vector<128x32xf32>
    %cst_7 = arith.constant dense<0.000000e+00> : vector<128xf32>
    %8 = vector.multi_reduction <add>, %7, %cst_7 [1] : vector<128x32xf32> to vector<128xf32>
    %9 = vector.shape_cast %8 : vector<128xf32> to vector<128x1xf32>
    %cst_8 = arith.constant 3.200000e+01 : f32
    %10 = vector.broadcast %cst_8 : f32 to vector<128x1xf32>
    %11 = arith.divf %9, %10 : vector<128x1xf32>
    %12 = vector.broadcast %11 : vector<128x1xf32> to vector<128x32xf32>
    %13 = arith.subf %7, %12 : vector<128x32xf32>
    %14 = arith.mulf %13, %13 : vector<128x32xf32>
    %cst_9 = arith.constant dense<0.000000e+00> : vector<128xf32>
    %15 = vector.multi_reduction <add>, %14, %cst_9 [1] : vector<128x32xf32> to vector<128xf32>
    %16 = vector.shape_cast %15 : vector<128xf32> to vector<128x1xf32>
    %cst_10 = arith.constant 3.200000e+01 : f32
    %17 = vector.broadcast %cst_10 : f32 to vector<128x1xf32>
    %18 = arith.divf %16, %17 : vector<128x1xf32>
    %cst_11 = arith.constant 9.99999974E-6 : f32
    %19 = vector.broadcast %cst_11 : f32 to vector<128x1xf32>
    %20 = arith.addf %18, %19 : vector<128x1xf32>
    %21 = math.rsqrt %20 : vector<128x1xf32>
    %22 = vector.broadcast %11 : vector<128x1xf32> to vector<128x32xf32>
    %23 = arith.subf %7, %22 : vector<128x32xf32>
    %24 = vector.broadcast %21 : vector<128x1xf32> to vector<128x32xf32>
    %25 = arith.mulf %23, %24 : vector<128x32xf32>
    %c0_12 = arith.constant 0 : index
    %c0_13 = arith.constant 0 : index
    %26 = vector.load %arg5[%c0_12, %c0_13] : memref<1x32xf32, #tpu.memory_space<vmem>>, vector<1x32xf32>
    %27 = vector.broadcast %26 : vector<1x32xf32> to vector<128x32xf32>
    %28 = arith.mulf %25, %27 : vector<128x32xf32>
    %c0_14 = arith.constant 0 : index
    %c0_15 = arith.constant 0 : index
    %29 = vector.load %arg6[%c0_14, %c0_15] : memref<1x32xf32, #tpu.memory_space<vmem>>, vector<1x32xf32>
    %30 = vector.broadcast %29 : vector<1x32xf32> to vector<128x32xf32>
    %31 = arith.addf %28, %30 : vector<128x32xf32>
    %c0_16 = arith.constant 0 : index
    %c0_17 = arith.constant 0 : index
    %32 = vector.load %arg7[%c0_16, %c0_17] : memref<128x32xf32, #tpu.memory_space<vmem>>, vector<128x32xf32>
    tpu.vector_store %arg7[%c0_16, %c0_17], %31 {strides = array<i32>} : memref<128x32xf32, #tpu.memory_space<vmem>>, vector<128x32xf32>,
    return
  }
  func.func @transform_0(%arg0: i32) -> (i32, i32) {
    %c0_i32 = arith.constant 0 : i32
    %c0_i32_0 = arith.constant 0 : i32
    return %arg0, %c0_i32 : i32, i32
  }
  func.func @transform_1(%arg0: i32) -> (i32, i32) {
    %c0_i32 = arith.constant 0 : i32
    %c0_i32_0 = arith.constant 0 : i32
    return %arg0, %c0_i32 : i32, i32
  }
  func.func @transform_2(%arg0: i32) -> (i32, i32) {
    %c0_i32 = arith.constant 0 : i32
    %c0_i32_0 = arith.constant 0 : i32
    %c0_i32_1 = arith.constant 0 : i32
    return %c0_i32, %c0_i32_0 : i32, i32
  }
  func.func @transform_3(%arg0: i32) -> (i32, i32) {
    %c0_i32 = arith.constant 0 : i32
    %c0_i32_0 = arith.constant 0 : i32
    %c0_i32_1 = arith.constant 0 : i32
    return %c0_i32, %c0_i32_0 : i32, i32
  }
  func.func @transform_4(%arg0: i32) -> (i32, i32) {
    %c0_i32 = arith.constant 0 : i32
    %c0_i32_0 = arith.constant 0 : i32
    %c0_i32_1 = arith.constant 0 : i32
    return %c0_i32, %c0_i32_0 : i32, i32
  }
  func.func @transform_5(%arg0: i32) -> (i32, i32) {
    %c0_i32 = arith.constant 0 : i32
    %c0_i32_0 = arith.constant 0 : i32
    %c0_i32_1 = arith.constant 0 : i32
    return %c0_i32, %c0_i32_0 : i32, i32
  }
  func.func @transform_6(%arg0: i32) -> (i32, i32) {
    %c0_i32 = arith.constant 0 : i32
    %c0_i32_0 = arith.constant 0 : i32
    return %arg0, %c0_i32 : i32, i32
  }
}

module attributes {stable_mosaic.version = 11 : i64} {
  func.func @_qkv_attn_kernel(%arg0: i32, %arg1: memref<64x32xf32, #tpu.memory_space<vmem>>, %arg2: memref<32x96xbf16, #tpu.memory_space<vmem>>, %arg3: memref<1x96xf32, #tpu.memory_space<vmem>>, %arg4: memref<64x32xbf16, #tpu.memory_space<vmem>>) attributes {dimension_semantics = [#tpu.dimension_semantics<parallel>], iteration_bounds = array<i64: 2>, scalar_prefetch = 0 : i64, scratch_operands = 0 : i64, tpu.core_type = #tpu.core_type<tc>, window_params = [{transform_indices = @transform_0, window_bounds = array<i64: 64, 32>}, {pipeline_mode = #tpu.pipeline_mode<synchronous>, transform_indices = @transform_1, window_bounds = array<i64: 32, 96>}, {pipeline_mode = #tpu.pipeline_mode<synchronous>, transform_indices = @transform_2, window_bounds = array<i64: 1, 96>}, {transform_indices = @transform_3, window_bounds = array<i64: 64, 32>}]} {
    %c0 = arith.constant 0 : index
    %c0_0 = arith.constant 0 : index
    %0 = vector.load %arg1[%c0, %c0_0] : memref<64x32xf32, #tpu.memory_space<vmem>>, vector<64x32xf32>
    %1 = arith.truncf %0 : vector<64x32xf32> to vector<64x32xbf16>
    %c0_1 = arith.constant 0 : index
    %c0_2 = arith.constant 0 : index
    %2 = vector.load %arg2[%c0_1, %c0_2] : memref<32x96xbf16, #tpu.memory_space<vmem>>, vector<32x96xbf16>
    %cst = arith.constant dense<0.000000e+00> : vector<64x96xf32>
    %3 = tpu.matmul %1, %2, %cst {dimension_numbers = #tpu.dot_dimension_numbers<[1], [0], [0], [1], [0, 0, 1, 1], [], []>} : vector<64x32xbf16>, vector<32x96xbf16>, vector<64x96xf32> -> vector<64x96xf32>
    %c0_3 = arith.constant 0 : index
    %c0_4 = arith.constant 0 : index
    %4 = vector.load %arg3[%c0_3, %c0_4] : memref<1x96xf32, #tpu.memory_space<vmem>>, vector<1x96xf32>
    %5 = vector.broadcast %4 : vector<1x96xf32> to vector<64x96xf32>
    %6 = arith.addf %3, %5 : vector<64x96xf32>
    %7 = arith.truncf %6 : vector<64x96xf32> to vector<64x96xbf16>
    %8 = vector.extract_strided_slice %7 {offsets = [0, 0], sizes = [64, 4], strides = [1, 1]} : vector<64x96xbf16> to vector<64x4xbf16>
    %9 = vector.extract_strided_slice %7 {offsets = [0, 32], sizes = [64, 4], strides = [1, 1]} : vector<64x96xbf16> to vector<64x4xbf16>
    %10 = vector.extract_strided_slice %7 {offsets = [0, 64], sizes = [64, 4], strides = [1, 1]} : vector<64x96xbf16> to vector<64x4xbf16>
    "tpu.trace_start"() <{level = 10 : i32, message = "qd,kd->qk"}> : () -> ()
    %cst_5 = arith.constant dense<0.000000e+00> : vector<64x64xf32>
    %11 = tpu.matmul %8, %9, %cst_5 {dimension_numbers = #tpu.dot_dimension_numbers<[1], [1], [0], [0], [0, 0, 1, 0], [], []>} : vector<64x4xbf16>, vector<64x4xbf16>, vector<64x64xf32> -> vector<64x64xf32>
    "tpu.trace_stop"() : () -> ()
    %cst_6 = arith.constant dense<0xFF800000> : vector<64xf32>
    %12 = vector.multi_reduction <maximumf>, %11, %cst_6 [1] : vector<64x64xf32> to vector<64xf32>
    %13 = vector.shape_cast %12 : vector<64xf32> to vector<64x1xf32>
    %14 = vector.broadcast %13 : vector<64x1xf32> to vector<64x64xf32>
    %15 = arith.subf %11, %14 : vector<64x64xf32>
    %16 = math.exp %15 : vector<64x64xf32>
    %cst_7 = arith.constant dense<0.000000e+00> : vector<64xf32>
    %17 = vector.multi_reduction <add>, %16, %cst_7 [1] : vector<64x64xf32> to vector<64xf32>
    %18 = vector.shape_cast %17 : vector<64xf32> to vector<64x1xf32>
    %19 = tpu.reciprocal %18 {approx = true} : vector<64x1xf32> -> vector<64x1xf32>
    %20 = vector.broadcast %19 : vector<64x1xf32> to vector<64x64xf32>
    %21 = arith.mulf %16, %20 : vector<64x64xf32>
    %22 = arith.truncf %21 : vector<64x64xf32> to vector<64x64xbf16>
    %cst_8 = arith.constant dense<0.000000e+00> : vector<64x4xf32>
    %23 = tpu.matmul %22, %10, %cst_8 {dimension_numbers = #tpu.dot_dimension_numbers<[1], [0], [0], [1], [0, 0, 1, 1], [], []>} : vector<64x64xbf16>, vector<64x4xbf16>, vector<64x4xf32> -> vector<64x4xf32>
    %24 = vector.extract_strided_slice %7 {offsets = [0, 4], sizes = [64, 4], strides = [1, 1]} : vector<64x96xbf16> to vector<64x4xbf16>
    %25 = vector.extract_strided_slice %7 {offsets = [0, 36], sizes = [64, 4], strides = [1, 1]} : vector<64x96xbf16> to vector<64x4xbf16>
    %26 = vector.extract_strided_slice %7 {offsets = [0, 68], sizes = [64, 4], strides = [1, 1]} : vector<64x96xbf16> to vector<64x4xbf16>
    "tpu.trace_start"() <{level = 10 : i32, message = "qd,kd->qk"}> : () -> ()
    %cst_9 = arith.constant dense<0.000000e+00> : vector<64x64xf32>
    %27 = tpu.matmul %24, %25, %cst_9 {dimension_numbers = #tpu.dot_dimension_numbers<[1], [1], [0], [0], [0, 0, 1, 0], [], []>} : vector<64x4xbf16>, vector<64x4xbf16>, vector<64x64xf32> -> vector<64x64xf32>
    "tpu.trace_stop"() : () -> ()
    %cst_10 = arith.constant dense<0xFF800000> : vector<64xf32>
    %28 = vector.multi_reduction <maximumf>, %27, %cst_10 [1] : vector<64x64xf32> to vector<64xf32>
    %29 = vector.shape_cast %28 : vector<64xf32> to vector<64x1xf32>
    %30 = vector.broadcast %29 : vector<64x1xf32> to vector<64x64xf32>
    %31 = arith.subf %27, %30 : vector<64x64xf32>
    %32 = math.exp %31 : vector<64x64xf32>
    %cst_11 = arith.constant dense<0.000000e+00> : vector<64xf32>
    %33 = vector.multi_reduction <add>, %32, %cst_11 [1] : vector<64x64xf32> to vector<64xf32>
    %34 = vector.shape_cast %33 : vector<64xf32> to vector<64x1xf32>
    %35 = tpu.reciprocal %34 {approx = true} : vector<64x1xf32> -> vector<64x1xf32>
    %36 = vector.broadcast %35 : vector<64x1xf32> to vector<64x64xf32>
    %37 = arith.mulf %32, %36 : vector<64x64xf32>
    %38 = arith.truncf %37 : vector<64x64xf32> to vector<64x64xbf16>
    %cst_12 = arith.constant dense<0.000000e+00> : vector<64x4xf32>
    %39 = tpu.matmul %38, %26, %cst_12 {dimension_numbers = #tpu.dot_dimension_numbers<[1], [0], [0], [1], [0, 0, 1, 1], [], []>} : vector<64x64xbf16>, vector<64x4xbf16>, vector<64x4xf32> -> vector<64x4xf32>
    %40 = vector.extract_strided_slice %7 {offsets = [0, 8], sizes = [64, 4], strides = [1, 1]} : vector<64x96xbf16> to vector<64x4xbf16>
    %41 = vector.extract_strided_slice %7 {offsets = [0, 40], sizes = [64, 4], strides = [1, 1]} : vector<64x96xbf16> to vector<64x4xbf16>
    %42 = vector.extract_strided_slice %7 {offsets = [0, 72], sizes = [64, 4], strides = [1, 1]} : vector<64x96xbf16> to vector<64x4xbf16>
    "tpu.trace_start"() <{level = 10 : i32, message = "qd,kd->qk"}> : () -> ()
    %cst_13 = arith.constant dense<0.000000e+00> : vector<64x64xf32>
    %43 = tpu.matmul %40, %41, %cst_13 {dimension_numbers = #tpu.dot_dimension_numbers<[1], [1], [0], [0], [0, 0, 1, 0], [], []>} : vector<64x4xbf16>, vector<64x4xbf16>, vector<64x64xf32> -> vector<64x64xf32>
    "tpu.trace_stop"() : () -> ()
    %cst_14 = arith.constant dense<0xFF800000> : vector<64xf32>
    %44 = vector.multi_reduction <maximumf>, %43, %cst_14 [1] : vector<64x64xf32> to vector<64xf32>
    %45 = vector.shape_cast %44 : vector<64xf32> to vector<64x1xf32>
    %46 = vector.broadcast %45 : vector<64x1xf32> to vector<64x64xf32>
    %47 = arith.subf %43, %46 : vector<64x64xf32>
    %48 = math.exp %47 : vector<64x64xf32>
    %cst_15 = arith.constant dense<0.000000e+00> : vector<64xf32>
    %49 = vector.multi_reduction <add>, %48, %cst_15 [1] : vector<64x64xf32> to vector<64xf32>
    %50 = vector.shape_cast %49 : vector<64xf32> to vector<64x1xf32>
    %51 = tpu.reciprocal %50 {approx = true} : vector<64x1xf32> -> vector<64x1xf32>
    %52 = vector.broadcast %51 : vector<64x1xf32> to vector<64x64xf32>
    %53 = arith.mulf %48, %52 : vector<64x64xf32>
    %54 = arith.truncf %53 : vector<64x64xf32> to vector<64x64xbf16>
    %cst_16 = arith.constant dense<0.000000e+00> : vector<64x4xf32>
    %55 = tpu.matmul %54, %42, %cst_16 {dimension_numbers = #tpu.dot_dimension_numbers<[1], [0], [0], [1], [0, 0, 1, 1], [], []>} : vector<64x64xbf16>, vector<64x4xbf16>, vector<64x4xf32> -> vector<64x4xf32>
    %56 = vector.extract_strided_slice %7 {offsets = [0, 12], sizes = [64, 4], strides = [1, 1]} : vector<64x96xbf16> to vector<64x4xbf16>
    %57 = vector.extract_strided_slice %7 {offsets = [0, 44], sizes = [64, 4], strides = [1, 1]} : vector<64x96xbf16> to vector<64x4xbf16>
    %58 = vector.extract_strided_slice %7 {offsets = [0, 76], sizes = [64, 4], strides = [1, 1]} : vector<64x96xbf16> to vector<64x4xbf16>
    "tpu.trace_start"() <{level = 10 : i32, message = "qd,kd->qk"}> : () -> ()
    %cst_17 = arith.constant dense<0.000000e+00> : vector<64x64xf32>
    %59 = tpu.matmul %56, %57, %cst_17 {dimension_numbers = #tpu.dot_dimension_numbers<[1], [1], [0], [0], [0, 0, 1, 0], [], []>} : vector<64x4xbf16>, vector<64x4xbf16>, vector<64x64xf32> -> vector<64x64xf32>
    "tpu.trace_stop"() : () -> ()
    %cst_18 = arith.constant dense<0xFF800000> : vector<64xf32>
    %60 = vector.multi_reduction <maximumf>, %59, %cst_18 [1] : vector<64x64xf32> to vector<64xf32>
    %61 = vector.shape_cast %60 : vector<64xf32> to vector<64x1xf32>
    %62 = vector.broadcast %61 : vector<64x1xf32> to vector<64x64xf32>
    %63 = arith.subf %59, %62 : vector<64x64xf32>
    %64 = math.exp %63 : vector<64x64xf32>
    %cst_19 = arith.constant dense<0.000000e+00> : vector<64xf32>
    %65 = vector.multi_reduction <add>, %64, %cst_19 [1] : vector<64x64xf32> to vector<64xf32>
    %66 = vector.shape_cast %65 : vector<64xf32> to vector<64x1xf32>
    %67 = tpu.reciprocal %66 {approx = true} : vector<64x1xf32> -> vector<64x1xf32>
    %68 = vector.broadcast %67 : vector<64x1xf32> to vector<64x64xf32>
    %69 = arith.mulf %64, %68 : vector<64x64xf32>
    %70 = arith.truncf %69 : vector<64x64xf32> to vector<64x64xbf16>
    %cst_20 = arith.constant dense<0.000000e+00> : vector<64x4xf32>
    %71 = tpu.matmul %70, %58, %cst_20 {dimension_numbers = #tpu.dot_dimension_numbers<[1], [0], [0], [1], [0, 0, 1, 1], [], []>} : vector<64x64xbf16>, vector<64x4xbf16>, vector<64x4xf32> -> vector<64x4xf32>
    %72 = vector.extract_strided_slice %7 {offsets = [0, 16], sizes = [64, 4], strides = [1, 1]} : vector<64x96xbf16> to vector<64x4xbf16>
    %73 = vector.extract_strided_slice %7 {offsets = [0, 48], sizes = [64, 4], strides = [1, 1]} : vector<64x96xbf16> to vector<64x4xbf16>
    %74 = vector.extract_strided_slice %7 {offsets = [0, 80], sizes = [64, 4], strides = [1, 1]} : vector<64x96xbf16> to vector<64x4xbf16>
    "tpu.trace_start"() <{level = 10 : i32, message = "qd,kd->qk"}> : () -> ()
    %cst_21 = arith.constant dense<0.000000e+00> : vector<64x64xf32>
    %75 = tpu.matmul %72, %73, %cst_21 {dimension_numbers = #tpu.dot_dimension_numbers<[1], [1], [0], [0], [0, 0, 1, 0], [], []>} : vector<64x4xbf16>, vector<64x4xbf16>, vector<64x64xf32> -> vector<64x64xf32>
    "tpu.trace_stop"() : () -> ()
    %cst_22 = arith.constant dense<0xFF800000> : vector<64xf32>
    %76 = vector.multi_reduction <maximumf>, %75, %cst_22 [1] : vector<64x64xf32> to vector<64xf32>
    %77 = vector.shape_cast %76 : vector<64xf32> to vector<64x1xf32>
    %78 = vector.broadcast %77 : vector<64x1xf32> to vector<64x64xf32>
    %79 = arith.subf %75, %78 : vector<64x64xf32>
    %80 = math.exp %79 : vector<64x64xf32>
    %cst_23 = arith.constant dense<0.000000e+00> : vector<64xf32>
    %81 = vector.multi_reduction <add>, %80, %cst_23 [1] : vector<64x64xf32> to vector<64xf32>
    %82 = vector.shape_cast %81 : vector<64xf32> to vector<64x1xf32>
    %83 = tpu.reciprocal %82 {approx = true} : vector<64x1xf32> -> vector<64x1xf32>
    %84 = vector.broadcast %83 : vector<64x1xf32> to vector<64x64xf32>
    %85 = arith.mulf %80, %84 : vector<64x64xf32>
    %86 = arith.truncf %85 : vector<64x64xf32> to vector<64x64xbf16>
    %cst_24 = arith.constant dense<0.000000e+00> : vector<64x4xf32>
    %87 = tpu.matmul %86, %74, %cst_24 {dimension_numbers = #tpu.dot_dimension_numbers<[1], [0], [0], [1], [0, 0, 1, 1], [], []>} : vector<64x64xbf16>, vector<64x4xbf16>, vector<64x4xf32> -> vector<64x4xf32>
    %88 = vector.extract_strided_slice %7 {offsets = [0, 20], sizes = [64, 4], strides = [1, 1]} : vector<64x96xbf16> to vector<64x4xbf16>
    %89 = vector.extract_strided_slice %7 {offsets = [0, 52], sizes = [64, 4], strides = [1, 1]} : vector<64x96xbf16> to vector<64x4xbf16>
    %90 = vector.extract_strided_slice %7 {offsets = [0, 84], sizes = [64, 4], strides = [1, 1]} : vector<64x96xbf16> to vector<64x4xbf16>
    "tpu.trace_start"() <{level = 10 : i32, message = "qd,kd->qk"}> : () -> ()
    %cst_25 = arith.constant dense<0.000000e+00> : vector<64x64xf32>
    %91 = tpu.matmul %88, %89, %cst_25 {dimension_numbers = #tpu.dot_dimension_numbers<[1], [1], [0], [0], [0, 0, 1, 0], [], []>} : vector<64x4xbf16>, vector<64x4xbf16>, vector<64x64xf32> -> vector<64x64xf32>
    "tpu.trace_stop"() : () -> ()
    %cst_26 = arith.constant dense<0xFF800000> : vector<64xf32>
    %92 = vector.multi_reduction <maximumf>, %91, %cst_26 [1] : vector<64x64xf32> to vector<64xf32>
    %93 = vector.shape_cast %92 : vector<64xf32> to vector<64x1xf32>
    %94 = vector.broadcast %93 : vector<64x1xf32> to vector<64x64xf32>
    %95 = arith.subf %91, %94 : vector<64x64xf32>
    %96 = math.exp %95 : vector<64x64xf32>
    %cst_27 = arith.constant dense<0.000000e+00> : vector<64xf32>
    %97 = vector.multi_reduction <add>, %96, %cst_27 [1] : vector<64x64xf32> to vector<64xf32>
    %98 = vector.shape_cast %97 : vector<64xf32> to vector<64x1xf32>
    %99 = tpu.reciprocal %98 {approx = true} : vector<64x1xf32> -> vector<64x1xf32>
    %100 = vector.broadcast %99 : vector<64x1xf32> to vector<64x64xf32>
    %101 = arith.mulf %96, %100 : vector<64x64xf32>
    %102 = arith.truncf %101 : vector<64x64xf32> to vector<64x64xbf16>
    %cst_28 = arith.constant dense<0.000000e+00> : vector<64x4xf32>
    %103 = tpu.matmul %102, %90, %cst_28 {dimension_numbers = #tpu.dot_dimension_numbers<[1], [0], [0], [1], [0, 0, 1, 1], [], []>} : vector<64x64xbf16>, vector<64x4xbf16>, vector<64x4xf32> -> vector<64x4xf32>
    %104 = vector.extract_strided_slice %7 {offsets = [0, 24], sizes = [64, 4], strides = [1, 1]} : vector<64x96xbf16> to vector<64x4xbf16>
    %105 = vector.extract_strided_slice %7 {offsets = [0, 56], sizes = [64, 4], strides = [1, 1]} : vector<64x96xbf16> to vector<64x4xbf16>
    %106 = vector.extract_strided_slice %7 {offsets = [0, 88], sizes = [64, 4], strides = [1, 1]} : vector<64x96xbf16> to vector<64x4xbf16>
    "tpu.trace_start"() <{level = 10 : i32, message = "qd,kd->qk"}> : () -> ()
    %cst_29 = arith.constant dense<0.000000e+00> : vector<64x64xf32>
    %107 = tpu.matmul %104, %105, %cst_29 {dimension_numbers = #tpu.dot_dimension_numbers<[1], [1], [0], [0], [0, 0, 1, 0], [], []>} : vector<64x4xbf16>, vector<64x4xbf16>, vector<64x64xf32> -> vector<64x64xf32>
    "tpu.trace_stop"() : () -> ()
    %cst_30 = arith.constant dense<0xFF800000> : vector<64xf32>
    %108 = vector.multi_reduction <maximumf>, %107, %cst_30 [1] : vector<64x64xf32> to vector<64xf32>
    %109 = vector.shape_cast %108 : vector<64xf32> to vector<64x1xf32>
    %110 = vector.broadcast %109 : vector<64x1xf32> to vector<64x64xf32>
    %111 = arith.subf %107, %110 : vector<64x64xf32>
    %112 = math.exp %111 : vector<64x64xf32>
    %cst_31 = arith.constant dense<0.000000e+00> : vector<64xf32>
    %113 = vector.multi_reduction <add>, %112, %cst_31 [1] : vector<64x64xf32> to vector<64xf32>
    %114 = vector.shape_cast %113 : vector<64xf32> to vector<64x1xf32>
    %115 = tpu.reciprocal %114 {approx = true} : vector<64x1xf32> -> vector<64x1xf32>
    %116 = vector.broadcast %115 : vector<64x1xf32> to vector<64x64xf32>
    %117 = arith.mulf %112, %116 : vector<64x64xf32>
    %118 = arith.truncf %117 : vector<64x64xf32> to vector<64x64xbf16>
    %cst_32 = arith.constant dense<0.000000e+00> : vector<64x4xf32>
    %119 = tpu.matmul %118, %106, %cst_32 {dimension_numbers = #tpu.dot_dimension_numbers<[1], [0], [0], [1], [0, 0, 1, 1], [], []>} : vector<64x64xbf16>, vector<64x4xbf16>, vector<64x4xf32> -> vector<64x4xf32>
    %120 = vector.extract_strided_slice %7 {offsets = [0, 28], sizes = [64, 4], strides = [1, 1]} : vector<64x96xbf16> to vector<64x4xbf16>
    %121 = vector.extract_strided_slice %7 {offsets = [0, 60], sizes = [64, 4], strides = [1, 1]} : vector<64x96xbf16> to vector<64x4xbf16>
    %122 = vector.extract_strided_slice %7 {offsets = [0, 92], sizes = [64, 4], strides = [1, 1]} : vector<64x96xbf16> to vector<64x4xbf16>
    "tpu.trace_start"() <{level = 10 : i32, message = "qd,kd->qk"}> : () -> ()
    %cst_33 = arith.constant dense<0.000000e+00> : vector<64x64xf32>
    %123 = tpu.matmul %120, %121, %cst_33 {dimension_numbers = #tpu.dot_dimension_numbers<[1], [1], [0], [0], [0, 0, 1, 0], [], []>} : vector<64x4xbf16>, vector<64x4xbf16>, vector<64x64xf32> -> vector<64x64xf32>
    "tpu.trace_stop"() : () -> ()
    %cst_34 = arith.constant dense<0xFF800000> : vector<64xf32>
    %124 = vector.multi_reduction <maximumf>, %123, %cst_34 [1] : vector<64x64xf32> to vector<64xf32>
    %125 = vector.shape_cast %124 : vector<64xf32> to vector<64x1xf32>
    %126 = vector.broadcast %125 : vector<64x1xf32> to vector<64x64xf32>
    %127 = arith.subf %123, %126 : vector<64x64xf32>
    %128 = math.exp %127 : vector<64x64xf32>
    %cst_35 = arith.constant dense<0.000000e+00> : vector<64xf32>
    %129 = vector.multi_reduction <add>, %128, %cst_35 [1] : vector<64x64xf32> to vector<64xf32>
    %130 = vector.shape_cast %129 : vector<64xf32> to vector<64x1xf32>
    %131 = tpu.reciprocal %130 {approx = true} : vector<64x1xf32> -> vector<64x1xf32>
    %132 = vector.broadcast %131 : vector<64x1xf32> to vector<64x64xf32>
    %133 = arith.mulf %128, %132 : vector<64x64xf32>
    %134 = arith.truncf %133 : vector<64x64xf32> to vector<64x64xbf16>
    %cst_36 = arith.constant dense<0.000000e+00> : vector<64x4xf32>
    %135 = tpu.matmul %134, %122, %cst_36 {dimension_numbers = #tpu.dot_dimension_numbers<[1], [0], [0], [1], [0, 0, 1, 1], [], []>} : vector<64x64xbf16>, vector<64x4xbf16>, vector<64x4xf32> -> vector<64x4xf32>
    %136 = tpu.concatenate %23, %39, %55, %71, %87, %103, %119, %135 in 1 : vector<64x4xf32>, vector<64x4xf32>, vector<64x4xf32>, vector<64x4xf32>, vector<64x4xf32>, vector<64x4xf32>, vector<64x4xf32>, vector<64x4xf32> -> vector<64x32xf32>
    %137 = arith.truncf %136 : vector<64x32xf32> to vector<64x32xbf16>
    %c0_37 = arith.constant 0 : index
    %c0_38 = arith.constant 0 : index
    %138 = vector.load %arg4[%c0_37, %c0_38] : memref<64x32xbf16, #tpu.memory_space<vmem>>, vector<64x32xbf16>
    tpu.vector_store %arg4[%c0_37, %c0_38], %137 {strides = array<i32>} : memref<64x32xbf16, #tpu.memory_space<vmem>>, vector<64x32xbf16>,
    return
  }
  func.func @transform_0(%arg0: i32) -> (i32, i32) {
    %c0_i32 = arith.constant 0 : i32
    %c0_i32_0 = arith.constant 0 : i32
    return %arg0, %c0_i32 : i32, i32
  }
  func.func @transform_1(%arg0: i32) -> (i32, i32) {
    %c0_i32 = arith.constant 0 : i32
    %c0_i32_0 = arith.constant 0 : i32
    %c0_i32_1 = arith.constant 0 : i32
    return %c0_i32, %c0_i32_0 : i32, i32
  }
  func.func @transform_2(%arg0: i32) -> (i32, i32) {
    %c0_i32 = arith.constant 0 : i32
    %c0_i32_0 = arith.constant 0 : i32
    %c0_i32_1 = arith.constant 0 : i32
    return %c0_i32, %c0_i32_0 : i32, i32
  }
  func.func @transform_3(%arg0: i32) -> (i32, i32) {
    %c0_i32 = arith.constant 0 : i32
    %c0_i32_0 = arith.constant 0 : i32
    return %arg0, %c0_i32 : i32, i32
  }
}

module attributes {stable_mosaic.version = 11 : i64} {
  func.func @_ffn_res_ln_kernel(%arg0: i32, %arg1: i32, %arg2: memref<128x32xf32, #tpu.memory_space<vmem>>, %arg3: memref<32x128xbf16, #tpu.memory_space<vmem>>, %arg4: memref<1x128xf32, #tpu.memory_space<vmem>>, %arg5: memref<128x32xbf16, #tpu.memory_space<vmem>>, %arg6: memref<1x32xf32, #tpu.memory_space<vmem>>, %arg7: memref<1x32xf32, #tpu.memory_space<vmem>>, %arg8: memref<1x32xf32, #tpu.memory_space<vmem>>, %arg9: memref<128x32xf32, #tpu.memory_space<vmem>>, %arg10: memref<128x32xf32, #tpu.memory_space<vmem>>) attributes {dimension_semantics = [#tpu.dimension_semantics<parallel>, #tpu.dimension_semantics<arbitrary>], iteration_bounds = array<i64: 1, 1>, scalar_prefetch = 0 : i64, scratch_operands = 1 : i64, tpu.core_type = #tpu.core_type<tc>, window_params = [{transform_indices = @transform_0, window_bounds = array<i64: 128, 32>}, {transform_indices = @transform_1, window_bounds = array<i64: 32, 128>}, {transform_indices = @transform_2, window_bounds = array<i64: 1, 128>}, {transform_indices = @transform_3, window_bounds = array<i64: 128, 32>}, {pipeline_mode = #tpu.pipeline_mode<synchronous>, transform_indices = @transform_4, window_bounds = array<i64: 1, 32>}, {pipeline_mode = #tpu.pipeline_mode<synchronous>, transform_indices = @transform_5, window_bounds = array<i64: 1, 32>}, {pipeline_mode = #tpu.pipeline_mode<synchronous>, transform_indices = @transform_6, window_bounds = array<i64: 1, 32>}, {transform_indices = @transform_7, window_bounds = array<i64: 128, 32>}]} {
    %c0_i32 = arith.constant 0 : i32
    %0 = arith.cmpi eq, %arg1, %c0_i32 : i32
    %1 = arith.extui %0 : i1 to i32
    %c0_i32_0 = arith.constant 0 : i32
    %2 = arith.cmpi ne, %1, %c0_i32_0 : i32
    scf.if %2 {
      %cst_16 = arith.constant 0.000000e+00 : f32
      %21 = vector.broadcast %cst_16 : f32 to vector<128x32xf32>
      %c0_17 = arith.constant 0 : index
      %c0_18 = arith.constant 0 : index
      %22 = vector.load %arg10[%c0_17, %c0_18] : memref<128x32xf32, #tpu.memory_space<vmem>>, vector<128x32xf32>
      tpu.vector_store %arg10[%c0_17, %c0_18], %21 {strides = array<i32>} : memref<128x32xf32, #tpu.memory_space<vmem>>, vector<128x32xf32>,
    } else {
    }
    %c0 = arith.constant 0 : index
    %c0_1 = arith.constant 0 : index
    %3 = vector.load %arg2[%c0, %c0_1] : memref<128x32xf32, #tpu.memory_space<vmem>>, vector<128x32xf32>
    %4 = arith.truncf %3 : vector<128x32xf32> to vector<128x32xbf16>
    %c0_2 = arith.constant 0 : index
    %c0_3 = arith.constant 0 : index
    %5 = vector.load %arg3[%c0_2, %c0_3] : memref<32x128xbf16, #tpu.memory_space<vmem>>, vector<32x128xbf16>
    %cst = arith.constant dense<0.000000e+00> : vector<128x128xf32>
    %6 = tpu.matmul %4, %5, %cst {dimension_numbers = #tpu.dot_dimension_numbers<[1], [0], [0], [1], [0, 0, 1, 1], [], []>} : vector<128x32xbf16>, vector<32x128xbf16>, vector<128x128xf32> -> vector<128x128xf32>
    %c0_4 = arith.constant 0 : index
    %c0_5 = arith.constant 0 : index
    %7 = vector.load %arg4[%c0_4, %c0_5] : memref<1x128xf32, #tpu.memory_space<vmem>>, vector<1x128xf32>
    %8 = vector.broadcast %7 : vector<1x128xf32> to vector<128x128xf32>
    %9 = arith.addf %6, %8 : vector<128x128xf32>
    %cst_6 = arith.constant 0.000000e+00 : f32
    %10 = vector.broadcast %cst_6 : f32 to vector<128x128xf32>
    %11 = arith.maximumf %9, %10 : vector<128x128xf32>
    %c0_7 = arith.constant 0 : index
    %c0_8 = arith.constant 0 : index
    %12 = vector.load %arg10[%c0_7, %c0_8] : memref<128x32xf32, #tpu.memory_space<vmem>>, vector<128x32xf32>
    %13 = arith.truncf %11 : vector<128x128xf32> to vector<128x128xbf16>
    %c0_9 = arith.constant 0 : index
    %c0_10 = arith.constant 0 : index
    %14 = vector.load %arg5[%c0_9, %c0_10] : memref<128x32xbf16, #tpu.memory_space<vmem>>, vector<128x32xbf16>
    %cst_11 = arith.constant dense<0.000000e+00> : vector<128x32xf32>
    %15 = tpu.matmul %13, %14, %cst_11 {dimension_numbers = #tpu.dot_dimension_numbers<[1], [0], [0], [1], [0, 0, 1, 1], [], []>} : vector<128x128xbf16>, vector<128x32xbf16>, vector<128x32xf32> -> vector<128x32xf32>
    %16 = arith.addf %12, %15 : vector<128x32xf32>
    %c0_12 = arith.constant 0 : index
    %c0_13 = arith.constant 0 : index
    %17 = vector.load %arg10[%c0_12, %c0_13] : memref<128x32xf32, #tpu.memory_space<vmem>>, vector<128x32xf32>
    tpu.vector_store %arg10[%c0_12, %c0_13], %16 {strides = array<i32>} : memref<128x32xf32, #tpu.memory_space<vmem>>, vector<128x32xf32>,
    %c0_i32_14 = arith.constant 0 : i32
    %18 = arith.cmpi eq, %arg1, %c0_i32_14 : i32
    %19 = arith.extui %18 : i1 to i32
    %c0_i32_15 = arith.constant 0 : i32
    %20 = arith.cmpi ne, %19, %c0_i32_15 : i32
    scf.if %20 {
      %c0_16 = arith.constant 0 : index
      %c0_17 = arith.constant 0 : index
      %21 = vector.load %arg10[%c0_16, %c0_17] : memref<128x32xf32, #tpu.memory_space<vmem>>, vector<128x32xf32>
      %22 = arith.addf %3, %21 : vector<128x32xf32>
      %c0_18 = arith.constant 0 : index
      %c0_19 = arith.constant 0 : index
      %23 = vector.load %arg6[%c0_18, %c0_19] : memref<1x32xf32, #tpu.memory_space<vmem>>, vector<1x32xf32>
      %24 = vector.broadcast %23 : vector<1x32xf32> to vector<128x32xf32>
      %25 = arith.addf %22, %24 : vector<128x32xf32>
      %cst_20 = arith.constant dense<0.000000e+00> : vector<128xf32>
      %26 = vector.multi_reduction <add>, %25, %cst_20 [1] : vector<128x32xf32> to vector<128xf32>
      %27 = vector.shape_cast %26 : vector<128xf32> to vector<128x1xf32>
      %cst_21 = arith.constant 3.200000e+01 : f32
      %28 = vector.broadcast %cst_21 : f32 to vector<128x1xf32>
      %29 = arith.divf %27, %28 : vector<128x1xf32>
      %30 = vector.broadcast %29 : vector<128x1xf32> to vector<128x32xf32>
      %31 = arith.subf %25, %30 : vector<128x32xf32>
      %32 = arith.mulf %31, %31 : vector<128x32xf32>
      %cst_22 = arith.constant dense<0.000000e+00> : vector<128xf32>
      %33 = vector.multi_reduction <add>, %32, %cst_22 [1] : vector<128x32xf32> to vector<128xf32>
      %34 = vector.shape_cast %33 : vector<128xf32> to vector<128x1xf32>
      %cst_23 = arith.constant 3.200000e+01 : f32
      %35 = vector.broadcast %cst_23 : f32 to vector<128x1xf32>
      %36 = arith.divf %34, %35 : vector<128x1xf32>
      %cst_24 = arith.constant 9.99999974E-6 : f32
      %37 = vector.broadcast %cst_24 : f32 to vector<128x1xf32>
      %38 = arith.addf %36, %37 : vector<128x1xf32>
      %39 = math.rsqrt %38 : vector<128x1xf32>
      %40 = vector.broadcast %29 : vector<128x1xf32> to vector<128x32xf32>
      %41 = arith.subf %25, %40 : vector<128x32xf32>
      %42 = vector.broadcast %39 : vector<128x1xf32> to vector<128x32xf32>
      %43 = arith.mulf %41, %42 : vector<128x32xf32>
      %c0_25 = arith.constant 0 : index
      %c0_26 = arith.constant 0 : index
      %44 = vector.load %arg7[%c0_25, %c0_26] : memref<1x32xf32, #tpu.memory_space<vmem>>, vector<1x32xf32>
      %45 = vector.broadcast %44 : vector<1x32xf32> to vector<128x32xf32>
      %46 = arith.mulf %43, %45 : vector<128x32xf32>
      %c0_27 = arith.constant 0 : index
      %c0_28 = arith.constant 0 : index
      %47 = vector.load %arg8[%c0_27, %c0_28] : memref<1x32xf32, #tpu.memory_space<vmem>>, vector<1x32xf32>
      %48 = vector.broadcast %47 : vector<1x32xf32> to vector<128x32xf32>
      %49 = arith.addf %46, %48 : vector<128x32xf32>
      %c0_29 = arith.constant 0 : index
      %c0_30 = arith.constant 0 : index
      %50 = vector.load %arg9[%c0_29, %c0_30] : memref<128x32xf32, #tpu.memory_space<vmem>>, vector<128x32xf32>
      tpu.vector_store %arg9[%c0_29, %c0_30], %49 {strides = array<i32>} : memref<128x32xf32, #tpu.memory_space<vmem>>, vector<128x32xf32>,
    } else {
    }
    return
  }
  func.func @transform_0(%arg0: i32, %arg1: i32) -> (i32, i32) {
    %c0_i32 = arith.constant 0 : i32
    %c0_i32_0 = arith.constant 0 : i32
    return %arg0, %c0_i32 : i32, i32
  }
  func.func @transform_1(%arg0: i32, %arg1: i32) -> (i32, i32) {
    %c0_i32 = arith.constant 0 : i32
    %c0_i32_0 = arith.constant 0 : i32
    return %c0_i32, %arg1 : i32, i32
  }
  func.func @transform_2(%arg0: i32, %arg1: i32) -> (i32, i32) {
    %c0_i32 = arith.constant 0 : i32
    %c0_i32_0 = arith.constant 0 : i32
    return %c0_i32, %arg1 : i32, i32
  }
  func.func @transform_3(%arg0: i32, %arg1: i32) -> (i32, i32) {
    %c0_i32 = arith.constant 0 : i32
    %c0_i32_0 = arith.constant 0 : i32
    return %arg1, %c0_i32 : i32, i32
  }
  func.func @transform_4(%arg0: i32, %arg1: i32) -> (i32, i32) {
    %c0_i32 = arith.constant 0 : i32
    %c0_i32_0 = arith.constant 0 : i32
    %c0_i32_1 = arith.constant 0 : i32
    return %c0_i32, %c0_i32_0 : i32, i32
  }
  func.func @transform_5(%arg0: i32, %arg1: i32) -> (i32, i32) {
    %c0_i32 = arith.constant 0 : i32
    %c0_i32_0 = arith.constant 0 : i32
    %c0_i32_1 = arith.constant 0 : i32
    return %c0_i32, %c0_i32_0 : i32, i32
  }
  func.func @transform_6(%arg0: i32, %arg1: i32) -> (i32, i32) {
    %c0_i32 = arith.constant 0 : i32
    %c0_i32_0 = arith.constant 0 : i32
    %c0_i32_1 = arith.constant 0 : i32
    return %c0_i32, %c0_i32_0 : i32, i32
  }
  func.func @transform_7(%arg0: i32, %arg1: i32) -> (i32, i32) {
    %c0_i32 = arith.constant 0 : i32
    %c0_i32_0 = arith.constant 0 : i32
    return %arg0, %c0_i32 : i32, i32
  }
}

</mosaic_0001>

<bundles_post_ra>
// kernel: swin3d_encoder_forward.15
= control target key start
LH: loop header
LB: loop body
LE: loop exit
PB: predicated region body
PF: predicated region fallthrough
CT: control target
= control target key end

     0   :  { %vm106_vm0 = vcmask 441344   ;;  %vm131_vm1 = vcmask 1042432   ;;  %vm232_vm2 = vcmask 261120   ;;  %s463_s1 = inlined_call_operand.vmem [shape: bf16[54,32], index: 1, kind: input, shape index: {}]   ;;  %s464_s0 = inlined_call_operand.vmem [shape: bf16[128,54], index: 0, kind: input, shape index: {}]   ;;  %s465_s2 = inlined_call_operand.vmem [shape: f32[1,32], index: 2, kind: input, shape index: {}]   ;;  %s466_s3 = inlined_call_operand.vmem [shape: f32[128,32], index: 3, kind: output, shape index: {}]  }
   0x1   :  { %v320_v0 = vld [vmem:[%s463_s1] sm:$0xff]   ;;  %v321_v1 = vld [vmem:[%s463_s1 + $0x8] sm:$0xff]   ;;  %v322_v2 = vld [vmem:[%s463_s1 + $0x10] sm:$0xff]  }
   0x2   :  { %286 = vmatprep.subr.bf16.mxu0 %v320_v0  ;;  %310 = vmatprep.subr.bf16.mxu1 %v320_v0  ;;  %v324_v3 = vld [vmem:[%s464_s0] sm:$0xff]   ;;  %v323_v5 = vld [vmem:[%s463_s1 + $0x18] ss:$0 sps:$4 sm:$0x77]   ;;  %v326_v7 = vld [vmem:[%s464_s0 + $0x8] sm:$0xff]  }
   0x3   :  { %287 = vmatpush3.bf16.msra.mxu0 %v320_v0  ;;  %314 = vmatpush3.bf16.msra.mxu1 %v320_v0  ;;  %v325_v4 = vld [vmem:[%s464_s0 + $0x20] sm:$0xff]   ;;  %v133_v6 = vsel %vm131_vm1, %v323_v5, 0  ;;  %v327_v8 = vld [vmem:[%s464_s0 + $0x28] sm:$0xff]   ;;  %v328_v9 = vld [vmem:[%s464_s0 + $0x10] sm:$0xff]  }
   0x4   :  { %288 = vmatprep.subr.bf16.mxu0 %v321_v1  ;;  %311 = vmatprep.subr.bf16.mxu1 %v321_v1  ;;  %v329_v10 = vld [vmem:[%s464_s0 + $0x30] sm:$0xff]   ;;  %v330_v11 = vld [vmem:[%s464_s0 + $0x18] sm:$0xff]   ;;  %v253_v13 = vld [vmem:[%s465_s2] ss:$0 sm:$0xff] }
   0x5   :  { %294 = vmatprep.mubr.msk.bf16.mxu0 %vm106_vm0, %v324_v3  ;;  %302 = vmatprep.mubr.msk.bf16.mxu1 %vm106_vm0, %v325_v4  ;;  %v331_v12 = vld [vmem:[%s464_s0 + $0x38] sm:$0xff]  }
   0x7   :  { %289 = vmatpush3.bf16.msra.mxu0 %v321_v1  ;;  %315 = vmatpush3.bf16.msra.mxu1 %v321_v1 }
   0x8   :  { %290 = vmatprep.subr.bf16.mxu0 %v322_v2  ;;  %312 = vmatprep.subr.bf16.mxu1 %v322_v2 }
   0xb   :  { %291 = vmatpush3.bf16.msra.mxu0 %v322_v2  ;;  %316 = vmatpush3.bf16.msra.mxu1 %v322_v2 }
   0xc   :  { %318 = vmatprep.subr.msk.bf16.mxu0 %vm131_vm1, %v323_v5  ;;  %319 = vmatprep.subr.msk.bf16.mxu1 %vm131_vm1, %v323_v5 }
   0xf   :  { %293 = vmatpush3.bf16.msra.mxu0 %v133_v6  ;;  %317 = vmatpush3.bf16.msra.mxu1 %v133_v6 }
  0x12   :  { %295 = vmatmul.mubr.msk.bf16.vlgmr.msra.gmra.mrb[0].mxu0 %vm106_vm0, %v326_v7  ;;  %303 = vmatmul.mubr.msk.bf16.vlgmr.msra.gmra.mrb[0].mxu1 %vm106_vm0, %v327_v8 }
  0x13   :  { %298 = vmatprep.mubr.msk.bf16.mxu0 %vm106_vm0, %v328_v9  ;;  %306 = vmatprep.mubr.msk.bf16.mxu1 %vm106_vm0, %v329_v10 }
  0x1a   :  { %299 = vmatmul.mubr.msk.bf16.gmra.mrb[4].mxu0 %vm106_vm0, %v330_v11  ;;  %307 = vmatmul.mubr.msk.bf16.gmra.mrb[4].mxu1 %vm106_vm0, %v331_v12 }
  0xe5   :  { %v296_v14 = vpop.f32.mrb[0].mxu0  ;;  %v304_v15 = vpop.f32.mrb[0].mxu1 }
  0xe6   :  { %v178_v16 = vadd.f32 %v296_v14, %v253_v13  ;;  %v210_v17 = vadd.f32 %v304_v15, %v253_v13  ;;  %v169_v18 = vpop.f32.mrb[1].mxu0  ;;  %v201_v19 = vpop.f32.mrb[1].mxu1 }
  0xe7   :  { %v170_v20 = vadd.f32 %v253_v13, %v169_v18  ;;  %v202_v21 = vadd.f32 %v253_v13, %v201_v19  ;;  %v297_v22 = vpop.f32.mrb[2].mxu0  ;;  %v305_v23 = vpop.f32.mrb[2].mxu1 }
  0xe8   :  { %235 = vst.msk [vmem:[%s466_s3 + $0x10] sm:$0xff] %vm232_vm2, %v178_v16  ;;  %243 = vst.msk [vmem:[%s466_s3 + $0x50] sm:$0xff] %vm232_vm2, %v210_v17  ;;  %v181_v24 = vadd.f32 %v297_v22, %v253_v13  ;;  %v213_v25 = vadd.f32 %v305_v23, %v253_v13  ;;  %v172_v26 = vpop.f32.mrb[3].mxu0  ;;  %v204_v27 = vpop.f32.mrb[3].mxu1 }
  0xe9   :  { %233 = vst.msk [vmem:[%s466_s3] sm:$0xff] %vm232_vm2, %v170_v20  ;;  %241 = vst.msk [vmem:[%s466_s3 + $0x40] sm:$0xff] %vm232_vm2, %v202_v21  ;;  %v173_v28 = vadd.f32 %v253_v13, %v172_v26  ;;  %v205_v29 = vadd.f32 %v253_v13, %v204_v27 }
  0xea   :  { %236 = vst.msk [vmem:[%s466_s3 + $0x18] sm:$0xff] %vm232_vm2, %v181_v24  ;;  %244 = vst.msk [vmem:[%s466_s3 + $0x58] sm:$0xff] %vm232_vm2, %v213_v25 }
  0xeb   :  { %234 = vst.msk [vmem:[%s466_s3 + $0x8] sm:$0xff] %vm232_vm2, %v173_v28  ;;  %242 = vst.msk [vmem:[%s466_s3 + $0x48] sm:$0xff] %vm232_vm2, %v205_v29 }
  0xed   :  { %v300_v30 = vpop.f32.mrb[4].mxu0  ;;  %v308_v31 = vpop.f32.mrb[4].mxu1 }
  0xee   :  { %v194_v32 = vadd.f32 %v300_v30, %v253_v13  ;;  %v226_v33 = vadd.f32 %v308_v31, %v253_v13  ;;  %v185_v34 = vpop.f32.mrb[5].mxu0  ;;  %v217_v35 = vpop.f32.mrb[5].mxu1 }
  0xef   :  { %v186_v36 = vadd.f32 %v253_v13, %v185_v34  ;;  %v218_v37 = vadd.f32 %v253_v13, %v217_v35  ;;  %v301_v38 = vpop.f32.mrb[6].mxu0  ;;  %v309_v39 = vpop.f32.mrb[6].mxu1 }
  0xf0   :  { %239 = vst.msk [vmem:[%s466_s3 + $0x30] sm:$0xff] %vm232_vm2, %v194_v32  ;;  %247 = vst.msk [vmem:[%s466_s3 + $0x70] sm:$0xff] %vm232_vm2, %v226_v33  ;;  %v197_v40 = vadd.f32 %v301_v38, %v253_v13  ;;  %v229_v41 = vadd.f32 %v309_v39, %v253_v13  ;;  %v188_v42 = vpop.f32.mrb[7].mxu0  ;;  %v220_v43 = vpop.f32.mrb[7].mxu1 }
  0xf1   :  { %237 = vst.msk [vmem:[%s466_s3 + $0x20] sm:$0xff] %vm232_vm2, %v186_v36  ;;  %245 = vst.msk [vmem:[%s466_s3 + $0x60] sm:$0xff] %vm232_vm2, %v218_v37  ;;  %v189_v44 = vadd.f32 %v253_v13, %v188_v42  ;;  %v221_v45 = vadd.f32 %v253_v13, %v220_v43 }
  0xf2   :  { %240 = vst.msk [vmem:[%s466_s3 + $0x38] sm:$0xff] %vm232_vm2, %v197_v40  ;;  %248 = vst.msk [vmem:[%s466_s3 + $0x78] sm:$0xff] %vm232_vm2, %v229_v41 }
  0xf3   :  { %238 = vst.msk [vmem:[%s466_s3 + $0x28] sm:$0xff] %vm232_vm2, %v189_v44  ;;  %246 = vst.msk [vmem:[%s466_s3 + $0x68] sm:$0xff] %vm232_vm2, %v221_v45 }

// kernel: swin3d_encoder_forward.16
= control target key start
LH: loop header
LB: loop body
LE: loop exit
PB: predicated region body
PF: predicated region fallthrough
CT: control target
= control target key end

     0   :  { %vm30_vm0 = vcmask 261120   ;;  %s666_s0 = inlined_call_operand.vmem [shape: f32[128,32], index: 0, kind: input, shape index: {}]   ;;  %s667_s1 = inlined_call_operand.vmem [shape: f32[1,32], index: 1, kind: input, shape index: {}]   ;;  %s668_s2 = inlined_call_operand.vmem [shape: f32[1,32], index: 2, kind: input, shape index: {}]   ;;  %s669_s3 = inlined_call_operand.vmem [shape: f32[128,32], index: 3, kind: output, shape index: {}]  }
   0x1   :  { %v14_v0 = vld [vmem:[%s666_s0] sm:$0xff]  ;;  %v16_v1 = vld [vmem:[%s666_s0 + $0x10] sm:$0xff]  ;;  %v15_v2 = vld [vmem:[%s666_s0 + $0x8] sm:$0xff] }
   0x2   :  { %v31_v3 = vsel %vm30_vm0, %v14_v0, 0.0  ;;  %v37_v4 = vsel %vm30_vm0, %v16_v1, 0.0  ;;  %v17_v5 = vld [vmem:[%s666_s0 + $0x18] sm:$0xff]  ;;  %v34_v6 = vsel %vm30_vm0, %v15_v2, 0.0  ;;  %v18_v8 = vld [vmem:[%s666_s0 + $0x20] sm:$0xff]  ;;  %v19_v9 = vld [vmem:[%s666_s0 + $0x28] sm:$0xff] }
   0x3   :  { %32 = vadd.xlane.f32.xlu0 %v31_v3  ;;  %38 = vadd.xlane.f32.xlu1 %v37_v4  ;;  %v40_v7 = vsel %vm30_vm0, %v17_v5, 0.0  ;;  %v43_v10 = vsel %vm30_vm0, %v18_v8, 0.0  ;;  %v46_v11 = vsel %vm30_vm0, %v19_v9, 0.0  ;;  %v387_v12 = vld [vmem:[%s666_s0 + $0x30] sm:$0xff]  ;;  %v392_v13 = vld [vmem:[%s666_s0 + $0x38] sm:$0xff]  ;;  %v401_v16 = vld [vmem:[%s666_s0 + $0x40] sm:$0xff] }
   0x4   :  { %v49_v14 = vsel %vm30_vm0, %v387_v12, 0.0  ;;  %v52_v15 = vsel %vm30_vm0, %v392_v13, 0.0  ;;  %v406_v17 = vld [vmem:[%s666_s0 + $0x48] sm:$0xff]  ;;  %v55_v18 = vsel %vm30_vm0, %v401_v16, 0.0  ;;  %v415_v20 = vld [vmem:[%s666_s0 + $0x50] sm:$0xff]  ;;  %v420_v21 = vld [vmem:[%s666_s0 + $0x58] sm:$0xff] }
   0x5   :  { %v58_v19 = vsel %vm30_vm0, %v406_v17, 0.0  ;;  %v61_v22 = vsel %vm30_vm0, %v415_v20, 0.0  ;;  %v64_v23 = vsel %vm30_vm0, %v420_v21, 0.0  ;;  %v429_v24 = vld [vmem:[%s666_s0 + $0x60] sm:$0xff]  ;;  %v434_v25 = vld [vmem:[%s666_s0 + $0x68] sm:$0xff]  ;;  %v443_v28 = vld [vmem:[%s666_s0 + $0x70] sm:$0xff] }
   0x6   :  { %v67_v26 = vsel %vm30_vm0, %v429_v24, 0.0  ;;  %v70_v27 = vsel %vm30_vm0, %v434_v25, 0.0  ;;  %v448_v29 = vld [vmem:[%s666_s0 + $0x78] sm:$0xff]  ;;  %v73_v30 = vsel %vm30_vm0, %v443_v28, 0.0 }
   0x7   :  { %35 = vadd.xlane.f32.xlu0 %v34_v6  ;;  %41 = vadd.xlane.f32.xlu1 %v40_v7  ;;  %v76_v31 = vsel %vm30_vm0, %v448_v29, 0.0 }
   0xb   :  { %44 = vadd.xlane.f32.xlu0 %v43_v10  ;;  %47 = vadd.xlane.f32.xlu1 %v46_v11 }
   0xf   :  { %50 = vadd.xlane.f32.xlu0 %v49_v14  ;;  %53 = vadd.xlane.f32.xlu1 %v52_v15 }
  0x13   :  { %56 = vadd.xlane.f32.xlu0 %v55_v18  ;;  %59 = vadd.xlane.f32.xlu1 %v58_v19 }
  0x17   :  { %62 = vadd.xlane.f32.xlu0 %v61_v22  ;;  %65 = vadd.xlane.f32.xlu1 %v64_v23 }
  0x1b   :  { %68 = vadd.xlane.f32.xlu0 %v67_v26  ;;  %71 = vadd.xlane.f32.xlu1 %v70_v27 }
  0x1f   :  { %74 = vadd.xlane.f32.xlu0 %v73_v30  ;;  %77 = vadd.xlane.f32.xlu1 %v76_v31 }
  0x90   :  { %v33_v32 = vpop.xlane.xlu0 %32  ;;  %v39_v33 = vpop.xlane.xlu1 %38 }
  0x91   :  { %v80_v34 = vmul.f32 0.03125, %v33_v32  ;;  %v82_v35 = vmul.f32 0.03125, %v39_v33 }
  0x93   :  { %v454_v36 = vsub.f32 %v14_v0, %v80_v34  ;;  %v456_v37 = vsub.f32 %v16_v1, %v82_v35 }
  0x94   :  { %v36_v38 = vpop.xlane.xlu0 %35  ;;  %v42_v39 = vpop.xlane.xlu1 %41 }
  0x95   :  { %v81_v40 = vmul.f32 0.03125, %v36_v38  ;;  %v83_v41 = vmul.f32 0.03125, %v42_v39  ;;  %v112_v42 = vmul.f32 %v454_v36, %v454_v36  ;;  %v114_v43 = vmul.f32 %v456_v37, %v456_v37 }
  0x97   :  { %v462_v44 = vsub.f32 %v15_v2, %v81_v40  ;;  %v464_v45 = vsub.f32 %v17_v5, %v83_v41  ;;  %v128_v46 = vsel %vm30_vm0, %v112_v42, 0.0  ;;  %v134_v49 = vsel %vm30_vm0, %v114_v43, 0.0 }
  0x98   :  { %129 = vadd.xlane.f32.xlu0 %v128_v46  ;;  %v45_v47 = vpop.xlane.xlu0 %44  ;;  %v48_v48 = vpop.xlane.xlu1 %47 }
  0x99   :  { %v84_v50 = vmul.f32 0.03125, %v45_v47  ;;  %v85_v51 = vmul.f32 0.03125, %v48_v48  ;;  %v113_v52 = vmul.f32 %v462_v44, %v462_v44  ;;  %v115_v53 = vmul.f32 %v464_v45, %v464_v45 }
  0x9b   :  { %v472_v54 = vsub.f32 %v18_v8, %v84_v50  ;;  %v474_v55 = vsub.f32 %v19_v9, %v85_v51  ;;  %v131_v56 = vsel %vm30_vm0, %v113_v52, 0.0  ;;  %v137_v59 = vsel %vm30_vm0, %v115_v53, 0.0 }
  0x9c   :  { %135 = vadd.xlane.f32.xlu0 %v134_v49  ;;  %132 = vadd.xlane.f32.xlu1 %v131_v56  ;;  %v51_v57 = vpop.xlane.xlu0 %50  ;;  %v54_v58 = vpop.xlane.xlu1 %53 }
  0x9d   :  { %v86_v60 = vmul.f32 0.03125, %v51_v57  ;;  %v87_v61 = vmul.f32 0.03125, %v54_v58  ;;  %v116_v62 = vmul.f32 %v472_v54, %v472_v54  ;;  %v117_v63 = vmul.f32 %v474_v55, %v474_v55 }
  0x9f   :  { %v483_v0 = vsub.f32 %v387_v12, %v86_v60  ;;  %v486_v1 = vsub.f32 %v392_v13, %v87_v61  ;;  %v140_v2 = vsel %vm30_vm0, %v116_v62, 0.0  ;;  %v143_v5 = vsel %vm30_vm0, %v117_v63, 0.0 }
  0xa0   :  { %138 = vadd.xlane.f32.xlu1 %v137_v59  ;;  %141 = vadd.xlane.f32.xlu0 %v140_v2  ;;  %v57_v3 = vpop.xlane.xlu0 %56  ;;  %v60_v4 = vpop.xlane.xlu1 %59 }
  0xa1   :  { %v88_v6 = vmul.f32 0.03125, %v57_v3  ;;  %v89_v7 = vmul.f32 0.03125, %v60_v4  ;;  %v118_v8 = vmul.f32 %v483_v0, %v483_v0  ;;  %v119_v9 = vmul.f32 %v486_v1, %v486_v1 }
  0xa3   :  { %v495_v10 = vsub.f32 %v401_v16, %v88_v6  ;;  %v498_v11 = vsub.f32 %v406_v17, %v89_v7  ;;  %v146_v12 = vsel %vm30_vm0, %v118_v8, 0.0  ;;  %v149_v15 = vsel %vm30_vm0, %v119_v9, 0.0 }
  0xa4   :  { %144 = vadd.xlane.f32.xlu1 %v143_v5  ;;  %147 = vadd.xlane.f32.xlu0 %v146_v12  ;;  %v63_v13 = vpop.xlane.xlu0 %62  ;;  %v66_v14 = vpop.xlane.xlu1 %65 }
  0xa5   :  { %v90_v18 = vmul.f32 0.03125, %v63_v13  ;;  %v91_v19 = vmul.f32 0.03125, %v66_v14  ;;  %v120_v22 = vmul.f32 %v495_v10, %v495_v10  ;;  %v121_v16 = vmul.f32 %v498_v11, %v498_v11  ;;  %v547_v14 = vld [vmem:[%s667_s1] ss:$0 sm:$0xff] }
  0xa7   :  { %v507_v23 = vsub.f32 %v415_v20, %v90_v18  ;;  %v510_v17 = vsub.f32 %v420_v21, %v91_v19  ;;  %v152_v26 = vsel %vm30_vm0, %v120_v22, 0.0  ;;  %v155_v31 = vsel %vm30_vm0, %v121_v16, 0.0 }
  0xa8   :  { %150 = vadd.xlane.f32.xlu1 %v149_v15  ;;  %153 = vadd.xlane.f32.xlu0 %v152_v26  ;;  %v69_v27 = vpop.xlane.xlu0 %68  ;;  %v72_v30 = vpop.xlane.xlu1 %71  ;;  %v553_v26 = vld [vmem:[%s668_s2] ss:$0 sm:$0xff] }
  0xa9   :  { %v92_v32 = vmul.f32 0.03125, %v69_v27  ;;  %v93_v33 = vmul.f32 0.03125, %v72_v30  ;;  %v122_v34 = vmul.f32 %v507_v23, %v507_v23  ;;  %v123_v20 = vmul.f32 %v510_v17, %v510_v17 }
  0xab   :  { %v519_v35 = vsub.f32 %v429_v24, %v92_v32  ;;  %v522_v21 = vsub.f32 %v434_v25, %v93_v33  ;;  %v158_v38 = vsel %vm30_vm0, %v122_v34, 0.0  ;;  %v161_v41 = vsel %vm30_vm0, %v123_v20, 0.0 }
  0xac   :  { %156 = vadd.xlane.f32.xlu1 %v155_v31  ;;  %159 = vadd.xlane.f32.xlu0 %v158_v38  ;;  %v75_v39 = vpop.xlane.xlu0 %74  ;;  %v78_v40 = vpop.xlane.xlu1 %77 }
  0xad   :  { %v94_v42 = vmul.f32 0.03125, %v75_v39  ;;  %v95_v43 = vmul.f32 0.03125, %v78_v40  ;;  %v124_v46 = vmul.f32 %v519_v35, %v519_v35  ;;  %v125_v24 = vmul.f32 %v522_v21, %v522_v21 }
  0xaf   :  { %v531_v47 = vsub.f32 %v443_v28, %v94_v42  ;;  %v534_v25 = vsub.f32 %v448_v29, %v95_v43  ;;  %v164_v48 = vsel %vm30_vm0, %v124_v46, 0.0  ;;  %v167_v49 = vsel %vm30_vm0, %v125_v24, 0.0 }
  0xb0   :  { %162 = vadd.xlane.f32.xlu1 %v161_v41  ;;  %165 = vadd.xlane.f32.xlu0 %v164_v48 }
  0xb1   :  { %v126_v50 = vmul.f32 %v531_v47, %v531_v47  ;;  %v127_v51 = vmul.f32 %v534_v25, %v534_v25 }
  0xb3   :  { %v170_v52 = vsel %vm30_vm0, %v126_v50, 0.0  ;;  %v173_v28 = vsel %vm30_vm0, %v127_v51, 0.0 }
  0xb4   :  { %168 = vadd.xlane.f32.xlu1 %v167_v49  ;;  %171 = vadd.xlane.f32.xlu0 %v170_v52 }
  0xb8   :  { %174 = vadd.xlane.f32.xlu1 %v173_v28 }
 0x125   :  { %v130_v29 = vpop.xlane.xlu0 %129 }
 0x126   :  { %v176_v53 = vmul.f32 0.03125, %v130_v29 }
 0x128   :  { %v192_v56 = vadd.f32 1e-05, %v176_v53 }
 0x129   :  { %v133_v57 = vpop.xlane.xlu1 %132  ;;  %v136_v58 = vpop.xlane.xlu0 %135 }
 0x12a   :  { %308 = vrsqrt.f32 %v192_v56  ;;  %v177_v59 = vmul.f32 0.03125, %v133_v57  ;;  %v178_v60 = vmul.f32 0.03125, %v136_v58 }
 0x12c   :  { %v193_v61 = vadd.f32 1e-05, %v177_v59  ;;  %v194_v62 = vadd.f32 1e-05, %v178_v60 }
 0x12d   :  { %v139_v63 = vpop.xlane.xlu1 %138  ;;  %v142_v2 = vpop.xlane.xlu0 %141 }
 0x12e   :  { %310 = vrsqrt.f32 %v193_v61  ;;  %v179_v3 = vmul.f32 0.03125, %v139_v63  ;;  %v180_v4 = vmul.f32 0.03125, %v142_v2 }
 0x12f   :  { %312 = vrsqrt.f32 %v194_v62 }
 0x130   :  { %v195_v5 = vadd.f32 1e-05, %v179_v3  ;;  %v196_v6 = vadd.f32 1e-05, %v180_v4 }
 0x131   :  { %v145_v7 = vpop.xlane.xlu1 %144  ;;  %v148_v8 = vpop.xlane.xlu0 %147 }
 0x132   :  { %314 = vrsqrt.f32 %v195_v5  ;;  %v181_v9 = vmul.f32 0.03125, %v145_v7  ;;  %v182_v12 = vmul.f32 0.03125, %v148_v8 }
 0x133   :  { %316 = vrsqrt.f32 %v196_v6 }
 0x134   :  { %v309_v13 = vpop.eup %308  ;;  %v197_v15 = vadd.f32 1e-05, %v181_v9  ;;  %v198_v18 = vadd.f32 1e-05, %v182_v12 }
 0x135   :  { %v224_v19 = vmul.f32 %v309_v13, %v454_v36  ;;  %v151_v22 = vpop.xlane.xlu1 %150  ;;  %v154_v16 = vpop.xlane.xlu0 %153 }
 0x136   :  { %318 = vrsqrt.f32 %v197_v15  ;;  %v183_v27 = vmul.f32 0.03125, %v151_v22  ;;  %v184_v30 = vmul.f32 0.03125, %v154_v16 }
 0x137   :  { %v247_v31 = vmul.f32 %v547_v14, %v224_v19  ;;  %320 = vrsqrt.f32 %v198_v18 }
 0x138   :  { %v311_v32 = vpop.eup %310  ;;  %v199_v33 = vadd.f32 1e-05, %v183_v27  ;;  %v200_v34 = vadd.f32 1e-05, %v184_v30 }
 0x139   :  { %v313_v20 = vpop.eup %312  ;;  %v270_v38 = vadd.f32 %v553_v26, %v247_v31  ;;  %v225_v36 = vmul.f32 %v311_v32, %v462_v44  ;;  %v157_v39 = vpop.xlane.xlu1 %156 }
 0x13a   :  { %v160_v40 = vpop.xlane.xlu0 %159  ;;  %v226_v41 = vmul.f32 %v313_v20, %v456_v37  ;;  %322 = vrsqrt.f32 %v199_v33  ;;  %v185_v42 = vmul.f32 0.03125, %v157_v39 }
 0x13b   :  { %v186_v43 = vmul.f32 0.03125, %v160_v40  ;;  %286 = vst.msk [vmem:[%s669_s3] sm:$0xff] %vm30_vm0, %v270_v38  ;;  %v248_v46 = vmul.f32 %v547_v14, %v225_v36  ;;  %324 = vrsqrt.f32 %v200_v34 }
 0x13c   :  { %v315_v24 = vpop.eup %314  ;;  %v249_v48 = vmul.f32 %v547_v14, %v226_v41  ;;  %v201_v49 = vadd.f32 1e-05, %v185_v42 }
 0x13d   :  { %v202_v44 = vadd.f32 1e-05, %v186_v43  ;;  %v317_v50 = vpop.eup %316  ;;  %v271_v51 = vadd.f32 %v553_v26, %v248_v46  ;;  %v227_v37 = vmul.f32 %v315_v24, %v464_v45  ;;  %v163_v52 = vpop.xlane.xlu1 %162 }
 0x13e   :  { %v166_v28 = vpop.xlane.xlu0 %165  ;;  %v272_v29 = vadd.f32 %v553_v26, %v249_v48  ;;  %v228_v53 = vmul.f32 %v317_v50, %v472_v54  ;;  %326 = vrsqrt.f32 %v201_v49  ;;  %v187_v56 = vmul.f32 0.03125, %v163_v52 }
 0x13f   :  { %287 = vst.msk [vmem:[%s669_s3 + $0x8] sm:$0xff] %vm30_vm0, %v271_v51  ;;  %v250_v57 = vmul.f32 %v547_v14, %v227_v37  ;;  %328 = vrsqrt.f32 %v202_v44  ;;  %v188_v58 = vmul.f32 0.03125, %v166_v28 }
 0x140   :  { %v319_v59 = vpop.eup %318  ;;  %288 = vst.msk [vmem:[%s669_s3 + $0x10] sm:$0xff] %vm30_vm0, %v272_v29  ;;  %v251_v45 = vmul.f32 %v547_v14, %v228_v53  ;;  %v203_v54 = vadd.f32 1e-05, %v187_v56 }
 0x141   :  { %v321_v60 = vpop.eup %320  ;;  %v273_v61 = vadd.f32 %v553_v26, %v250_v57  ;;  %v229_v62 = vmul.f32 %v319_v59, %v474_v55  ;;  %v204_v63 = vadd.f32 1e-05, %v188_v58  ;;  %v169_v2 = vpop.xlane.xlu1 %168 }
 0x142   :  { %v172_v3 = vpop.xlane.xlu0 %171  ;;  %v274_v4 = vadd.f32 %v553_v26, %v251_v45  ;;  %v230_v5 = vmul.f32 %v321_v60, %v483_v0  ;;  %330 = vrsqrt.f32 %v203_v54  ;;  %v189_v6 = vmul.f32 0.03125, %v169_v2 }
 0x143   :  { %289 = vst.msk [vmem:[%s669_s3 + $0x18] sm:$0xff] %vm30_vm0, %v273_v61  ;;  %v252_v7 = vmul.f32 %v547_v14, %v229_v62  ;;  %332 = vrsqrt.f32 %v204_v63  ;;  %v190_v8 = vmul.f32 0.03125, %v172_v3 }
 0x144   :  { %v323_v9 = vpop.eup %322  ;;  %290 = vst.msk [vmem:[%s669_s3 + $0x20] sm:$0xff] %vm30_vm0, %v274_v4  ;;  %v253_v55 = vmul.f32 %v547_v14, %v230_v5  ;;  %v205_v0 = vadd.f32 1e-05, %v189_v6 }
 0x145   :  { %v325_v12 = vpop.eup %324  ;;  %v275_v13 = vadd.f32 %v553_v26, %v252_v7  ;;  %v231_v15 = vmul.f32 %v323_v9, %v486_v1  ;;  %v206_v18 = vadd.f32 1e-05, %v190_v8  ;;  %v175_v19 = vpop.xlane.xlu1 %174 }
 0x146   :  { %v276_v22 = vadd.f32 %v553_v26, %v253_v55  ;;  %v232_v16 = vmul.f32 %v325_v12, %v495_v10  ;;  %334 = vrsqrt.f32 %v205_v0  ;;  %v191_v27 = vmul.f32 0.03125, %v175_v19 }
 0x147   :  { %291 = vst.msk [vmem:[%s669_s3 + $0x28] sm:$0xff] %vm30_vm0, %v275_v13  ;;  %v254_v30 = vmul.f32 %v547_v14, %v231_v15  ;;  %336 = vrsqrt.f32 %v206_v18 }
 0x148   :  { %v327_v31 = vpop.eup %326  ;;  %292 = vst.msk [vmem:[%s669_s3 + $0x30] sm:$0xff] %vm30_vm0, %v276_v22  ;;  %v255_v1 = vmul.f32 %v547_v14, %v232_v16  ;;  %v207_v32 = vadd.f32 1e-05, %v191_v27 }
 0x149   :  { %v329_v10 = vpop.eup %328  ;;  %v277_v33 = vadd.f32 %v553_v26, %v254_v30  ;;  %v233_v34 = vmul.f32 %v327_v31, %v498_v11 }
 0x14a   :  { %v278_v20 = vadd.f32 %v553_v26, %v255_v1  ;;  %v234_v38 = vmul.f32 %v329_v10, %v507_v23  ;;  %338 = vrsqrt.f32 %v207_v32 }
 0x14b   :  { %293 = vst.msk [vmem:[%s669_s3 + $0x38] sm:$0xff] %vm30_vm0, %v277_v33  ;;  %v256_v36 = vmul.f32 %v547_v14, %v233_v34 }
 0x14c   :  { %v331_v39 = vpop.eup %330  ;;  %294 = vst.msk [vmem:[%s669_s3 + $0x40] sm:$0xff] %vm30_vm0, %v278_v20  ;;  %v257_v11 = vmul.f32 %v547_v14, %v234_v38 }
 0x14d   :  { %v333_v40 = vpop.eup %332  ;;  %v279_v41 = vadd.f32 %v553_v26, %v256_v36  ;;  %v235_v23 = vmul.f32 %v331_v39, %v510_v17 }
 0x14e   :  { %v280_v42 = vadd.f32 %v553_v26, %v257_v11  ;;  %v236_v43 = vmul.f32 %v333_v40, %v519_v35 }
 0x14f   :  { %295 = vst.msk [vmem:[%s669_s3 + $0x48] sm:$0xff] %vm30_vm0, %v279_v41  ;;  %v258_v46 = vmul.f32 %v547_v14, %v235_v23 }
 0x150   :  { %v335_v24 = vpop.eup %334  ;;  %296 = vst.msk [vmem:[%s669_s3 + $0x50] sm:$0xff] %vm30_vm0, %v280_v42  ;;  %v259_v48 = vmul.f32 %v547_v14, %v236_v43 }
 0x151   :  { %v337_v17 = vpop.eup %336  ;;  %v281_v49 = vadd.f32 %v553_v26, %v258_v46  ;;  %v237_v35 = vmul.f32 %v335_v24, %v522_v21 }
 0x152   :  { %v282_v44 = vadd.f32 %v553_v26, %v259_v48  ;;  %v238_v50 = vmul.f32 %v337_v17, %v531_v47 }
 0x153   :  { %297 = vst.msk [vmem:[%s669_s3 + $0x58] sm:$0xff] %vm30_vm0, %v281_v49  ;;  %v260_v51 = vmul.f32 %v547_v14, %v237_v35 }
 0x154   :  { %v339_v37 = vpop.eup %338  ;;  %298 = vst.msk [vmem:[%s669_s3 + $0x60] sm:$0xff] %vm30_vm0, %v282_v44  ;;  %v261_v52 = vmul.f32 %v547_v14, %v238_v50 }
 0x155   :  { %v283_v21 = vadd.f32 %v553_v26, %v260_v51  ;;  %v239_v28 = vmul.f32 %v339_v37, %v534_v25 }
 0x156   :  { %v284_v47 = vadd.f32 %v553_v26, %v261_v52 }
 0x157   :  { %299 = vst.msk [vmem:[%s669_s3 + $0x68] sm:$0xff] %vm30_vm0, %v283_v21  ;;  %v262_v29 = vmul.f32 %v547_v14, %v239_v28 }
 0x158   :  { %300 = vst.msk [vmem:[%s669_s3 + $0x70] sm:$0xff] %vm30_vm0, %v284_v47 }
 0x159   :  { %v285_v53 = vadd.f32 %v553_v26, %v262_v29 }
 0x15b   :  { %301 = vst.msk [vmem:[%s669_s3 + $0x78] sm:$0xff] %vm30_vm0, %v285_v53 }

// kernel: swin3d_encoder_forward.18
= control target key start
LH: loop header
LB: loop body
LE: loop exit
PB: predicated region body
PF: predicated region fallthrough
CT: control target
= control target key end

     0   :  { %vm96_vm0 = vcmask 261120   ;;  %s1069_s2 = inlined_call_operand.vmem [shape: bf16[32,32], index: 2, kind: input, shape index: {}]   ;;  %s1070_s0 = inlined_call_operand.vmem [shape: bf16[128,32], index: 0, kind: input, shape index: {}]   ;;  %s1071_s1 = inlined_call_operand.vmem [shape: f32[128,32], index: 1, kind: input, shape index: {}]   ;;  %s1072_s3 = inlined_call_operand.vmem [shape: f32[1,32], index: 3, kind: input, shape index: {}]   ;;  %s1073_s4 = inlined_call_operand.vmem [shape: f32[1,32], index: 4, kind: input, shape index: {}]   ;;  %s1074_s5 = inlined_call_operand.vmem [shape: f32[1,32], index: 5, kind: input, shape index: {}]   ;;  %s1075_s6 = inlined_call_operand.vmem [shape: f32[128,32], index: 6, kind: output, shape index: {}]  }
   0x1   :  { %v603_v0 = vld [vmem:[%s1069_s2] sm:$0xff]   ;;  %v604_v1 = vld [vmem:[%s1069_s2 + $0x8] sm:$0xff]   ;;  %v609_v6 = vld [vmem:[%s1070_s0 + $0x10] sm:$0xff]  }
   0x2   :  { %579 = vmatprep.subr.bf16.mxu0 %v603_v0  ;;  %599 = vmatprep.subr.bf16.mxu1 %v603_v0  ;;  %v605_v2 = vld [vmem:[%s1070_s0] sm:$0xff]   ;;  %v607_v4 = vld [vmem:[%s1070_s0 + $0x8] sm:$0xff]   ;;  %v611_v7 = vld [vmem:[%s1070_s0 + $0x30] sm:$0xff]  }
   0x3   :  { %580 = vmatpush3.bf16.msra.mxu0 %v603_v0  ;;  %601 = vmatpush3.bf16.msra.mxu1 %v603_v0  ;;  %v606_v3 = vld [vmem:[%s1070_s0 + $0x20] sm:$0xff]   ;;  %v608_v5 = vld [vmem:[%s1070_s0 + $0x28] sm:$0xff]   ;;  %v610_v8 = vld [vmem:[%s1070_s0 + $0x18] sm:$0xff]  }
   0x4   :  { %581 = vmatprep.subr.bf16.mxu0 %v604_v1  ;;  %600 = vmatprep.subr.bf16.mxu1 %v604_v1  ;;  %v612_v9 = vld [vmem:[%s1070_s0 + $0x38] sm:$0xff]   ;;  %v220_v10 = vld [vmem:[%s1071_s1 + $0x10] sm:$0xff]  ;;  %v218_v12 = vld [vmem:[%s1071_s1] sm:$0xff] }
   0x5   :  { %583 = vmatprep.mubr.msk.bf16.mxu0 %vm96_vm0, %v605_v2  ;;  %591 = vmatprep.mubr.msk.bf16.mxu1 %vm96_vm0, %v606_v3  ;;  %v228_v11 = vld [vmem:[%s1071_s1 + $0x50] sm:$0xff]  ;;  %v221_v15 = vld [vmem:[%s1071_s1 + $0x18] sm:$0xff]  ;;  %v733_v16 = vld [vmem:[%s1072_s3] ss:$0 sm:$0xff] }
   0x6   :  { %v226_v21 = vld [vmem:[%s1071_s1 + $0x40] sm:$0xff]  ;;  %v229_v22 = vld [vmem:[%s1071_s1 + $0x58] sm:$0xff]  ;;  %v219_v33 = vld [vmem:[%s1071_s1 + $0x8] sm:$0xff] }
   0x7   :  { %582 = vmatpush3.bf16.msra.mxu0 %v604_v1  ;;  %602 = vmatpush3.bf16.msra.mxu1 %v604_v1  ;;  %v227_v34 = vld [vmem:[%s1071_s1 + $0x48] sm:$0xff]  ;;  %v224_v42 = vld [vmem:[%s1071_s1 + $0x30] sm:$0xff]  ;;  %v225_v43 = vld [vmem:[%s1071_s1 + $0x38] sm:$0xff] }
   0x8   :  { %v222_v61 = vld [vmem:[%s1071_s1 + $0x20] sm:$0xff]  ;;  %v223_v62 = vld [vmem:[%s1071_s1 + $0x28] sm:$0xff] }
   0x9   :  { %v230_v1 = vld [vmem:[%s1071_s1 + $0x60] sm:$0xff]  ;;  %v231_v2 = vld [vmem:[%s1071_s1 + $0x68] sm:$0xff] }
   0xa   :  { %584 = vmatmul.mubr.msk.bf16.vlgmr.msra.gmra.mrb[0].mxu0 %vm96_vm0, %v607_v4  ;;  %592 = vmatmul.mubr.msk.bf16.vlgmr.msra.gmra.mrb[0].mxu1 %vm96_vm0, %v608_v5 }
   0xb   :  { %587 = vmatprep.mubr.msk.bf16.mxu0 %vm96_vm0, %v609_v6  ;;  %595 = vmatprep.mubr.msk.bf16.mxu1 %vm96_vm0, %v611_v7 }
  0x12   :  { %588 = vmatmul.mubr.msk.bf16.gmra.mrb[4].mxu0 %vm96_vm0, %v610_v8  ;;  %596 = vmatmul.mubr.msk.bf16.gmra.mrb[4].mxu1 %vm96_vm0, %v612_v9 }
  0xdd   :  { %v585_v13 = vpop.f32.mrb[0].mxu0  ;;  %v593_v14 = vpop.f32.mrb[0].mxu1 }
  0xde   :  { %v236_v17 = vadd.f32 %v585_v13, %v220_v10  ;;  %v244_v18 = vadd.f32 %v593_v14, %v228_v11  ;;  %v155_v19 = vpop.f32.mrb[1].mxu0  ;;  %v187_v20 = vpop.f32.mrb[1].mxu1  ;;  %v232_v13 = vld [vmem:[%s1071_s1 + $0x70] sm:$0xff]  ;;  %v233_v14 = vld [vmem:[%s1071_s1 + $0x78] sm:$0xff] }
  0xdf   :  { %v234_v23 = vadd.f32 %v218_v12, %v155_v19  ;;  %v586_v24 = vpop.f32.mrb[2].mxu0  ;;  %v594_v25 = vpop.f32.mrb[2].mxu1  ;;  %v242_v31 = vadd.f32 %v226_v21, %v187_v20 }
  0xe0   :  { %v237_v26 = vadd.f32 %v586_v24, %v221_v15  ;;  %v158_v27 = vpop.f32.mrb[3].mxu0  ;;  %v190_v28 = vpop.f32.mrb[3].mxu1  ;;  %v742_v29 = vadd.f32 %v733_v16, %v244_v18  ;;  %v745_v30 = vadd.f32 %v733_v16, %v236_v17  ;;  %v245_v32 = vadd.f32 %v594_v25, %v229_v22 }
  0xe1   :  { %v758_v37 = vadd.f32 %v733_v16, %v234_v23  ;;  %v235_v39 = vadd.f32 %v219_v33, %v158_v27  ;;  %v243_v40 = vadd.f32 %v227_v34, %v190_v28  ;;  %v774_v47 = vadd.f32 %v733_v16, %v242_v31 }
  0xe2   :  { %v303_v35 = vsel %vm96_vm0, %v742_v29, 0.0  ;;  %v279_v36 = vsel %vm96_vm0, %v745_v30, 0.0  ;;  %v761_v38 = vadd.f32 %v733_v16, %v237_v26  ;;  %v777_v48 = vadd.f32 %v733_v16, %v245_v32 }
  0xe3   :  { %304 = vadd.xlane.f32.xlu0 %v303_v35  ;;  %280 = vadd.xlane.f32.xlu1 %v279_v36  ;;  %v273_v45 = vsel %vm96_vm0, %v758_v37, 0.0  ;;  %v297_v57 = vsel %vm96_vm0, %v774_v47, 0.0  ;;  %v784_v59 = vadd.f32 %v733_v16, %v243_v40  ;;  %v787_v60 = vadd.f32 %v733_v16, %v235_v39 }
  0xe4   :  { %v282_v46 = vsel %vm96_vm0, %v761_v38, 0.0  ;;  %v306_v58 = vsel %vm96_vm0, %v777_v48, 0.0 }
  0xe5   :  { %v589_v41 = vpop.f32.mrb[4].mxu0  ;;  %v597_v44 = vpop.f32.mrb[4].mxu1  ;;  %v300_v4 = vsel %vm96_vm0, %v784_v59, 0.0  ;;  %v276_v5 = vsel %vm96_vm0, %v787_v60, 0.0 }
  0xe6   :  { %v171_v49 = vpop.f32.mrb[5].mxu0  ;;  %v203_v50 = vpop.f32.mrb[5].mxu1  ;;  %v240_v53 = vadd.f32 %v589_v41, %v224_v42  ;;  %v248_v18 = vadd.f32 %v597_v44, %v232_v13 }
  0xe7   :  { %274 = vadd.xlane.f32.xlu0 %v273_v45  ;;  %283 = vadd.xlane.f32.xlu1 %v282_v46  ;;  %v590_v51 = vpop.f32.mrb[6].mxu0  ;;  %v598_v52 = vpop.f32.mrb[6].mxu1  ;;  %v238_v3 = vadd.f32 %v222_v61, %v171_v49  ;;  %v246_v7 = vadd.f32 %v230_v1, %v203_v50 }
  0xe8   :  { %v241_v54 = vadd.f32 %v590_v51, %v225_v43  ;;  %v174_v55 = vpop.f32.mrb[7].mxu0  ;;  %v206_v56 = vpop.f32.mrb[7].mxu1  ;;  %v796_v63 = vadd.f32 %v733_v16, %v240_v53  ;;  %v249_v19 = vadd.f32 %v598_v52, %v233_v14  ;;  %v842_v24 = vadd.f32 %v733_v16, %v248_v18 }
  0xe9   :  { %v239_v6 = vadd.f32 %v223_v62, %v174_v55  ;;  %v247_v10 = vadd.f32 %v231_v2, %v206_v56  ;;  %v816_v11 = vadd.f32 %v733_v16, %v238_v3  ;;  %v828_v15 = vadd.f32 %v733_v16, %v246_v7 }
  0xea   :  { %v799_v0 = vadd.f32 %v733_v16, %v241_v54  ;;  %v291_v8 = vsel %vm96_vm0, %v796_v63, 0.0  ;;  %v845_v25 = vadd.f32 %v733_v16, %v249_v19  ;;  %v315_v26 = vsel %vm96_vm0, %v842_v24, 0.0 }
  0xeb   :  { %298 = vadd.xlane.f32.xlu0 %v297_v57  ;;  %307 = vadd.xlane.f32.xlu1 %v306_v58  ;;  %v819_v12 = vadd.f32 %v733_v16, %v239_v6  ;;  %v831_v17 = vadd.f32 %v733_v16, %v247_v10  ;;  %v285_v20 = vsel %vm96_vm0, %v816_v11, 0.0  ;;  %v309_v22 = vsel %vm96_vm0, %v828_v15, 0.0 }
  0xec   :  { %v294_v9 = vsel %vm96_vm0, %v799_v0, 0.0  ;;  %v318_v27 = vsel %vm96_vm0, %v845_v25, 0.0 }
  0xed   :  { %v288_v21 = vsel %vm96_vm0, %v819_v12, 0.0  ;;  %v312_v23 = vsel %vm96_vm0, %v831_v17, 0.0 }
  0xef   :  { %301 = vadd.xlane.f32.xlu1 %v300_v4  ;;  %277 = vadd.xlane.f32.xlu0 %v276_v5 }
  0xf3   :  { %292 = vadd.xlane.f32.xlu0 %v291_v8  ;;  %295 = vadd.xlane.f32.xlu1 %v294_v9 }
  0xf7   :  { %286 = vadd.xlane.f32.xlu0 %v285_v20  ;;  %289 = vadd.xlane.f32.xlu1 %v288_v21 }
  0xfb   :  { %310 = vadd.xlane.f32.xlu0 %v309_v22  ;;  %313 = vadd.xlane.f32.xlu1 %v312_v23 }
  0xff   :  { %316 = vadd.xlane.f32.xlu0 %v315_v26  ;;  %319 = vadd.xlane.f32.xlu1 %v318_v27 }
 0x170   :  { %v305_v28 = vpop.xlane.xlu0 %304  ;;  %v281_v31 = vpop.xlane.xlu1 %280 }
 0x171   :  { %v332_v32 = vmul.f32 0.03125, %v305_v28  ;;  %v324_v33 = vmul.f32 0.03125, %v281_v31 }
 0x173   :  { %v852_v34 = vsub.f32 %v742_v29, %v332_v32  ;;  %v855_v16 = vsub.f32 %v745_v30, %v324_v33 }
 0x174   :  { %v275_v35 = vpop.xlane.xlu0 %274  ;;  %v284_v36 = vpop.xlane.xlu1 %283 }
 0x175   :  { %v322_v39 = vmul.f32 0.03125, %v275_v35  ;;  %v325_v40 = vmul.f32 0.03125, %v284_v36  ;;  %v356_v41 = vmul.f32 %v855_v16, %v855_v16  ;;  %v364_v29 = vmul.f32 %v852_v34, %v852_v34 }
 0x177   :  { %v860_v42 = vsub.f32 %v758_v37, %v322_v39  ;;  %v863_v43 = vsub.f32 %v761_v38, %v325_v40  ;;  %v376_v44 = vsel %vm96_vm0, %v356_v41, 0.0  ;;  %v400_v52 = vsel %vm96_vm0, %v364_v29, 0.0 }
 0x178   :  { %v299_v30 = vpop.xlane.xlu0 %298  ;;  %v308_v45 = vpop.xlane.xlu1 %307  ;;  %377 = vadd.xlane.f32.xlu0 %v376_v44 }
 0x179   :  { %v330_v46 = vmul.f32 0.03125, %v299_v30  ;;  %v333_v49 = vmul.f32 0.03125, %v308_v45  ;;  %v357_v50 = vmul.f32 %v863_v43, %v863_v43  ;;  %v354_v37 = vmul.f32 %v860_v42, %v860_v42 }
 0x17b   :  { %v873_v51 = vsub.f32 %v774_v47, %v330_v46  ;;  %v876_v38 = vsub.f32 %v777_v48, %v333_v49  ;;  %v379_v53 = vsel %vm96_vm0, %v357_v50, 0.0  ;;  %v370_v61 = vsel %vm96_vm0, %v354_v37, 0.0 }
 0x17c   :  { %v302_v54 = vpop.xlane.xlu1 %301  ;;  %v278_v55 = vpop.xlane.xlu0 %277  ;;  %401 = vadd.xlane.f32.xlu0 %v400_v52  ;;  %380 = vadd.xlane.f32.xlu1 %v379_v53 }
 0x17d   :  { %v331_v56 = vmul.f32 0.03125, %v302_v54  ;;  %v323_v57 = vmul.f32 0.03125, %v278_v55  ;;  %v365_v58 = vmul.f32 %v876_v38, %v876_v38  ;;  %v362_v1 = vmul.f32 %v873_v51, %v873_v51 }
 0x17f   :  { %v884_v47 = vsub.f32 %v784_v59, %v331_v56  ;;  %v887_v48 = vsub.f32 %v787_v60, %v323_v57  ;;  %v403_v62 = vsel %vm96_vm0, %v365_v58, 0.0  ;;  %v394_v8 = vsel %vm96_vm0, %v362_v1, 0.0 }
 0x180   :  { %v293_v2 = vpop.xlane.xlu0 %292  ;;  %371 = vadd.xlane.f32.xlu0 %v370_v61  ;;  %v296_v3 = vpop.xlane.xlu1 %295  ;;  %404 = vadd.xlane.f32.xlu1 %v403_v62 }
 0x181   :  { %v328_v4 = vmul.f32 0.03125, %v293_v2  ;;  %v329_v5 = vmul.f32 0.03125, %v296_v3  ;;  %v355_v6 = vmul.f32 %v887_v48, %v887_v48  ;;  %v363_v59 = vmul.f32 %v884_v47, %v884_v47 }
 0x183   :  { %v897_v60 = vsub.f32 %v796_v63, %v328_v4  ;;  %v900_v7 = vsub.f32 %v799_v0, %v329_v5  ;;  %v373_v9 = vsel %vm96_vm0, %v355_v6, 0.0  ;;  %v397_v20 = vsel %vm96_vm0, %v363_v59, 0.0 }
 0x184   :  { %395 = vadd.xlane.f32.xlu0 %v394_v8  ;;  %v287_v10 = vpop.xlane.xlu0 %286  ;;  %374 = vadd.xlane.f32.xlu1 %v373_v9  ;;  %v290_v13 = vpop.xlane.xlu1 %289 }
 0x185   :  { %v326_v14 = vmul.f32 0.03125, %v287_v10  ;;  %v327_v18 = vmul.f32 0.03125, %v290_v13  ;;  %v360_v19 = vmul.f32 %v897_v60, %v897_v60  ;;  %v361_v22 = vmul.f32 %v900_v7, %v900_v7  ;;  %v950_v13 = vld [vmem:[%s1073_s4] ss:$0 sm:$0xff] }
 0x187   :  { %v908_v63 = vsub.f32 %v816_v11, %v326_v14  ;;  %v911_v0 = vsub.f32 %v819_v12, %v327_v18  ;;  %v388_v21 = vsel %vm96_vm0, %v360_v19, 0.0  ;;  %v391_v35 = vsel %vm96_vm0, %v361_v22, 0.0  ;;  %v956_v22 = vld [vmem:[%s1074_s5] ss:$0 sm:$0xff] }
 0x188   :  { %389 = vadd.xlane.f32.xlu0 %v388_v21  ;;  %v311_v23 = vpop.xlane.xlu0 %310  ;;  %398 = vadd.xlane.f32.xlu1 %v397_v20  ;;  %v314_v26 = vpop.xlane.xlu1 %313 }
 0x189   :  { %v334_v27 = vmul.f32 0.03125, %v311_v23  ;;  %v335_v28 = vmul.f32 0.03125, %v314_v26  ;;  %v358_v31 = vmul.f32 %v908_v63, %v908_v63  ;;  %v359_v11 = vmul.f32 %v911_v0, %v911_v0 }
 0x18b   :  { %v921_v12 = vsub.f32 %v828_v15, %v334_v27  ;;  %v924_v32 = vsub.f32 %v831_v17, %v335_v28  ;;  %v382_v33 = vsel %vm96_vm0, %v358_v31, 0.0  ;;  %v385_v29 = vsel %vm96_vm0, %v359_v11, 0.0 }
 0x18c   :  { %383 = vadd.xlane.f32.xlu0 %v382_v33  ;;  %v317_v36 = vpop.xlane.xlu0 %316  ;;  %392 = vadd.xlane.f32.xlu1 %v391_v35  ;;  %v320_v39 = vpop.xlane.xlu1 %319 }
 0x18d   :  { %v336_v40 = vmul.f32 0.03125, %v317_v36  ;;  %v337_v41 = vmul.f32 0.03125, %v320_v39  ;;  %v366_v44 = vmul.f32 %v921_v12, %v921_v12  ;;  %v367_v45 = vmul.f32 %v924_v32, %v924_v32 }
 0x18f   :  { %v932_v15 = vsub.f32 %v842_v24, %v336_v40  ;;  %v935_v17 = vsub.f32 %v845_v25, %v337_v41  ;;  %v406_v30 = vsel %vm96_vm0, %v366_v44, 0.0  ;;  %v409_v50 = vsel %vm96_vm0, %v367_v45, 0.0 }
 0x190   :  { %407 = vadd.xlane.f32.xlu0 %v406_v30  ;;  %386 = vadd.xlane.f32.xlu1 %v385_v29 }
 0x191   :  { %v368_v46 = vmul.f32 %v932_v15, %v932_v15  ;;  %v369_v24 = vmul.f32 %v935_v17, %v935_v17 }
 0x193   :  { %v412_v49 = vsel %vm96_vm0, %v368_v46, 0.0  ;;  %v415_v25 = vsel %vm96_vm0, %v369_v24, 0.0 }
 0x194   :  { %413 = vadd.xlane.f32.xlu0 %v412_v49  ;;  %410 = vadd.xlane.f32.xlu1 %v409_v50 }
 0x198   :  { %416 = vadd.xlane.f32.xlu1 %v415_v25 }
 0x205   :  { %v378_v37 = vpop.xlane.xlu0 %377 }
 0x206   :  { %v420_v52 = vmul.f32 0.03125, %v378_v37 }
 0x208   :  { %v436_v53 = vadd.f32 1e-05, %v420_v52 }
 0x209   :  { %v402_v54 = vpop.xlane.xlu0 %401  ;;  %v381_v55 = vpop.xlane.xlu1 %380 }
 0x20a   :  { %613 = vrsqrt.f32 %v436_v53  ;;  %v428_v56 = vmul.f32 0.03125, %v402_v54  ;;  %v421_v57 = vmul.f32 0.03125, %v381_v55 }
 0x20c   :  { %v444_v58 = vadd.f32 1e-05, %v428_v56  ;;  %v437_v61 = vadd.f32 1e-05, %v421_v57 }
 0x20d   :  { %v372_v62 = vpop.xlane.xlu0 %371  ;;  %v405_v1 = vpop.xlane.xlu1 %404 }
 0x20e   :  { %615 = vrsqrt.f32 %v444_v58  ;;  %v418_v2 = vmul.f32 0.03125, %v372_v62  ;;  %v429_v3 = vmul.f32 0.03125, %v405_v1 }
 0x20f   :  { %617 = vrsqrt.f32 %v437_v61 }
 0x210   :  { %v434_v4 = vadd.f32 1e-05, %v418_v2  ;;  %v445_v5 = vadd.f32 1e-05, %v429_v3 }
 0x211   :  { %v396_v6 = vpop.xlane.xlu0 %395  ;;  %v375_v59 = vpop.xlane.xlu1 %374 }
 0x212   :  { %619 = vrsqrt.f32 %v434_v4  ;;  %v426_v8 = vmul.f32 0.03125, %v396_v6  ;;  %v419_v9 = vmul.f32 0.03125, %v375_v59 }
 0x213   :  { %621 = vrsqrt.f32 %v445_v5 }
 0x214   :  { %v614_v10 = vpop.eup %613  ;;  %v442_v14 = vadd.f32 1e-05, %v426_v8  ;;  %v435_v18 = vadd.f32 1e-05, %v419_v9 }
 0x215   :  { %v468_v19 = vmul.f32 %v614_v10, %v855_v16  ;;  %v390_v20 = vpop.xlane.xlu0 %389  ;;  %v399_v21 = vpop.xlane.xlu1 %398 }
 0x216   :  { %623 = vrsqrt.f32 %v442_v14  ;;  %v424_v23 = vmul.f32 0.03125, %v390_v20  ;;  %v427_v26 = vmul.f32 0.03125, %v399_v21 }
 0x217   :  { %v491_v27 = vmul.f32 %v950_v13, %v468_v19  ;;  %625 = vrsqrt.f32 %v435_v18 }
 0x218   :  { %v616_v28 = vpop.eup %615  ;;  %v440_v31 = vadd.f32 1e-05, %v424_v23  ;;  %v443_v11 = vadd.f32 1e-05, %v427_v26 }
 0x219   :  { %v618_v33 = vpop.eup %617  ;;  %v514_v35 = vadd.f32 %v956_v22, %v491_v27  ;;  %v476_v16 = vmul.f32 %v616_v28, %v852_v34  ;;  %v384_v36 = vpop.xlane.xlu0 %383 }
 0x21a   :  { %v393_v39 = vpop.xlane.xlu1 %392  ;;  %v469_v40 = vmul.f32 %v618_v33, %v863_v43  ;;  %627 = vrsqrt.f32 %v440_v31  ;;  %v422_v41 = vmul.f32 0.03125, %v384_v36 }
 0x21b   :  { %v425_v44 = vmul.f32 0.03125, %v393_v39  ;;  %530 = vst.msk [vmem:[%s1075_s6 + $0x10] sm:$0xff] %vm96_vm0, %v514_v35  ;;  %v499_v29 = vmul.f32 %v950_v13, %v476_v16  ;;  %629 = vrsqrt.f32 %v443_v11 }
 0x21c   :  { %v620_v30 = vpop.eup %619  ;;  %v492_v45 = vmul.f32 %v950_v13, %v469_v40  ;;  %v438_v46 = vadd.f32 1e-05, %v422_v41 }
 0x21d   :  { %v441_v34 = vadd.f32 1e-05, %v425_v44  ;;  %v622_v49 = vpop.eup %621  ;;  %v522_v50 = vadd.f32 %v956_v22, %v499_v29  ;;  %v466_v43 = vmul.f32 %v620_v30, %v860_v42  ;;  %v408_v24 = vpop.xlane.xlu0 %407 }
 0x21e   :  { %v387_v25 = vpop.xlane.xlu1 %386  ;;  %v515_v37 = vadd.f32 %v956_v22, %v492_v45  ;;  %v477_v52 = vmul.f32 %v622_v49, %v876_v38  ;;  %631 = vrsqrt.f32 %v438_v46  ;;  %v430_v53 = vmul.f32 0.03125, %v408_v24 }
 0x21f   :  { %538 = vst.msk [vmem:[%s1075_s6 + $0x50] sm:$0xff] %vm96_vm0, %v522_v50  ;;  %v489_v54 = vmul.f32 %v950_v13, %v466_v43  ;;  %633 = vrsqrt.f32 %v441_v34  ;;  %v423_v55 = vmul.f32 0.03125, %v387_v25 }
 0x220   :  { %v624_v56 = vpop.eup %623  ;;  %531 = vst.msk [vmem:[%s1075_s6 + $0x18] sm:$0xff] %vm96_vm0, %v515_v37  ;;  %v500_v42 = vmul.f32 %v950_v13, %v477_v52  ;;  %v446_v38 = vadd.f32 1e-05, %v430_v53 }
 0x221   :  { %v626_v57 = vpop.eup %625  ;;  %v512_v58 = vadd.f32 %v956_v22, %v489_v54  ;;  %v474_v61 = vmul.f32 %v624_v56, %v873_v51  ;;  %v439_v62 = vadd.f32 1e-05, %v423_v55  ;;  %v414_v1 = vpop.xlane.xlu0 %413 }
 0x222   :  { %v411_v2 = vpop.xlane.xlu1 %410  ;;  %v523_v3 = vadd.f32 %v956_v22, %v500_v42  ;;  %v467_v4 = vmul.f32 %v626_v57, %v887_v48  ;;  %635 = vrsqrt.f32 %v446_v38  ;;  %v432_v5 = vmul.f32 0.03125, %v414_v1 }
 0x223   :  { %528 = vst.msk [vmem:[%s1075_s6] sm:$0xff] %vm96_vm0, %v512_v58  ;;  %v497_v6 = vmul.f32 %v950_v13, %v474_v61  ;;  %637 = vrsqrt.f32 %v439_v62  ;;  %v431_v59 = vmul.f32 0.03125, %v411_v2 }
 0x224   :  { %v628_v8 = vpop.eup %627  ;;  %539 = vst.msk [vmem:[%s1075_s6 + $0x58] sm:$0xff] %vm96_vm0, %v523_v3  ;;  %v490_v51 = vmul.f32 %v950_v13, %v467_v4  ;;  %v448_v48 = vadd.f32 1e-05, %v432_v5 }
 0x225   :  { %v630_v9 = vpop.eup %629  ;;  %v520_v10 = vadd.f32 %v956_v22, %v497_v6  ;;  %v472_v14 = vmul.f32 %v628_v8, %v897_v60  ;;  %v447_v18 = vadd.f32 1e-05, %v431_v59 }
 0x226   :  { %v417_v19 = vpop.xlane.xlu1 %416  ;;  %v513_v20 = vadd.f32 %v956_v22, %v490_v51  ;;  %v475_v21 = vmul.f32 %v630_v9, %v884_v47  ;;  %639 = vrsqrt.f32 %v448_v48 }
 0x227   :  { %v433_v23 = vmul.f32 0.03125, %v417_v19  ;;  %536 = vst.msk [vmem:[%s1075_s6 + $0x40] sm:$0xff] %vm96_vm0, %v520_v10  ;;  %v495_v26 = vmul.f32 %v950_v13, %v472_v14  ;;  %641 = vrsqrt.f32 %v447_v18 }
 0x228   :  { %v632_v27 = vpop.eup %631  ;;  %529 = vst.msk [vmem:[%s1075_s6 + $0x8] sm:$0xff] %vm96_vm0, %v513_v20  ;;  %v498_v60 = vmul.f32 %v950_v13, %v475_v21 }
 0x229   :  { %v449_v28 = vadd.f32 1e-05, %v433_v23  ;;  %v634_v47 = vpop.eup %633  ;;  %v518_v31 = vadd.f32 %v956_v22, %v495_v26  ;;  %v470_v11 = vmul.f32 %v632_v27, %v908_v63 }
 0x22a   :  { %v521_v33 = vadd.f32 %v956_v22, %v498_v60  ;;  %v473_v35 = vmul.f32 %v634_v47, %v900_v7 }
 0x22b   :  { %643 = vrsqrt.f32 %v449_v28  ;;  %534 = vst.msk [vmem:[%s1075_s6 + $0x30] sm:$0xff] %vm96_vm0, %v518_v31  ;;  %v493_v16 = vmul.f32 %v950_v13, %v470_v11 }
 0x22c   :  { %v636_v36 = vpop.eup %635  ;;  %537 = vst.msk [vmem:[%s1075_s6 + $0x48] sm:$0xff] %vm96_vm0, %v521_v33  ;;  %v496_v63 = vmul.f32 %v950_v13, %v473_v35 }
 0x22d   :  { %v638_v39 = vpop.eup %637  ;;  %v516_v40 = vadd.f32 %v956_v22, %v493_v16  ;;  %v478_v7 = vmul.f32 %v636_v36, %v921_v12 }
 0x22e   :  { %v519_v41 = vadd.f32 %v956_v22, %v496_v63  ;;  %v471_v44 = vmul.f32 %v638_v39, %v911_v0 }
 0x22f   :  { %532 = vst.msk [vmem:[%s1075_s6 + $0x20] sm:$0xff] %vm96_vm0, %v516_v40  ;;  %v501_v29 = vmul.f32 %v950_v13, %v478_v7 }
 0x230   :  { %v640_v30 = vpop.eup %639  ;;  %535 = vst.msk [vmem:[%s1075_s6 + $0x38] sm:$0xff] %vm96_vm0, %v519_v41  ;;  %v494_v45 = vmul.f32 %v950_v13, %v471_v44 }
 0x231   :  { %v642_v12 = vpop.eup %641  ;;  %v524_v46 = vadd.f32 %v956_v22, %v501_v29  ;;  %v480_v0 = vmul.f32 %v640_v30, %v932_v15 }
 0x232   :  { %v517_v34 = vadd.f32 %v956_v22, %v494_v45  ;;  %v479_v49 = vmul.f32 %v642_v12, %v924_v32 }
 0x233   :  { %540 = vst.msk [vmem:[%s1075_s6 + $0x60] sm:$0xff] %vm96_vm0, %v524_v46  ;;  %v503_v50 = vmul.f32 %v950_v13, %v480_v0 }
 0x234   :  { %533 = vst.msk [vmem:[%s1075_s6 + $0x28] sm:$0xff] %vm96_vm0, %v517_v34  ;;  %v502_v24 = vmul.f32 %v950_v13, %v479_v49 }
 0x235   :  { %v644_v43 = vpop.eup %643  ;;  %v526_v15 = vadd.f32 %v956_v22, %v503_v50 }
 0x236   :  { %v481_v25 = vmul.f32 %v644_v43, %v935_v17  ;;  %v525_v32 = vadd.f32 %v956_v22, %v502_v24 }
 0x237   :  { %542 = vst.msk [vmem:[%s1075_s6 + $0x70] sm:$0xff] %vm96_vm0, %v526_v15 }
 0x238   :  { %v504_v37 = vmul.f32 %v950_v13, %v481_v25  ;;  %541 = vst.msk [vmem:[%s1075_s6 + $0x68] sm:$0xff] %vm96_vm0, %v525_v32 }
 0x23a   :  { %v527_v52 = vadd.f32 %v956_v22, %v504_v37 }
 0x23c   :  { %543 = vst.msk [vmem:[%s1075_s6 + $0x78] sm:$0xff] %vm96_vm0, %v527_v52 }

// kernel: swin3d_encoder_forward.19
= control target key start
LH: loop header
LB: loop body
LE: loop exit
PB: predicated region body
PF: predicated region fallthrough
CT: control target
= control target key end

     0   :  { %vm31_vm0 = vcmask 261120   ;;  %v942_v34 = vmov 0.0   ;;  %s1471_s1 = inlined_call_operand.vmem [shape: bf16[32,128], index: 1, kind: input, shape index: {}]   ;;  %s1472_s0 = inlined_call_operand.vmem [shape: f32[128,32], index: 0, kind: input, shape index: {}]   ;;  %s1473_s3 = inlined_call_operand.vmem [shape: bf16[128,32], index: 3, kind: input, shape index: {}]   ;;  %s1474_s2 = inlined_call_operand.vmem [shape: f32[1,128], index: 2, kind: input, shape index: {}]   ;;  %s1475_s4 = inlined_call_operand.vmem [shape: f32[1,32], index: 4, kind: input, shape index: {}]   ;;  %s1476_s5 = inlined_call_operand.vmem [shape: f32[1,32], index: 5, kind: input, shape index: {}]   ;;  %s1477_s6 = inlined_call_operand.vmem [shape: f32[1,32], index: 6, kind: input, shape index: {}]   ;;  %s1478_s7 = inlined_call_operand.vmem [shape: f32[128,32], index: 7, kind: output, shape index: {}]  }
   0x1   :  { %v900_v0 = vld [vmem:[%s1471_s1] sm:$0xff]   ;;  %v901_v1 = vld [vmem:[%s1471_s1 + $0x8] sm:$0xff]   ;;  %v1004_v5 = vld [vmem:[%s1472_s0 + $0x10] sm:$0xff]  ;;  %34 = vst.msk [vmem:[#allocation2 + $0x10] sm:$0xff] %vm31_vm0, %v942_v34 }
   0x2   :  { %831 = vmatprep.subr.bf16.mxu0 %v900_v0  ;;  %v992_v2 = vld [vmem:[%s1472_s0] sm:$0xff]  ;;  %v997_v3 = vld [vmem:[%s1472_s0 + $0x8] sm:$0xff]  ;;  %v1009_v6 = vld [vmem:[%s1472_s0 + $0x18] sm:$0xff]  ;;  %32 = vst.msk [vmem:[#allocation2] sm:$0xff] %vm31_vm0, %v942_v34 }
   0x3   :  { %832 = vmatpush3.bf16.msra.mxu0 %v900_v0  ;;  %v64_v4 = vpack.c.bf16 %v997_v3, %v992_v2  ;;  %v1014_v7 = vld [vmem:[%s1472_s0 + $0x20] sm:$0xff]  ;;  %v1019_v8 = vld [vmem:[%s1472_s0 + $0x28] sm:$0xff]  ;;  %v65_v9 = vpack.c.bf16 %v1009_v6, %v1004_v5  ;;  %v1032_v12 = vld [vmem:[%s1472_s0 + $0x30] sm:$0xff]  ;;  %33 = vst.msk [vmem:[#allocation2 + $0x8] sm:$0xff] %vm31_vm0, %v942_v34 }
   0x4   :  { %833 = vmatprep.subr.bf16.mxu0 %v901_v1  ;;  %v66_v10 = vpack.c.bf16 %v1019_v8, %v1014_v7  ;;  %v902_v11 = vld [vmem:[%s1473_s3] sm:$0xff]   ;;  %v1037_v13 = vld [vmem:[%s1472_s0 + $0x38] sm:$0xff]  ;;  %v903_v14 = vld [vmem:[%s1473_s3 + $0x8] sm:$0xff]   ;;  %35 = vst.msk [vmem:[#allocation2 + $0x18] sm:$0xff] %vm31_vm0, %v942_v34 }
   0x5   :  { %835 = vmatprep.mubr.msk.bf16.mxu0 %vm31_vm0, %v64_v4  ;;  %v1046_v15 = vld [vmem:[%s1472_s0 + $0x40] sm:$0xff]  ;;  %v1052_v16 = vld [vmem:[%s1472_s0 + $0x48] sm:$0xff]  ;;  %v904_v17 = vld [vmem:[%s1473_s3 + $0x10] sm:$0xff]   ;;  %883 = vmatprep.subr.bf16.mxu1 %v902_v11  ;;  %v67_v18 = vpack.c.bf16 %v1037_v13, %v1032_v12  ;;  %36 = vst.msk [vmem:[#allocation2 + $0x20] sm:$0xff] %vm31_vm0, %v942_v34 }
   0x6   :  { %891 = vmatpush3.bf16.msra.mxu1 %v902_v11  ;;  %v68_v19 = vpack.c.bf16 %v1052_v16, %v1046_v15  ;;  %v905_v20 = vld [vmem:[%s1473_s3 + $0x18] sm:$0xff]   ;;  %v1069_v21 = vld [vmem:[%s1472_s0 + $0x50] sm:$0xff]  ;;  %v1079_v23 = vld [vmem:[%s1472_s0 + $0x60] sm:$0xff]  ;;  %37 = vst.msk [vmem:[#allocation2 + $0x28] sm:$0xff] %vm31_vm0, %v942_v34 }
   0x7   :  { %834 = vmatpush3.bf16.msra.mxu0 %v901_v1  ;;  %884 = vmatprep.subr.bf16.mxu1 %v903_v14  ;;  %v1074_v22 = vld [vmem:[%s1472_s0 + $0x58] sm:$0xff]  ;;  %v1084_v24 = vld [vmem:[%s1472_s0 + $0x68] sm:$0xff]  ;;  %v906_v25 = vld [vmem:[%s1473_s3 + $0x20] sm:$0xff]   ;;  %38 = vst.msk [vmem:[#allocation2 + $0x30] sm:$0xff] %vm31_vm0, %v942_v34 }
   0x8   :  { %851 = vmatprep.subr.bf16.mxu0 %v902_v11  ;;  %v69_v26 = vpack.c.bf16 %v1074_v22, %v1069_v21  ;;  %v70_v27 = vpack.c.bf16 %v1084_v24, %v1079_v23  ;;  %v907_v28 = vld [vmem:[%s1473_s3 + $0x28] sm:$0xff]   ;;  %v1101_v29 = vld [vmem:[%s1472_s0 + $0x70] sm:$0xff]  ;;  %v1106_v30 = vld [vmem:[%s1472_s0 + $0x78] sm:$0xff]  ;;  %39 = vst.msk [vmem:[#allocation2 + $0x38] sm:$0xff] %vm31_vm0, %v942_v34 }
   0x9   :  { %v71_v31 = vpack.c.bf16 %v1106_v30, %v1101_v29  ;;  %v908_v32 = vld [vmem:[%s1473_s3 + $0x30] sm:$0xff]   ;;  %v909_v33 = vld [vmem:[%s1473_s3 + $0x38] sm:$0xff]   ;;  %40 = vst.msk [vmem:[#allocation2 + $0x40] sm:$0xff] %vm31_vm0, %v942_v34  ;;  %41 = vst.msk [vmem:[#allocation2 + $0x48] sm:$0xff] %vm31_vm0, %v942_v34 }
   0xa   :  { %836 = vmatmul.mubr.msk.bf16.vlgmr.msra.gmra.mrb[0].mxu0 %vm31_vm0, %v65_v9  ;;  %892 = vmatpush3.bf16.msra.mxu1 %v903_v14  ;;  %42 = vst.msk [vmem:[#allocation2 + $0x50] sm:$0xff] %vm31_vm0, %v942_v34  ;;  %43 = vst.msk [vmem:[#allocation2 + $0x58] sm:$0xff] %vm31_vm0, %v942_v34  ;;  %v783_v35 = vld [vmem:[%s1474_s2] ss:$0 sm:$0xff] }
   0xb   :  { %839 = vmatprep.mubr.msk.bf16.mxu0 %vm31_vm0, %v66_v10  ;;  %852 = vmatpush3.bf16.msra.mxu0 %v902_v11  ;;  %44 = vst.msk [vmem:[#allocation2 + $0x60] sm:$0xff] %vm31_vm0, %v942_v34  ;;  %45 = vst.msk [vmem:[#allocation2 + $0x68] sm:$0xff] %vm31_vm0, %v942_v34 }
   0xc   :  { %853 = vmatprep.subr.bf16.mxu0 %v903_v14  ;;  %885 = vmatprep.subr.bf16.mxu1 %v904_v17  ;;  %46 = vst.msk [vmem:[#allocation2 + $0x70] sm:$0xff] %vm31_vm0, %v942_v34  ;;  %47 = vst.msk [vmem:[#allocation2 + $0x78] sm:$0xff] %vm31_vm0, %v942_v34 }
   0xe   :  { %893 = vmatpush3.bf16.msra.mxu1 %v904_v17 }
   0xf   :  { %854 = vmatpush3.bf16.msra.mxu0 %v903_v14  ;;  %886 = vmatprep.subr.bf16.mxu1 %v905_v20 }
  0x10   :  { %855 = vmatprep.subr.bf16.mxu0 %v904_v17 }
  0x12   :  { %840 = vmatmul.mubr.msk.bf16.gmra.mrb[4].mxu0 %vm31_vm0, %v67_v18  ;;  %894 = vmatpush3.bf16.msra.mxu1 %v905_v20 }
  0x13   :  { %843 = vmatprep.mubr.msk.bf16.mxu0 %vm31_vm0, %v68_v19  ;;  %856 = vmatpush3.bf16.msra.mxu0 %v904_v17 }
  0x14   :  { %857 = vmatprep.subr.bf16.mxu0 %v905_v20  ;;  %887 = vmatprep.subr.bf16.mxu1 %v906_v25 }
  0x16   :  { %895 = vmatpush3.bf16.msra.mxu1 %v906_v25 }
  0x17   :  { %858 = vmatpush3.bf16.msra.mxu0 %v905_v20  ;;  %888 = vmatprep.subr.bf16.mxu1 %v907_v28 }
  0x18   :  { %859 = vmatprep.subr.bf16.mxu0 %v906_v25 }
  0x1a   :  { %844 = vmatmul.mubr.msk.bf16.gmra.mrb[8].mxu0 %vm31_vm0, %v69_v26  ;;  %896 = vmatpush3.bf16.msra.mxu1 %v907_v28 }
  0x1b   :  { %847 = vmatprep.mubr.msk.bf16.mxu0 %vm31_vm0, %v70_v27  ;;  %860 = vmatpush3.bf16.msra.mxu0 %v906_v25 }
  0x1c   :  { %861 = vmatprep.subr.bf16.mxu0 %v907_v28  ;;  %889 = vmatprep.subr.bf16.mxu1 %v908_v32 }
  0x1e   :  { %897 = vmatpush3.bf16.msra.mxu1 %v908_v32 }
  0x1f   :  { %862 = vmatpush3.bf16.msra.mxu0 %v907_v28  ;;  %890 = vmatprep.subr.bf16.mxu1 %v909_v33 }
  0x20   :  { %863 = vmatprep.subr.bf16.mxu0 %v908_v32 }
  0x22   :  { %848 = vmatmul.mubr.msk.bf16.gmra.mrb[12].mxu0 %vm31_vm0, %v71_v31  ;;  %898 = vmatpush3.bf16.msra.mxu1 %v909_v33 }
  0x23   :  { %864 = vmatpush3.bf16.msra.mxu0 %v908_v32 }
  0x24   :  { %865 = vmatprep.subr.bf16.mxu0 %v909_v33 }
  0x27   :  { %866 = vmatpush3.bf16.msra.mxu0 %v909_v33 }
  0xdd   :  { %v837_v36 = vpop.f32.mrb[0].mxu0 }
  0xde   :  { %v163_v37 = vadd.f32 %v837_v36, %v783_v35  ;;  %v154_v38 = vpop.f32.mrb[1].mxu0 }
  0xdf   :  { %v155_v39 = vadd.f32 %v783_v35, %v154_v38  ;;  %v838_v40 = vpop.f32.mrb[2].mxu0 }
  0xe0   :  { %v166_v41 = vadd.f32 %v838_v40, %v783_v35  ;;  %v157_v42 = vpop.f32.mrb[3].mxu0  ;;  %v219_v44 = vmax.f32 %v163_v37, 0.0 }
  0xe1   :  { %v158_v43 = vadd.f32 %v783_v35, %v157_v42  ;;  %v217_v46 = vmax.f32 %v155_v39, 0.0 }
  0xe2   :  { %v220_v45 = vmax.f32 %v166_v41, 0.0 }
  0xe3   :  { %v218_v47 = vmax.f32 %v158_v43, 0.0 }
  0xe4   :  { %v250_v48 = vpack.c.bf16 %v220_v45, %v219_v44  ;;  %v235_v45 = vld [vmem:[#allocation2 + $0x10] sm:$0xff] }
  0xe5   :  { %v249_v49 = vpack.c.bf16 %v218_v47, %v217_v46  ;;  %v841_v50 = vpop.f32.mrb[4].mxu0  ;;  %v233_v46 = vld [vmem:[#allocation2] sm:$0xff] }
  0xe6   :  { %v179_v51 = vadd.f32 %v841_v50, %v783_v35  ;;  %v170_v52 = vpop.f32.mrb[5].mxu0 }
  0xe7   :  { %v171_v53 = vadd.f32 %v783_v35, %v170_v52  ;;  %v842_v54 = vpop.f32.mrb[6].mxu0  ;;  %867 = vmatprep.mubr.bf16.mxu0 %v249_v49 }
  0xe8   :  { %v223_v55 = vmax.f32 %v179_v51, 0.0  ;;  %v182_v56 = vadd.f32 %v842_v54, %v783_v35  ;;  %v173_v57 = vpop.f32.mrb[7].mxu0  ;;  %868 = vmatmul.mubr.bf16.vlgmr.msra.gmra.mrb[16].mxu0 %v250_v48  ;;  %v236_v48 = vld [vmem:[#allocation2 + $0x18] sm:$0xff]  ;;  %v234_v51 = vld [vmem:[#allocation2 + $0x8] sm:$0xff] }
  0xe9   :  { %v174_v58 = vadd.f32 %v783_v35, %v173_v57  ;;  %v221_v60 = vmax.f32 %v171_v53, 0.0  ;;  %v237_v57 = vld [vmem:[#allocation2 + $0x20] sm:$0xff] }
  0xea   :  { %v224_v59 = vmax.f32 %v182_v56, 0.0  ;;  %v239_v56 = vld [vmem:[#allocation2 + $0x30] sm:$0xff] }
  0xeb   :  { %v222_v61 = vmax.f32 %v174_v58, 0.0 }
  0xec   :  { %v252_v62 = vpack.c.bf16 %v224_v59, %v223_v55  ;;  %v240_v59 = vld [vmem:[#allocation2 + $0x38] sm:$0xff] }
  0xed   :  { %v845_v63 = vpop.f32.mrb[8].mxu0  ;;  %v251_v0 = vpack.c.bf16 %v222_v61, %v221_v60 }
  0xee   :  { %v195_v1 = vadd.f32 %v845_v63, %v783_v35  ;;  %v186_v4 = vpop.f32.mrb[9].mxu0 }
  0xef   :  { %v187_v9 = vadd.f32 %v783_v35, %v186_v4  ;;  %v846_v10 = vpop.f32.mrb[10].mxu0  ;;  %871 = vmatprep.mubr.bf16.mxu1 %v251_v0  ;;  %v1143_v4 = vld [vmem:[%s1475_s4] ss:$0 sm:$0xff] }
  0xf0   :  { %v227_v11 = vmax.f32 %v195_v1, 0.0  ;;  %v198_v14 = vadd.f32 %v846_v10, %v783_v35  ;;  %v189_v17 = vpop.f32.mrb[11].mxu0  ;;  %872 = vmatmul.mubr.bf16.vlgmr.msra.gmra.mrb[0].mxu1 %v252_v62  ;;  %v238_v62 = vld [vmem:[#allocation2 + $0x28] sm:$0xff] }
  0xf1   :  { %v190_v18 = vadd.f32 %v783_v35, %v189_v17  ;;  %v225_v20 = vmax.f32 %v187_v9, 0.0 }
  0xf2   :  { %v228_v19 = vmax.f32 %v198_v14, 0.0 }
  0xf3   :  { %v226_v25 = vmax.f32 %v190_v18, 0.0 }
  0xf4   :  { %v254_v26 = vpack.c.bf16 %v228_v19, %v227_v11 }
  0xf5   :  { %v253_v27 = vpack.c.bf16 %v226_v25, %v225_v20  ;;  %v849_v28 = vpop.f32.mrb[12].mxu0 }
  0xf6   :  { %v211_v31 = vadd.f32 %v849_v28, %v783_v35  ;;  %v202_v32 = vpop.f32.mrb[13].mxu0 }
  0xf7   :  { %v203_v33 = vadd.f32 %v783_v35, %v202_v32  ;;  %v850_v34 = vpop.f32.mrb[14].mxu0  ;;  %875 = vmatprep.mubr.bf16.mxu1 %v253_v27  ;;  %v243_v27 = vld [vmem:[#allocation2 + $0x50] sm:$0xff] }
  0xf8   :  { %v231_v36 = vmax.f32 %v211_v31, 0.0  ;;  %v214_v37 = vadd.f32 %v850_v34, %v783_v35  ;;  %v205_v38 = vpop.f32.mrb[15].mxu0  ;;  %876 = vmatmul.mubr.bf16.gmra.mrb[4].mxu1 %v254_v26  ;;  %v241_v31 = vld [vmem:[#allocation2 + $0x40] sm:$0xff]  ;;  %v244_v34 = vld [vmem:[#allocation2 + $0x58] sm:$0xff] }
  0xf9   :  { %v206_v39 = vadd.f32 %v783_v35, %v205_v38  ;;  %v229_v41 = vmax.f32 %v203_v33, 0.0 }
  0xfa   :  { %v232_v40 = vmax.f32 %v214_v37, 0.0 }
  0xfb   :  { %v230_v42 = vmax.f32 %v206_v39, 0.0 }
  0xfc   :  { %v256_v43 = vpack.c.bf16 %v232_v40, %v231_v36 }
  0xfd   :  { %v255_v44 = vpack.c.bf16 %v230_v42, %v229_v41 }
  0xff   :  { %879 = vmatprep.mubr.bf16.mxu1 %v255_v44 }
 0x100   :  { %880 = vmatmul.mubr.bf16.gmra.mrb[8].mxu1 %v256_v43 }
 0x1bb   :  { %v869_v47 = vpop.f32.mrb[16].mxu0 }
 0x1bc   :  { %v420_v49 = vadd.f32 %v869_v47, %v235_v45  ;;  %v355_v50 = vpop.f32.mrb[17].mxu0 }
 0x1bd   :  { %v418_v52 = vadd.f32 %v355_v50, %v233_v46  ;;  %v870_v53 = vpop.f32.mrb[18].mxu0 }
 0x1be   :  { %436 = vst.msk [vmem:[#allocation2 + $0x10] sm:$0xff] %vm31_vm0, %v420_v49  ;;  %v421_v54 = vadd.f32 %v870_v53, %v236_v48  ;;  %v358_v35 = vpop.f32.mrb[19].mxu0  ;;  %v247_v53 = vld [vmem:[#allocation2 + $0x70] sm:$0xff] }
 0x1bf   :  { %434 = vst.msk [vmem:[#allocation2] sm:$0xff] %vm31_vm0, %v418_v52  ;;  %v419_v55 = vadd.f32 %v358_v35, %v234_v51  ;;  %v245_v35 = vld [vmem:[#allocation2 + $0x60] sm:$0xff] }
 0x1c0   :  { %437 = vst.msk [vmem:[#allocation2 + $0x18] sm:$0xff] %vm31_vm0, %v421_v54 }
 0x1c1   :  { %435 = vst.msk [vmem:[#allocation2 + $0x8] sm:$0xff] %vm31_vm0, %v419_v55 }
 0x1c3   :  { %v873_v58 = vpop.f32.mrb[0].mxu1 }
 0x1c4   :  { %v424_v60 = vadd.f32 %v873_v58, %v239_v56  ;;  %v371_v61 = vpop.f32.mrb[1].mxu1 }
 0x1c5   :  { %v422_v63 = vadd.f32 %v371_v61, %v237_v57  ;;  %v874_v0 = vpop.f32.mrb[2].mxu1  ;;  %v455_v1 = vld [vmem:[#allocation2 + $0x10] sm:$0xff]  ;;  %v248_v57 = vld [vmem:[#allocation2 + $0x78] sm:$0xff]  ;;  %v246_v61 = vld [vmem:[#allocation2 + $0x68] sm:$0xff] }
 0x1c6   :  { %440 = vst.msk [vmem:[#allocation2 + $0x30] sm:$0xff] %vm31_vm0, %v424_v60  ;;  %v425_v9 = vadd.f32 %v874_v0, %v240_v59  ;;  %v374_v10 = vpop.f32.mrb[3].mxu1  ;;  %v471_v11 = vadd.f32 %v455_v1, %v1004_v5  ;;  %v453_v14 = vld [vmem:[#allocation2] sm:$0xff] }
 0x1c7   :  { %438 = vst.msk [vmem:[#allocation2 + $0x20] sm:$0xff] %vm31_vm0, %v422_v63  ;;  %v423_v17 = vadd.f32 %v374_v10, %v238_v62  ;;  %v469_v18 = vadd.f32 %v453_v14, %v992_v2  ;;  %v456_v19 = vld [vmem:[#allocation2 + $0x18] sm:$0xff] }
 0x1c8   :  { %441 = vst.msk [vmem:[#allocation2 + $0x38] sm:$0xff] %vm31_vm0, %v425_v9  ;;  %v1151_v20 = vadd.f32 %v1143_v4, %v471_v11  ;;  %v472_v25 = vadd.f32 %v456_v19, %v1009_v6  ;;  %v454_v26 = vld [vmem:[#allocation2 + $0x8] sm:$0xff] }
 0x1c9   :  { %439 = vst.msk [vmem:[#allocation2 + $0x28] sm:$0xff] %vm31_vm0, %v423_v17  ;;  %v1156_v5 = vadd.f32 %v1143_v4, %v469_v18  ;;  %v470_v28 = vadd.f32 %v454_v26, %v997_v3  ;;  %v242_v3 = vld [vmem:[#allocation2 + $0x48] sm:$0xff] }
 0x1ca   :  { %v514_v2 = vsel %vm31_vm0, %v1151_v20, 0.0  ;;  %v1162_v32 = vadd.f32 %v1143_v4, %v472_v25 }
 0x1cb   :  { %v877_v33 = vpop.f32.mrb[4].mxu1  ;;  %515 = vadd.xlane.f32.xlu1 %v514_v2  ;;  %v508_v6 = vsel %vm31_vm0, %v1156_v5, 0.0  ;;  %v1167_v36 = vadd.f32 %v1143_v4, %v470_v28 }
 0x1cc   :  { %v428_v37 = vadd.f32 %v877_v33, %v243_v27  ;;  %v387_v38 = vpop.f32.mrb[5].mxu1  ;;  %509 = vadd.xlane.f32.xlu0 %v508_v6  ;;  %v517_v44 = vsel %vm31_vm0, %v1162_v32, 0.0 }
 0x1cd   :  { %v426_v39 = vadd.f32 %v387_v38, %v241_v31  ;;  %v878_v40 = vpop.f32.mrb[6].mxu1  ;;  %v459_v41 = vld [vmem:[#allocation2 + $0x30] sm:$0xff]  ;;  %v511_v48 = vsel %vm31_vm0, %v1167_v36, 0.0 }
 0x1ce   :  { %444 = vst.msk [vmem:[#allocation2 + $0x50] sm:$0xff] %vm31_vm0, %v428_v37  ;;  %v429_v42 = vadd.f32 %v878_v40, %v244_v34  ;;  %v390_v43 = vpop.f32.mrb[7].mxu1  ;;  %v475_v45 = vadd.f32 %v459_v41, %v1032_v12  ;;  %v457_v46 = vld [vmem:[#allocation2 + $0x20] sm:$0xff] }
 0x1cf   :  { %442 = vst.msk [vmem:[#allocation2 + $0x40] sm:$0xff] %vm31_vm0, %v426_v39  ;;  %v427_v47 = vadd.f32 %v390_v43, %v242_v3  ;;  %518 = vadd.xlane.f32.xlu1 %v517_v44  ;;  %v460_v49 = vld [vmem:[#allocation2 + $0x38] sm:$0xff]  ;;  %v473_v50 = vadd.f32 %v457_v46, %v1014_v7 }
 0x1d0   :  { %445 = vst.msk [vmem:[#allocation2 + $0x58] sm:$0xff] %vm31_vm0, %v429_v42  ;;  %512 = vadd.xlane.f32.xlu0 %v511_v48  ;;  %v1179_v51 = vadd.f32 %v1143_v4, %v475_v45  ;;  %v476_v52 = vadd.f32 %v460_v49, %v1037_v13  ;;  %v458_v12 = vld [vmem:[#allocation2 + $0x28] sm:$0xff] }
 0x1d1   :  { %443 = vst.msk [vmem:[#allocation2 + $0x48] sm:$0xff] %vm31_vm0, %v427_v47  ;;  %v474_v54 = vadd.f32 %v458_v12, %v1019_v8  ;;  %v1190_v58 = vadd.f32 %v1143_v4, %v473_v50 }
 0x1d2   :  { %v526_v55 = vsel %vm31_vm0, %v1179_v51, 0.0  ;;  %v1187_v7 = vadd.f32 %v1143_v4, %v476_v52 }
 0x1d3   :  { %v881_v56 = vpop.f32.mrb[8].mxu1  ;;  %v1195_v8 = vadd.f32 %v1143_v4, %v474_v54  ;;  %v520_v17 = vsel %vm31_vm0, %v1190_v58, 0.0 }
 0x1d4   :  { %v432_v59 = vadd.f32 %v881_v56, %v247_v53  ;;  %v403_v13 = vpop.f32.mrb[9].mxu1  ;;  %527 = vadd.xlane.f32.xlu0 %v526_v55  ;;  %v529_v60 = vsel %vm31_vm0, %v1187_v7, 0.0 }
 0x1d5   :  { %v430_v62 = vadd.f32 %v403_v13, %v245_v35  ;;  %v882_v63 = vpop.f32.mrb[10].mxu1  ;;  %530 = vadd.xlane.f32.xlu1 %v529_v60  ;;  %v463_v0 = vld [vmem:[#allocation2 + $0x50] sm:$0xff]  ;;  %v523_v25 = vsel %vm31_vm0, %v1195_v8, 0.0 }
 0x1d6   :  { %448 = vst.msk [vmem:[#allocation2 + $0x70] sm:$0xff] %vm31_vm0, %v432_v59  ;;  %v433_v1 = vadd.f32 %v882_v63, %v248_v57  ;;  %v406_v9 = vpop.f32.mrb[11].mxu1  ;;  %v479_v10 = vadd.f32 %v463_v0, %v1069_v21  ;;  %v461_v11 = vld [vmem:[#allocation2 + $0x40] sm:$0xff] }
 0x1d7   :  { %446 = vst.msk [vmem:[#allocation2 + $0x60] sm:$0xff] %vm31_vm0, %v430_v62  ;;  %v431_v14 = vadd.f32 %v406_v9, %v246_v61  ;;  %v464_v18 = vld [vmem:[#allocation2 + $0x58] sm:$0xff]  ;;  %v477_v19 = vadd.f32 %v461_v11, %v1046_v15 }
 0x1d8   :  { %449 = vst.msk [vmem:[#allocation2 + $0x78] sm:$0xff] %vm31_vm0, %v433_v1  ;;  %521 = vadd.xlane.f32.xlu0 %v520_v17  ;;  %v1207_v26 = vadd.f32 %v1143_v4, %v479_v10  ;;  %v480_v21 = vadd.f32 %v464_v18, %v1074_v22  ;;  %v462_v27 = vld [vmem:[#allocation2 + $0x48] sm:$0xff] }
 0x1d9   :  { %447 = vst.msk [vmem:[#allocation2 + $0x68] sm:$0xff] %vm31_vm0, %v431_v14  ;;  %524 = vadd.xlane.f32.xlu1 %v523_v25  ;;  %v478_v28 = vadd.f32 %v462_v27, %v1052_v16  ;;  %v1218_v31 = vadd.f32 %v1143_v4, %v477_v19 }
 0x1da   :  { %v538_v15 = vsel %vm31_vm0, %v1207_v26, 0.0  ;;  %v1215_v2 = vadd.f32 %v1143_v4, %v480_v21 }
 0x1db   :  { %v1223_v22 = vadd.f32 %v1143_v4, %v478_v28  ;;  %v532_v16 = vsel %vm31_vm0, %v1218_v31, 0.0 }
 0x1dc   :  { %539 = vadd.xlane.f32.xlu0 %v538_v15  ;;  %v541_v33 = vsel %vm31_vm0, %v1215_v2, 0.0 }
 0x1dd   :  { %542 = vadd.xlane.f32.xlu1 %v541_v33  ;;  %v467_v6 = vld [vmem:[#allocation2 + $0x70] sm:$0xff]  ;;  %v535_v39 = vsel %vm31_vm0, %v1223_v22, 0.0 }
 0x1de   :  { %v465_v34 = vld [vmem:[#allocation2 + $0x60] sm:$0xff]  ;;  %v483_v38 = vadd.f32 %v467_v6, %v1101_v29 }
 0x1df   :  { %v481_v37 = vadd.f32 %v465_v34, %v1079_v23  ;;  %v468_v3 = vld [vmem:[#allocation2 + $0x78] sm:$0xff] }
 0x1e0   :  { %533 = vadd.xlane.f32.xlu0 %v532_v16  ;;  %v466_v40 = vld [vmem:[#allocation2 + $0x68] sm:$0xff]  ;;  %v484_v43 = vadd.f32 %v468_v3, %v1106_v30  ;;  %v1242_v29 = vadd.f32 %v1143_v4, %v483_v38 }
 0x1e1   :  { %536 = vadd.xlane.f32.xlu1 %v535_v39  ;;  %v1232_v41 = vadd.f32 %v1143_v4, %v481_v37  ;;  %v482_v42 = vadd.f32 %v466_v40, %v1084_v24 }
 0x1e2   :  { %v1247_v46 = vadd.f32 %v1143_v4, %v484_v43  ;;  %v550_v24 = vsel %vm31_vm0, %v1242_v29, 0.0 }
 0x1e3   :  { %v544_v44 = vsel %vm31_vm0, %v1232_v41, 0.0  ;;  %v1239_v23 = vadd.f32 %v1143_v4, %v482_v42 }
 0x1e4   :  { %545 = vadd.xlane.f32.xlu0 %v544_v44  ;;  %v553_v30 = vsel %vm31_vm0, %v1247_v46, 0.0 }
 0x1e5   :  { %v547_v45 = vsel %vm31_vm0, %v1239_v23, 0.0 }
 0x1e6   :  { %548 = vadd.xlane.f32.xlu1 %v547_v45 }
 0x1e8   :  { %551 = vadd.xlane.f32.xlu0 %v550_v24 }
 0x1ea   :  { %554 = vadd.xlane.f32.xlu1 %v553_v30 }
 0x258   :  { %v516_v47 = vpop.xlane.xlu1 %515 }
 0x259   :  { %v559_v48 = vmul.f32 0.03125, %v516_v47  ;;  %v510_v49 = vpop.xlane.xlu0 %509 }
 0x25a   :  { %v557_v50 = vmul.f32 0.03125, %v510_v49 }
 0x25b   :  { %v1254_v52 = vsub.f32 %v1151_v20, %v559_v48 }
 0x25c   :  { %v1257_v12 = vsub.f32 %v1156_v5, %v557_v50  ;;  %v519_v4 = vpop.xlane.xlu1 %518 }
 0x25d   :  { %v560_v53 = vmul.f32 0.03125, %v519_v4  ;;  %v513_v54 = vpop.xlane.xlu0 %512  ;;  %v591_v35 = vmul.f32 %v1254_v52, %v1254_v52 }
 0x25e   :  { %v558_v55 = vmul.f32 0.03125, %v513_v54  ;;  %v589_v59 = vmul.f32 %v1257_v12, %v1257_v12 }
 0x25f   :  { %v1262_v56 = vsub.f32 %v1162_v32, %v560_v53  ;;  %v611_v57 = vsel %vm31_vm0, %v591_v35, 0.0 }
 0x260   :  { %v1268_v20 = vsub.f32 %v1167_v36, %v558_v55  ;;  %612 = vadd.xlane.f32.xlu0 %v611_v57  ;;  %v605_v32 = vsel %vm31_vm0, %v589_v59, 0.0 }
 0x261   :  { %v528_v5 = vpop.xlane.xlu0 %527  ;;  %v592_v13 = vmul.f32 %v1262_v56, %v1262_v56 }
 0x262   :  { %v563_v60 = vmul.f32 0.03125, %v528_v5  ;;  %v531_v61 = vpop.xlane.xlu1 %530  ;;  %v590_v0 = vmul.f32 %v1268_v20, %v1268_v20 }
 0x263   :  { %v564_v62 = vmul.f32 0.03125, %v531_v61  ;;  %v614_v63 = vsel %vm31_vm0, %v592_v13, 0.0 }
 0x264   :  { %v1277_v1 = vsub.f32 %v1179_v51, %v563_v60  ;;  %615 = vadd.xlane.f32.xlu1 %v614_v63  ;;  %606 = vadd.xlane.f32.xlu0 %v605_v32  ;;  %v608_v18 = vsel %vm31_vm0, %v590_v0, 0.0 }
 0x265   :  { %v1280_v36 = vsub.f32 %v1187_v7, %v564_v62  ;;  %v522_v9 = vpop.xlane.xlu0 %521 }
 0x266   :  { %v561_v10 = vmul.f32 0.03125, %v522_v9  ;;  %v525_v11 = vpop.xlane.xlu1 %524  ;;  %v595_v14 = vmul.f32 %v1277_v1, %v1277_v1 }
 0x267   :  { %v562_v17 = vmul.f32 0.03125, %v525_v11  ;;  %v596_v19 = vmul.f32 %v1280_v36, %v1280_v36 }
 0x268   :  { %v1288_v51 = vsub.f32 %v1190_v58, %v561_v10  ;;  %609 = vadd.xlane.f32.xlu1 %v608_v18  ;;  %v623_v25 = vsel %vm31_vm0, %v595_v14, 0.0 }
 0x269   :  { %v1292_v7 = vsub.f32 %v1195_v8, %v562_v17  ;;  %624 = vadd.xlane.f32.xlu0 %v623_v25  ;;  %v540_v21 = vpop.xlane.xlu0 %539  ;;  %v626_v6 = vsel %vm31_vm0, %v596_v19, 0.0 }
 0x26a   :  { %v567_v27 = vmul.f32 0.03125, %v540_v21  ;;  %v543_v28 = vpop.xlane.xlu1 %542  ;;  %v593_v15 = vmul.f32 %v1288_v51, %v1288_v51 }
 0x26b   :  { %v568_v33 = vmul.f32 0.03125, %v543_v28  ;;  %v594_v58 = vmul.f32 %v1292_v7, %v1292_v7 }
 0x26c   :  { %v1300_v34 = vsub.f32 %v1207_v26, %v567_v27  ;;  %627 = vadd.xlane.f32.xlu1 %v626_v6  ;;  %v617_v8 = vsel %vm31_vm0, %v593_v15, 0.0 }
 0x26d   :  { %v1304_v16 = vsub.f32 %v1215_v2, %v568_v33  ;;  %618 = vadd.xlane.f32.xlu0 %v617_v8  ;;  %v534_v37 = vpop.xlane.xlu0 %533  ;;  %v620_v42 = vsel %vm31_vm0, %v594_v58, 0.0 }
 0x26e   :  { %v565_v38 = vmul.f32 0.03125, %v534_v37  ;;  %v537_v3 = vpop.xlane.xlu1 %536  ;;  %v599_v39 = vmul.f32 %v1300_v34, %v1300_v34 }
 0x26f   :  { %v566_v40 = vmul.f32 0.03125, %v537_v3  ;;  %v600_v26 = vmul.f32 %v1304_v16, %v1304_v16 }
 0x270   :  { %v1312_v43 = vsub.f32 %v1218_v31, %v565_v38  ;;  %621 = vadd.xlane.f32.xlu1 %v620_v42  ;;  %v635_v2 = vsel %vm31_vm0, %v599_v39, 0.0  ;;  %v1352_v38 = vld [vmem:[%s1476_s5] ss:$0 sm:$0xff] }
 0x271   :  { %v1316_v44 = vsub.f32 %v1223_v22, %v566_v40  ;;  %636 = vadd.xlane.f32.xlu0 %v635_v2  ;;  %v546_v45 = vpop.xlane.xlu0 %545  ;;  %v638_v48 = vsel %vm31_vm0, %v600_v26, 0.0  ;;  %v1358_v26 = vld [vmem:[%s1477_s6] ss:$0 sm:$0xff] }
 0x272   :  { %v569_v24 = vmul.f32 0.03125, %v546_v45  ;;  %v597_v30 = vmul.f32 %v1312_v43, %v1312_v43 }
 0x273   :  { %v549_v47 = vpop.xlane.xlu1 %548  ;;  %v598_v49 = vmul.f32 %v1316_v44, %v1316_v44 }
 0x274   :  { %v1324_v31 = vsub.f32 %v1232_v41, %v569_v24  ;;  %v570_v50 = vmul.f32 0.03125, %v549_v47  ;;  %639 = vadd.xlane.f32.xlu1 %v638_v48  ;;  %v629_v22 = vsel %vm31_vm0, %v597_v30, 0.0 }
 0x275   :  { %630 = vadd.xlane.f32.xlu0 %v629_v22  ;;  %v552_v4 = vpop.xlane.xlu0 %551  ;;  %v632_v57 = vsel %vm31_vm0, %v598_v49, 0.0 }
 0x276   :  { %v1328_v53 = vsub.f32 %v1239_v23, %v570_v50  ;;  %v571_v54 = vmul.f32 0.03125, %v552_v4  ;;  %v601_v35 = vmul.f32 %v1324_v31, %v1324_v31 }
 0x277   :  { %v555_v55 = vpop.xlane.xlu1 %554 }
 0x278   :  { %v1334_v59 = vsub.f32 %v1242_v29, %v571_v54  ;;  %v572_v41 = vmul.f32 0.03125, %v555_v55  ;;  %633 = vadd.xlane.f32.xlu1 %v632_v57  ;;  %v641_v5 = vsel %vm31_vm0, %v601_v35, 0.0  ;;  %v602_v13 = vmul.f32 %v1328_v53, %v1328_v53 }
 0x279   :  { %642 = vadd.xlane.f32.xlu0 %v641_v5 }
 0x27a   :  { %v1340_v23 = vsub.f32 %v1247_v46, %v572_v41  ;;  %v644_v60 = vsel %vm31_vm0, %v602_v13, 0.0  ;;  %v603_v61 = vmul.f32 %v1334_v59, %v1334_v59 }
 0x27c   :  { %645 = vadd.xlane.f32.xlu1 %v644_v60  ;;  %v647_v29 = vsel %vm31_vm0, %v603_v61, 0.0  ;;  %v604_v62 = vmul.f32 %v1340_v23, %v1340_v23 }
 0x27d   :  { %648 = vadd.xlane.f32.xlu0 %v647_v29 }
 0x27e   :  { %v650_v63 = vsel %vm31_vm0, %v604_v62, 0.0 }
 0x280   :  { %651 = vadd.xlane.f32.xlu1 %v650_v63 }
 0x2ed   :  { %v613_v32 = vpop.xlane.xlu0 %612 }
 0x2ee   :  { %v655_v0 = vmul.f32 0.03125, %v613_v32 }
 0x2f0   :  { %v671_v9 = vadd.f32 1e-05, %v655_v0 }
 0x2f1   :  { %v616_v46 = vpop.xlane.xlu1 %615  ;;  %v607_v10 = vpop.xlane.xlu0 %606 }
 0x2f2   :  { %910 = vrsqrt.f32 %v671_v9  ;;  %v656_v11 = vmul.f32 0.03125, %v616_v46  ;;  %v653_v14 = vmul.f32 0.03125, %v607_v10 }
 0x2f4   :  { %v672_v17 = vadd.f32 1e-05, %v656_v11  ;;  %v669_v18 = vadd.f32 1e-05, %v653_v14 }
 0x2f5   :  { %v610_v19 = vpop.xlane.xlu1 %609 }
 0x2f6   :  { %912 = vrsqrt.f32 %v672_v17  ;;  %v654_v25 = vmul.f32 0.03125, %v610_v19  ;;  %v625_v21 = vpop.xlane.xlu0 %624 }
 0x2f7   :  { %914 = vrsqrt.f32 %v669_v18  ;;  %v659_v27 = vmul.f32 0.03125, %v625_v21 }
 0x2f8   :  { %v670_v28 = vadd.f32 1e-05, %v654_v25 }
 0x2f9   :  { %v675_v15 = vadd.f32 1e-05, %v659_v27  ;;  %v628_v33 = vpop.xlane.xlu1 %627 }
 0x2fa   :  { %916 = vrsqrt.f32 %v670_v28  ;;  %v660_v6 = vmul.f32 0.03125, %v628_v33  ;;  %v619_v58 = vpop.xlane.xlu0 %618 }
 0x2fb   :  { %918 = vrsqrt.f32 %v675_v15  ;;  %v657_v8 = vmul.f32 0.03125, %v619_v58 }
 0x2fc   :  { %v911_v37 = vpop.eup %910  ;;  %v676_v3 = vadd.f32 1e-05, %v660_v6 }
 0x2fd   :  { %v703_v39 = vmul.f32 %v911_v37, %v1254_v52  ;;  %v673_v40 = vadd.f32 1e-05, %v657_v8  ;;  %v622_v42 = vpop.xlane.xlu1 %621 }
 0x2fe   :  { %920 = vrsqrt.f32 %v676_v3  ;;  %v658_v2 = vmul.f32 0.03125, %v622_v42  ;;  %v637_v45 = vpop.xlane.xlu0 %636 }
 0x2ff   :  { %v726_v24 = vmul.f32 %v1352_v38, %v703_v39  ;;  %922 = vrsqrt.f32 %v673_v40  ;;  %v663_v30 = vmul.f32 0.03125, %v637_v45 }
 0x300   :  { %v913_v47 = vpop.eup %912  ;;  %v674_v48 = vadd.f32 1e-05, %v658_v2 }
 0x301   :  { %v915_v49 = vpop.eup %914  ;;  %v749_v50 = vadd.f32 %v1358_v26, %v726_v24  ;;  %v704_v52 = vmul.f32 %v913_v47, %v1262_v56  ;;  %v679_v22 = vadd.f32 1e-05, %v663_v30  ;;  %v640_v4 = vpop.xlane.xlu1 %639 }
 0x302   :  { %v701_v54 = vmul.f32 %v915_v49, %v1257_v12  ;;  %924 = vrsqrt.f32 %v674_v48  ;;  %v664_v35 = vmul.f32 0.03125, %v640_v4  ;;  %v631_v55 = vpop.xlane.xlu0 %630 }
 0x303   :  { %765 = vst.msk [vmem:[%s1478_s7 + $0x10] sm:$0xff] %vm31_vm0, %v749_v50  ;;  %v727_v57 = vmul.f32 %v1352_v38, %v704_v52  ;;  %926 = vrsqrt.f32 %v679_v22  ;;  %v661_v41 = vmul.f32 0.03125, %v631_v55 }
 0x304   :  { %v917_v5 = vpop.eup %916  ;;  %v724_v13 = vmul.f32 %v1352_v38, %v701_v54  ;;  %v680_v56 = vadd.f32 1e-05, %v664_v35 }
 0x305   :  { %v919_v60 = vpop.eup %918  ;;  %v750_v61 = vadd.f32 %v1358_v26, %v727_v57  ;;  %v702_v12 = vmul.f32 %v917_v5, %v1268_v20  ;;  %v677_v29 = vadd.f32 1e-05, %v661_v41  ;;  %v634_v62 = vpop.xlane.xlu1 %633 }
 0x306   :  { %v747_v63 = vadd.f32 %v1358_v26, %v724_v13  ;;  %v707_v32 = vmul.f32 %v919_v60, %v1277_v1  ;;  %928 = vrsqrt.f32 %v680_v56  ;;  %v662_v0 = vmul.f32 0.03125, %v634_v62  ;;  %v643_v9 = vpop.xlane.xlu0 %642 }
 0x307   :  { %766 = vst.msk [vmem:[%s1478_s7 + $0x18] sm:$0xff] %vm31_vm0, %v750_v61  ;;  %v725_v46 = vmul.f32 %v1352_v38, %v702_v12  ;;  %930 = vrsqrt.f32 %v677_v29  ;;  %v665_v10 = vmul.f32 0.03125, %v643_v9 }
 0x308   :  { %v921_v11 = vpop.eup %920  ;;  %763 = vst.msk [vmem:[%s1478_s7] sm:$0xff] %vm31_vm0, %v747_v63  ;;  %v730_v20 = vmul.f32 %v1352_v38, %v707_v32  ;;  %v678_v1 = vadd.f32 1e-05, %v662_v0 }
 0x309   :  { %v923_v14 = vpop.eup %922  ;;  %v748_v17 = vadd.f32 %v1358_v26, %v725_v46  ;;  %v708_v18 = vmul.f32 %v921_v11, %v1280_v36  ;;  %v681_v19 = vadd.f32 1e-05, %v665_v10  ;;  %v646_v25 = vpop.xlane.xlu1 %645 }
 0x30a   :  { %v753_v21 = vadd.f32 %v1358_v26, %v730_v20  ;;  %v705_v27 = vmul.f32 %v923_v14, %v1288_v51  ;;  %932 = vrsqrt.f32 %v678_v1  ;;  %v666_v28 = vmul.f32 0.03125, %v646_v25  ;;  %v649_v15 = vpop.xlane.xlu0 %648 }
 0x30b   :  { %764 = vst.msk [vmem:[%s1478_s7 + $0x8] sm:$0xff] %vm31_vm0, %v748_v17  ;;  %v731_v33 = vmul.f32 %v1352_v38, %v708_v18  ;;  %934 = vrsqrt.f32 %v681_v19  ;;  %v667_v6 = vmul.f32 0.03125, %v649_v15 }
 0x30c   :  { %v925_v58 = vpop.eup %924  ;;  %769 = vst.msk [vmem:[%s1478_s7 + $0x30] sm:$0xff] %vm31_vm0, %v753_v21  ;;  %v728_v36 = vmul.f32 %v1352_v38, %v705_v27  ;;  %v682_v51 = vadd.f32 1e-05, %v666_v28 }
 0x30d   :  { %v927_v8 = vpop.eup %926  ;;  %v754_v37 = vadd.f32 %v1358_v26, %v731_v33  ;;  %v706_v3 = vmul.f32 %v925_v58, %v1292_v7  ;;  %v683_v39 = vadd.f32 1e-05, %v667_v6  ;;  %v652_v40 = vpop.xlane.xlu1 %651 }
 0x30e   :  { %v751_v42 = vadd.f32 %v1358_v26, %v728_v36  ;;  %v711_v2 = vmul.f32 %v927_v8, %v1300_v34  ;;  %936 = vrsqrt.f32 %v682_v51  ;;  %v668_v45 = vmul.f32 0.03125, %v652_v40 }
 0x30f   :  { %770 = vst.msk [vmem:[%s1478_s7 + $0x38] sm:$0xff] %vm31_vm0, %v754_v37  ;;  %v729_v24 = vmul.f32 %v1352_v38, %v706_v3  ;;  %938 = vrsqrt.f32 %v683_v39 }
 0x310   :  { %v929_v30 = vpop.eup %928  ;;  %767 = vst.msk [vmem:[%s1478_s7 + $0x20] sm:$0xff] %vm31_vm0, %v751_v42  ;;  %v734_v7 = vmul.f32 %v1352_v38, %v711_v2  ;;  %v684_v47 = vadd.f32 1e-05, %v668_v45 }
 0x311   :  { %v931_v34 = vpop.eup %930  ;;  %v752_v48 = vadd.f32 %v1358_v26, %v729_v24  ;;  %v712_v49 = vmul.f32 %v929_v30, %v1304_v16 }
 0x312   :  { %v757_v50 = vadd.f32 %v1358_v26, %v734_v7  ;;  %v709_v52 = vmul.f32 %v931_v34, %v1312_v43  ;;  %940 = vrsqrt.f32 %v684_v47 }
 0x313   :  { %768 = vst.msk [vmem:[%s1478_s7 + $0x28] sm:$0xff] %vm31_vm0, %v752_v48  ;;  %v735_v22 = vmul.f32 %v1352_v38, %v712_v49 }
 0x314   :  { %v933_v4 = vpop.eup %932  ;;  %773 = vst.msk [vmem:[%s1478_s7 + $0x50] sm:$0xff] %vm31_vm0, %v757_v50  ;;  %v732_v16 = vmul.f32 %v1352_v38, %v709_v52 }
 0x315   :  { %v935_v54 = vpop.eup %934  ;;  %v758_v35 = vadd.f32 %v1358_v26, %v735_v22  ;;  %v710_v43 = vmul.f32 %v933_v4, %v1316_v44 }
 0x316   :  { %v755_v55 = vadd.f32 %v1358_v26, %v732_v16  ;;  %v713_v57 = vmul.f32 %v935_v54, %v1324_v31 }
 0x317   :  { %774 = vst.msk [vmem:[%s1478_s7 + $0x58] sm:$0xff] %vm31_vm0, %v758_v35  ;;  %v733_v41 = vmul.f32 %v1352_v38, %v710_v43 }
 0x318   :  { %v937_v5 = vpop.eup %936  ;;  %771 = vst.msk [vmem:[%s1478_s7 + $0x40] sm:$0xff] %vm31_vm0, %v755_v55  ;;  %v736_v13 = vmul.f32 %v1352_v38, %v713_v57 }
 0x319   :  { %v939_v44 = vpop.eup %938  ;;  %v756_v56 = vadd.f32 %v1358_v26, %v733_v41  ;;  %v714_v31 = vmul.f32 %v937_v5, %v1328_v53 }
 0x31a   :  { %v759_v60 = vadd.f32 %v1358_v26, %v736_v13  ;;  %v715_v61 = vmul.f32 %v939_v44, %v1334_v59 }
 0x31b   :  { %772 = vst.msk [vmem:[%s1478_s7 + $0x48] sm:$0xff] %vm31_vm0, %v756_v56  ;;  %v737_v12 = vmul.f32 %v1352_v38, %v714_v31 }
 0x31c   :  { %v941_v29 = vpop.eup %940  ;;  %775 = vst.msk [vmem:[%s1478_s7 + $0x60] sm:$0xff] %vm31_vm0, %v759_v60  ;;  %v738_v62 = vmul.f32 %v1352_v38, %v715_v61 }
 0x31d   :  { %v760_v53 = vadd.f32 %v1358_v26, %v737_v12  ;;  %v716_v63 = vmul.f32 %v941_v29, %v1340_v23 }
 0x31e   :  { %v761_v59 = vadd.f32 %v1358_v26, %v738_v62 }
 0x31f   :  { %776 = vst.msk [vmem:[%s1478_s7 + $0x68] sm:$0xff] %vm31_vm0, %v760_v53  ;;  %v739_v32 = vmul.f32 %v1352_v38, %v716_v63 }
 0x320   :  { %777 = vst.msk [vmem:[%s1478_s7 + $0x70] sm:$0xff] %vm31_vm0, %v761_v59 }
 0x321   :  { %v762_v0 = vadd.f32 %v1358_v26, %v739_v32 }
 0x323   :  { %778 = vst.msk [vmem:[%s1478_s7 + $0x78] sm:$0xff] %vm31_vm0, %v762_v0 }

// kernel: swin3d_encoder_forward.17
= control target key start
LH: loop header
LB: loop body
LE: loop exit
PB: predicated region body
PF: predicated region fallthrough
CT: control target
= control target key end

     0   :  { %s3987_s12 = smov 0   ;;  %s4981_s0 = inlined_call_operand.vmem [shape: f32[128,32], index: 0, kind: input, shape index: {}]   ;;  %s4982_s1 = inlined_call_operand.vmem [shape: bf16[32,96], index: 1, kind: input, shape index: {}]   ;;  %s4983_s2 = inlined_call_operand.vmem [shape: f32[1,96], index: 2, kind: input, shape index: {}]   ;;  %s4984_s3 = inlined_call_operand.vmem [shape: bf16[128,32], index: 3, kind: output, shape index: {}]  }
   0x1 LB: > { %s2961_s13 = sadd.s32 4294967295, %s3935_s12   ;;  %p2965_p0 = scmp.ge.s32.totalorder %s3935_s12, 1  ;;  %s3935_s12 = sphi %s3987_s12, %s13_s12  }
   0x2   : > { %p138_p1 = scmp.lt.s32.totalorder %s3935_s12, 3 }
   0x4   : > { %p139_p2 = pnand %p2965_p0, %p138_p1 }
   0x6   : > { %142 = sbr.rel (%p139_p2) target bundleno = 5443 (0x1543), region = 32 }
   0xd   : > { %v3671_v0 = vld [vmem:[%s4982_s1] sm:$0xff]   ;;  %s2966_s16 = sshll.u32 %s2961_s13, 3  ;;  %v3672_v1 = vld [vmem:[%s4982_s1 + $0x8] sm:$0xff]   ;;  %vm210_vm0 = vcmask 261120   ;;  %vm304_vm1 = vcmask 31744   ;;  %s3937_s25 = smov 96  }
   0xe   : > { %p163_p3 = scmp.lt.s32.totalorder %s2966_s16, 15  ;;  %3193 = vmatprep.subr.bf16.mxu0 %v3671_v0  ;;  %v2970_v15 = vld [vmem:[%s4983_s2] ss:$0 sm:$0xff]  ;;  %vm394_vm2 = vcmask 523264   ;;  %s3938_s26 = smov 64   ;;  %vm2810_vm3 = vcmask 64512  }
   0xf   : > { %3194 = vmatpush3.bf16.msra.mxu0 %v3671_v0  ;;  %s3939_s27 = smov 92   ;;  %s3940_s28 = smov 124   ;;  %vm2819_vm4 = vcmask 97280   ;;  %vm2828_vm5 = vcmask 130048   ;;  %vm2837_vm6 = vcmask 162816   ;;  %vm2846_vm7 = vcmask 195584  }
  0x10   : > { %s5065_s16 = smov (!%p163_p3, %s2966_s16), 15  ;;  %3195 = vmatprep.subr.bf16.mxu0 %v3672_v1  ;;  %s3941_s29 = smov 60   ;;  %vm2855_vm8 = vcmask 228352   ;;  %vm2896_vm9 = vcmask 257024  }
  0x11   : > { %s2967_s19 = sshll.u32 %s5065_s16, 3  ;;  %s3942_s30 = smov 88  }
  0x12   : > { %s166_s22 = scalar_lea.vmem %s4981_s0, %s2967_s19  ;;  %s3943_s4 = smov 120  }
  0x13   : > { %3196 = vmatpush3.bf16.msra.mxu0 %v3672_v1  ;;  %v175_v2 = vld [vmem:[%s166_s22] sm:$0xff]  ;;  %v176_v3 = vld [vmem:[%s166_s22 + $0x8] sm:$0xff]  ;;  %v177_v4 = vld [vmem:[%s166_s22 + $0x10] sm:$0xff]  ;;  %s3944_s5 = smov 56   ;;  %s3945_s6 = smov 84  }
  0x14   : > { %v183_v5 = vpack.c.bf16 %v176_v3, %v175_v2  ;;  %v178_v6 = vld [vmem:[%s166_s22 + $0x18] sm:$0xff]  ;;  %v179_v7 = vld [vmem:[%s166_s22 + $0x20] sm:$0xff]  ;;  %v180_v8 = vld [vmem:[%s166_s22 + $0x28] sm:$0xff]  ;;  %s3946_s7 = smov 116   ;;  %s3947_s8 = smov 52  }
  0x15   : > { %v184_v9 = vpack.c.bf16 %v178_v6, %v177_v4  ;;  %v185_v10 = vpack.c.bf16 %v180_v8, %v179_v7  ;;  %v181_v11 = vld [vmem:[%s166_s22 + $0x30] sm:$0xff]  ;;  %v182_v12 = vld [vmem:[%s166_s22 + $0x38] sm:$0xff]  ;;  %s3948_s9 = smov 80   ;;  %s3949_s10 = smov 112  }
  0x16   : > { %3197 = vmatprep.mubr.msk.bf16.mxu0 %vm210_vm0, %v183_v5  ;;  %v186_v13 = vpack.c.bf16 %v182_v12, %v181_v11  ;;  %s3950_s11 = smov 48   ;;  %s3951_s13 = smov 76  }
  0x17   : > { %3198 = vmatmul.mubr.msk.bf16.vlgmr.msra.gmra.mrb[0].mxu0 %vm210_vm0, %v184_v9  ;;  %s3952_s14 = smov 108   ;;  %s3953_s15 = smov 44  }
  0x18   : > { %3201 = vmatprep.mubr.msk.bf16.mxu0 %vm210_vm0, %v185_v10  ;;  %s3954_s17 = smov 72   ;;  %s3955_s18 = smov 104  }
  0x19   : > { %s3956_s19 = smov 40   ;;  %s3957_s20 = smov 68  }
  0x1a   : > { %s3958_s21 = smov 100   ;;  %s3959_s22 = smov 36  }
  0x1b   : > { %s3960_s23 = smov 4   ;;  %s3961_s24 = smov 8  }
  0x1f   : > { %3202 = vmatmul.mubr.msk.bf16.gmra.mrb[4].mxu0 %vm210_vm0, %v186_v13 }
  0xea   : > { %v3199_v14 = vpop.f32.mrb[0].mxu0 }
  0xeb   : > { %v257_v16 = vpop.f32.mrb[1].mxu0  ;;  %v266_v18 = vadd.f32 %v3199_v14, %v2970_v15 }
  0xec   : > { %v3200_v17 = vpop.f32.mrb[2].mxu0  ;;  %v258_v21 = vadd.f32 %v2970_v15, %v257_v16 }
  0xed   : > { %v269_v19 = vadd.f32 %v3200_v17, %v2970_v15  ;;  %v260_v20 = vpop.f32.mrb[3].mxu0 }
  0xee   : > { %v261_v22 = vadd.f32 %v2970_v15, %v260_v20 }
  0xef   : > { %v4010_v23 = vpack.c.bf16 %v269_v19, %v266_v18 }
  0xf0   : > { %v4012_v24 = vpack.c.bf16 %v261_v22, %v258_v21 }
  0xf2   : > { %296 = vrot.lane.b32.xlu0 %v4012_v24, %s3937_s25  ;;  %3213 = vmatprep.mubr.msk.bf16.mxu1 %vm304_vm1, %v4012_v24  ;;  %v3203_v25 = vpop.f32.mrb[4].mxu0 }
  0xf3   : > { %v282_v26 = vadd.f32 %v3203_v25, %v2970_v15  ;;  %v273_v27 = vpop.f32.mrb[5].mxu0 }
  0xf4   : > { %v274_v28 = vadd.f32 %v2970_v15, %v273_v27  ;;  %v3204_v29 = vpop.f32.mrb[6].mxu0 }
  0xf5   : > { %v285_v30 = vadd.f32 %v3204_v29, %v2970_v15  ;;  %v276_v31 = vpop.f32.mrb[7].mxu0 }
  0xf6   : > { %v277_v32 = vadd.f32 %v2970_v15, %v276_v31  ;;  %298 = vrot.lane.b32.xlu0 %v4010_v23, %s3937_s25 }
  0xf7   : > { %v4018_v33 = vpack.c.bf16 %v285_v30, %v282_v26 }
  0xf8   : > { %v4020_v34 = vpack.c.bf16 %v277_v32, %v274_v28 }
  0xfa   : > { %300 = vrot.lane.b32.xlu1 %v4020_v34, %s3937_s25 }
  0xfe   : > { %302 = vrot.lane.b32.xlu1 %v4018_v33, %s3937_s25  ;;  %s3962_s25 = smov 12  }
 0x164   : > { %v297_v35 = vpop.permute.xlu0 %296 }
 0x165   : > { %3461 = vmatprep.subr.msk.bf16.mxu1 %vm304_vm1, %v297_v35  ;;  %v318_v36 = vsel %vm304_vm1, %v297_v35, 0 }
 0x166   : > { %3206 = vmatpush3.bf16.xpose.msra.mxu1 %v318_v36 }
 0x168   : > { %v299_v37 = vpop.permute.xlu0 %298 }
 0x169   : > { %3462 = vmatprep.subr.msk.bf16.mxu1 %vm304_vm1, %v299_v37  ;;  %v321_v38 = vsel %vm304_vm1, %v299_v37, 0 }
 0x16c   : > { %v301_v39 = vpop.permute.xlu1 %300 }
 0x16d   : > { %v324_v40 = vsel %vm304_vm1, %v301_v39, 0 }
 0x16e   : > { %3208 = vmatpush3.bf16.xpose.msra.mxu1 %v321_v38 }
 0x16f   : > { %3463 = vmatprep.subr.msk.bf16.mxu1 %vm304_vm1, %v301_v39 }
 0x170   : > { %v303_v41 = vpop.permute.xlu1 %302 }
 0x171   : > { %v327_v42 = vsel %vm304_vm1, %v303_v41, 0 }
 0x176   : > { %3210 = vmatpush3.bf16.xpose.msra.mxu1 %v324_v40 }
 0x177   : > { %3464 = vmatprep.subr.msk.bf16.mxu1 %vm304_vm1, %v303_v41 }
 0x17e   : > { %3212 = vmatpush3.bf16.xpose.msra.mxu1 %v327_v42 }
 0x185   : > { %3214 = vmatmul.mubr.msk.bf16.vlgmr.msra.gmra.mrb[0].mxu1 %vm304_vm1, %v4010_v23 }
 0x186   : > { %3217 = vmatprep.mubr.msk.bf16.mxu1 %vm304_vm1, %v4020_v34 }
 0x18d   : > { %3218 = vmatmul.mubr.msk.bf16.gmra.mrb[4].mxu1 %vm304_vm1, %v4018_v33 }
 0x258   : > { %v3215_v43 = vpop.f32.mrb[0].mxu1 }
 0x259   : > { %v363_v44 = vpop.f32.mrb[1].mxu1  ;;  %v401_v45 = vsel %vm394_vm2, %v3215_v43, -inf }
 0x25a   : > { %402 = vmax.xlane.f32.xlu0 %v401_v45  ;;  %v3216_v46 = vpop.f32.mrb[2].mxu1  ;;  %v395_v49 = vsel %vm394_vm2, %v363_v44, -inf }
 0x25b   : > { %v366_v47 = vpop.f32.mrb[3].mxu1  ;;  %v404_v52 = vsel %vm394_vm2, %v3216_v46, -inf }
 0x25c   : > { %v398_v48 = vsel %vm394_vm2, %v366_v47, -inf }
 0x25d   : > { %399 = vmax.xlane.f32.xlu1 %v398_v48 }
 0x25e   : > { %396 = vmax.xlane.f32.xlu0 %v395_v49 }
 0x260   : > { %v3219_v50 = vpop.f32.mrb[4].mxu1 }
 0x261   : > { %v379_v51 = vpop.f32.mrb[5].mxu1  ;;  %v413_v53 = vsel %vm394_vm2, %v3219_v50, -inf }
 0x262   : > { %405 = vmax.xlane.f32.xlu0 %v404_v52  ;;  %414 = vmax.xlane.f32.xlu1 %v413_v53  ;;  %v3220_v54 = vpop.f32.mrb[6].mxu1  ;;  %v407_v57 = vsel %vm394_vm2, %v379_v51, -inf }
 0x263   : > { %v4043_v55 = vpop.f32.mrb[7].mxu1  ;;  %v416_v58 = vsel %vm394_vm2, %v3220_v54, -inf }
 0x264   : > { %v410_v56 = vsel %vm394_vm2, %v4043_v55, -inf }
 0x266   : > { %408 = vmax.xlane.f32.xlu1 %v407_v57  ;;  %411 = vmax.xlane.f32.xlu0 %v410_v56 }
 0x26a   : > { %417 = vmax.xlane.f32.xlu0 %v416_v58 }
 0x277   : > { %487 = vrot.lane.b32.xlu1 %v4012_v24, %s3938_s26 }
 0x27b   : > { %491 = vrot.lane.b32.xlu1 %v4020_v34, %s3938_s26 }
 0x27f   : > { %493 = vrot.lane.b32.xlu1 %v4018_v33, %s3938_s26 }
 0x280   : > { %489 = vrot.lane.b32.xlu0 %v4010_v23, %s3938_s26  ;;  %s3963_s26 = smov 16  }
 0x283   : > { %584 = vrot.lane.b32.xlu1 %v4012_v24, %s3939_s27 }
 0x2e7   : > { %v403_v59 = vpop.xlane.xlu0 %402 }
 0x2e8   : > { %v421_v60 = vsub.f32 %v3215_v43, %v403_v59 }
 0x2ea   : > { %v431_v61 = vmul.f32 1.442695, %v421_v60  ;;  %v400_v62 = vpop.xlane.xlu1 %399 }
 0x2eb   : > { %v397_v63 = vpop.xlane.xlu0 %396  ;;  %v420_v1 = vsub.f32 %v366_v47, %v400_v62 }
 0x2ec   : > { %3673 = vpow2.f32 %v431_v61  ;;  %v419_v0 = vsub.f32 %v363_v44, %v397_v63 }
 0x2ed   : > { %v429_v6 = vmul.f32 1.442695, %v420_v1 }
 0x2ee   : > { %v427_v2 = vmul.f32 1.442695, %v419_v0 }
 0x2ef   : > { %v406_v3 = vpop.xlane.xlu0 %405  ;;  %v415_v4 = vpop.xlane.xlu1 %414 }
 0x2f0   : > { %3675 = vpow2.f32 %v427_v2  ;;  %v422_v5 = vsub.f32 %v3216_v46, %v406_v3  ;;  %v425_v8 = vsub.f32 %v3219_v50, %v415_v4 }
 0x2f2   : > { %v433_v7 = vmul.f32 1.442695, %v422_v5  ;;  %v439_v12 = vmul.f32 1.442695, %v425_v8 }
 0x2f3   : > { %v409_v9 = vpop.xlane.xlu1 %408  ;;  %v412_v10 = vpop.xlane.xlu0 %411 }
 0x2f4   : > { %3677 = vpow2.f32 %v433_v7  ;;  %v423_v13 = vsub.f32 %v379_v51, %v409_v9  ;;  %v424_v40 = vsub.f32 %v4043_v55, %v412_v10 }
 0x2f5   : > { %3679 = vpow2.f32 %v429_v6 }
 0x2f6   : > { %v4055_v11 = vpop.eup %3673  ;;  %3681 = vpow2.f32 %v439_v12  ;;  %v435_v18 = vmul.f32 1.442695, %v423_v13  ;;  %v437_v41 = vmul.f32 1.442695, %v424_v40 }
 0x2f7   : > { %v488_v14 = vpop.permute.xlu1 %487  ;;  %v418_v15 = vpop.xlane.xlu0 %417  ;;  %v449_v16 = vsel %vm394_vm2, %v4055_v11, 0.0 }
 0x2f8   : > { %450 = vadd.xlane.f32.xlu1 %v449_v16  ;;  %3221 = vmatprep.subr.bf16.mxu0 %v488_v14  ;;  %v426_v19 = vsub.f32 %v3220_v54, %v418_v15  ;;  %3683 = vpow2.f32 %v435_v18 }
 0x2f9   : > { %3222 = vmatpush3.bf16.msra.mxu0 %v488_v14 }
 0x2fa   : > { %v4059_v17 = vpop.eup %3675  ;;  %v441_v26 = vmul.f32 1.442695, %v426_v19 }
 0x2fb   : > { %v492_v20 = vpop.permute.xlu1 %491  ;;  %v490_v21 = vpop.permute.xlu0 %489  ;;  %v443_v22 = vsel %vm394_vm2, %v4059_v17, 0.0 }
 0x2fc   : > { %444 = vadd.xlane.f32.xlu1 %v443_v22  ;;  %3223 = vmatprep.subr.bf16.mxu0 %v490_v21  ;;  %3685 = vpow2.f32 %v441_v26 }
 0x2fd   : > { %3224 = vmatpush3.bf16.msra.mxu0 %v490_v21  ;;  %3687 = vpow2.f32 %v437_v41 }
 0x2fe   : > { %v3678_v25 = vpop.eup %3677  ;;  %3225 = vmatprep.subr.bf16.mxu0 %v492_v20 }
 0x2ff   : > { %v494_v27 = vpop.permute.xlu1 %493  ;;  %v452_v28 = vsel %vm394_vm2, %v3678_v25, 0.0  ;;  %v3680_v29 = vpop.eup %3679 }
 0x300   : > { %453 = vadd.xlane.f32.xlu0 %v452_v28  ;;  %v446_v30 = vsel %vm394_vm2, %v3680_v29, 0.0  ;;  %v4065_v31 = vpop.eup %3681 }
 0x301   : > { %3226 = vmatpush3.bf16.msra.mxu0 %v492_v20  ;;  %v461_v35 = vsel %vm394_vm2, %v4065_v31, 0.0 }
 0x302   : > { %3227 = vmatprep.subr.bf16.mxu0 %v494_v27  ;;  %v4070_v36 = vpop.eup %3683 }
 0x303   : > { %v585_v32 = vpop.permute.xlu1 %584  ;;  %v455_v37 = vsel %vm394_vm2, %v4070_v36, 0.0 }
 0x304   : > { %447 = vadd.xlane.f32.xlu0 %v446_v30  ;;  %v605_v62 = vsel %vm304_vm1, %v585_v32, 0 }
 0x305   : > { %3228 = vmatpush3.bf16.msra.mxu0 %v494_v27 }
 0x306   : > { %3465 = vmatprep.subr.msk.bf16.mxu0 %vm304_vm1, %v585_v32  ;;  %v4074_v38 = vpop.eup %3685 }
 0x307   : > { %v464_v39 = vsel %vm394_vm2, %v4074_v38, 0.0  ;;  %v3688_v42 = vpop.eup %3687 }
 0x308   : > { %462 = vadd.xlane.f32.xlu0 %v461_v35  ;;  %v458_v43 = vsel %vm394_vm2, %v3688_v42, 0.0 }
 0x30c   : > { %456 = vadd.xlane.f32.xlu0 %v455_v37 }
 0x30d   : > { %588 = vrot.lane.b32.xlu1 %v4020_v34, %s3939_s27 }
 0x310   : > { %465 = vadd.xlane.f32.xlu0 %v464_v39 }
 0x326   : > { %586 = vrot.lane.b32.xlu0 %v4010_v23, %s3939_s27 }
 0x32a   : > { %576 = vrot.lane.b32.xlu0 %v4012_v24, %s3940_s28 }
 0x32e   : > { %580 = vrot.lane.b32.xlu0 %v4020_v34, %s3940_s28 }
 0x331   : > { %459 = vadd.xlane.f32.xlu1 %v458_v43 }
 0x342   : > { %590 = vrot.lane.b32.xlu1 %v4018_v33, %s3939_s27  ;;  %s3964_s27 = smov 20  }
 0x346   : > { %578 = vrot.lane.b32.xlu1 %v4010_v23, %s3940_s28 }
 0x34a   : > { %582 = vrot.lane.b32.xlu1 %v4018_v33, %s3940_s28  ;;  %s3965_s28 = smov 24  }
 0x385   : > { %v451_v44 = vpop.xlane.xlu1 %450 }
 0x389   : > { %v445_v45 = vpop.xlane.xlu1 %444 }
 0x38d   : > { %v454_v46 = vpop.xlane.xlu0 %453  ;;  %v589_v0 = vpop.permute.xlu1 %588 }
 0x38e   : > { %3689 = vrcp.f32 %v454_v46  ;;  %v611_v1 = vsel %vm304_vm1, %v589_v0, 0 }
 0x38f   : > { %3691 = vrcp.f32 %v445_v45 }
 0x390   : > { %3693 = vrcp.f32 %v451_v44 }
 0x391   : > { %v448_v47 = vpop.xlane.xlu0 %447 }
 0x392   : > { %3695 = vrcp.f32 %v448_v47 }
 0x395   : > { %v463_v48 = vpop.xlane.xlu0 %462 }
 0x398   : > { %v3690_v49 = vpop.eup %3689 }
 0x399   : > { %v457_v50 = vpop.xlane.xlu0 %456  ;;  %v3692_v51 = vpop.eup %3691  ;;  %v478_v54 = vmul.f32 %v3690_v49, %v3678_v25 }
 0x39a   : > { %v3694_v52 = vpop.eup %3693  ;;  %v475_v56 = vmul.f32 %v3692_v51, %v4059_v17 }
 0x39b   : > { %v477_v58 = vmul.f32 %v3694_v52, %v4055_v11 }
 0x39c   : > { %v3696_v53 = vpop.eup %3695 }
 0x39d   : > { %v466_v55 = vpop.xlane.xlu0 %465  ;;  %v476_v57 = vmul.f32 %v3696_v53, %v3680_v29  ;;  %v484_v60 = vpack.c.bf16 %v478_v54, %v477_v58 }
 0x39e   : > { %3697 = vrcp.f32 %v466_v55 }
 0x39f   : > { %v483_v59 = vpack.c.bf16 %v476_v57, %v475_v56  ;;  %3699 = vrcp.f32 %v457_v50 }
 0x3a0   : > { %3701 = vrcp.f32 %v463_v48 }
 0x3a1   : > { %3229 = vmatprep.mubr.msk.bf16.mxu0 %vm394_vm2, %v483_v59  ;;  %v587_v61 = vpop.permute.xlu0 %586 }
 0x3a2   : > { %3230 = vmatmul.mubr.msk.bf16.vlgmr.msra.gmra.mrb[8].mxu0 %vm394_vm2, %v484_v60  ;;  %v608_v63 = vsel %vm304_vm1, %v587_v61, 0 }
 0x3a3   : > { %3238 = vmatpush3.bf16.xpose.msra.mxu0 %v605_v62 }
 0x3a4   : > { %3466 = vmatprep.subr.msk.bf16.mxu0 %vm304_vm1, %v587_v61 }
 0x3a5   : > { %v577_v15 = vpop.permute.xlu0 %576 }
 0x3a8   : > { %v3698_v5 = vpop.eup %3697 }
 0x3a9   : > { %v3700_v6 = vpop.eup %3699  ;;  %v482_v9 = vmul.f32 %v3698_v5, %v4074_v38  ;;  %v581_v17 = vpop.permute.xlu0 %580 }
 0x3aa   : > { %v3702_v7 = vpop.eup %3701  ;;  %v479_v10 = vmul.f32 %v3700_v6, %v4070_v36 }
 0x3ab   : > { %3240 = vmatpush3.bf16.xpose.msra.mxu0 %v608_v63  ;;  %v481_v12 = vmul.f32 %v3702_v7, %v4065_v31 }
 0x3ac   : > { %3467 = vmatprep.subr.msk.bf16.mxu0 %vm304_vm1, %v589_v0 }
 0x3ad   : > { %v486_v14 = vpack.c.bf16 %v482_v9, %v481_v12 }
 0x3b3   : > { %3242 = vmatpush3.bf16.xpose.msra.mxu0 %v611_v1 }
 0x3be   : > { %v460_v2 = vpop.xlane.xlu1 %459 }
 0x3bf   : > { %3703 = vrcp.f32 %v460_v2 }
 0x3c2   : > { %v591_v3 = vpop.permute.xlu1 %590 }
 0x3c3   : > { %3468 = vmatprep.subr.msk.bf16.mxu0 %vm304_vm1, %v591_v3  ;;  %v614_v4 = vsel %vm304_vm1, %v591_v3, 0 }
 0x3c4   : > { %3244 = vmatpush3.bf16.xpose.msra.mxu0 %v614_v4 }
 0x3c6   : > { %v579_v16 = vpop.permute.xlu1 %578 }
 0x3c9   : > { %v3704_v8 = vpop.eup %3703 }
 0x3ca   : > { %v480_v11 = vmul.f32 %v3704_v8, %v3688_v42  ;;  %v583_v18 = vpop.permute.xlu1 %582 }
 0x3cc   : > { %v485_v13 = vpack.c.bf16 %v480_v11, %v479_v10 }
 0x3ce   : > { %3233 = vmatprep.mubr.msk.bf16.mxu0 %vm394_vm2, %v485_v13 }
 0x3cf   : > { %3234 = vmatmul.mubr.msk.bf16.gmra.mrb[12].mxu0 %vm394_vm2, %v486_v14 }
 0x3d0   : > { %3245 = vmatprep.mubr.msk.bf16.mxu0 %vm304_vm1, %v577_v15 }
 0x3d7   : > { %3246 = vmatmul.mubr.msk.bf16.vlgmr.msra.gmra.mrb[16].mxu0 %vm304_vm1, %v579_v16 }
 0x3d8   : > { %3249 = vmatprep.mubr.msk.bf16.mxu0 %vm304_vm1, %v581_v17 }
 0x3df   : > { %3250 = vmatmul.mubr.msk.bf16.gmra.mrb[20].mxu0 %vm304_vm1, %v583_v18 }
 0x475   : > { %v4110_v19 = vpop.f32.mrb[8].mxu0 }
 0x476   : > { %4998 = vst [vmem:[#allocation2_spill] sm:$0xff] %v4110_v19  ;;  %v4112_v20 = vpop.f32.mrb[9].mxu0 }
 0x477   : > { %4999 = vst [vmem:[#allocation3_spill] sm:$0xff] %v4112_v20  ;;  %v4114_v21 = vpop.f32.mrb[10].mxu0 }
 0x478   : > { %5000 = vst [vmem:[#allocation4_spill] sm:$0xff] %v4114_v21  ;;  %v4116_v22 = vpop.f32.mrb[11].mxu0 }
 0x479   : > { %5001 = vst [vmem:[#allocation5_spill] sm:$0xff] %v4116_v22 }
 0x4a2   : > { %v4118_v25 = vpop.f32.mrb[12].mxu0 }
 0x4a3   : > { %5002 = vst [vmem:[#allocation6_spill] sm:$0xff] %v4118_v25  ;;  %v4120_v26 = vpop.f32.mrb[13].mxu0 }
 0x4a4   : > { %5003 = vst [vmem:[#allocation7_spill] sm:$0xff] %v4120_v26  ;;  %v4122_v27 = vpop.f32.mrb[14].mxu0 }
 0x4a5   : > { %5004 = vst [vmem:[#allocation8_spill] sm:$0xff] %v4122_v27  ;;  %v4124_v28 = vpop.f32.mrb[15].mxu0 }
 0x4a6   : > { %5005 = vst [vmem:[#allocation9_spill] sm:$0xff] %v4124_v28 }
 0x4aa   : > { %v3247_v29 = vpop.f32.mrb[16].mxu0 }
 0x4ab   : > { %v650_v30 = vpop.f32.mrb[17].mxu0  ;;  %v687_v31 = vsel %vm394_vm2, %v3247_v29, -inf }
 0x4ac   : > { %688 = vmax.xlane.f32.xlu0 %v687_v31  ;;  %v3248_v32 = vpop.f32.mrb[18].mxu0  ;;  %v681_v37 = vsel %vm394_vm2, %v650_v30, -inf }
 0x4ad   : > { %v653_v35 = vpop.f32.mrb[19].mxu0  ;;  %v690_v40 = vsel %vm394_vm2, %v3248_v32, -inf }
 0x4ae   : > { %v684_v36 = vsel %vm394_vm2, %v653_v35, -inf }
 0x4af   : > { %685 = vmax.xlane.f32.xlu1 %v684_v36 }
 0x4b0   : > { %682 = vmax.xlane.f32.xlu0 %v681_v37 }
 0x4b2   : > { %v3251_v38 = vpop.f32.mrb[20].mxu0 }
 0x4b3   : > { %v666_v39 = vpop.f32.mrb[21].mxu0  ;;  %v699_v41 = vsel %vm394_vm2, %v3251_v38, -inf }
 0x4b4   : > { %691 = vmax.xlane.f32.xlu0 %v690_v40  ;;  %700 = vmax.xlane.f32.xlu1 %v699_v41  ;;  %v3252_v42 = vpop.f32.mrb[22].mxu0  ;;  %v693_v45 = vsel %vm394_vm2, %v666_v39, -inf }
 0x4b5   : > { %v4131_v43 = vpop.f32.mrb[23].mxu0  ;;  %v702_v46 = vsel %vm394_vm2, %v3252_v42, -inf }
 0x4b6   : > { %v696_v44 = vsel %vm394_vm2, %v4131_v43, -inf }
 0x4b8   : > { %694 = vmax.xlane.f32.xlu1 %v693_v45  ;;  %697 = vmax.xlane.f32.xlu0 %v696_v44 }
 0x4bc   : > { %703 = vmax.xlane.f32.xlu0 %v702_v46 }
 0x4c9   : > { %773 = vrot.lane.b32.xlu1 %v4012_v24, %s3941_s29 }
 0x4cd   : > { %777 = vrot.lane.b32.xlu1 %v4020_v34, %s3941_s29 }
 0x4d1   : > { %779 = vrot.lane.b32.xlu1 %v4018_v33, %s3941_s29 }
 0x4d2   : > { %775 = vrot.lane.b32.xlu0 %v4010_v23, %s3941_s29  ;;  %s3966_s29 = smov 28  }
 0x4d5   : > { %870 = vrot.lane.b32.xlu1 %v4012_v24, %s3942_s30 }
 0x539   : > { %v689_v47 = vpop.xlane.xlu0 %688 }
 0x53a   : > { %v707_v48 = vsub.f32 %v3247_v29, %v689_v47 }
 0x53c   : > { %v717_v49 = vmul.f32 1.442695, %v707_v48  ;;  %v686_v50 = vpop.xlane.xlu1 %685 }
 0x53d   : > { %v683_v51 = vpop.xlane.xlu0 %682  ;;  %v706_v54 = vsub.f32 %v653_v35, %v686_v50 }
 0x53e   : > { %3705 = vpow2.f32 %v717_v49  ;;  %v705_v52 = vsub.f32 %v650_v30, %v683_v51 }
 0x53f   : > { %v715_v59 = vmul.f32 1.442695, %v706_v54 }
 0x540   : > { %v713_v53 = vmul.f32 1.442695, %v705_v52 }
 0x541   : > { %v701_v55 = vpop.xlane.xlu1 %700  ;;  %v692_v56 = vpop.xlane.xlu0 %691 }
 0x542   : > { %3707 = vpow2.f32 %v713_v53  ;;  %v708_v57 = vsub.f32 %v3248_v32, %v692_v56  ;;  %v711_v60 = vsub.f32 %v3251_v38, %v701_v55 }
 0x544   : > { %v719_v58 = vmul.f32 1.442695, %v708_v57  ;;  %v725_v0 = vmul.f32 1.442695, %v711_v60 }
 0x545   : > { %v695_v61 = vpop.xlane.xlu1 %694  ;;  %v698_v62 = vpop.xlane.xlu0 %697 }
 0x546   : > { %3709 = vpow2.f32 %v719_v58  ;;  %v709_v1 = vsub.f32 %v666_v39, %v695_v61  ;;  %v710_v36 = vsub.f32 %v4131_v43, %v698_v62 }
 0x547   : > { %3711 = vpow2.f32 %v715_v59 }
 0x548   : > { %v4143_v63 = vpop.eup %3705  ;;  %3713 = vpow2.f32 %v725_v0  ;;  %v721_v6 = vmul.f32 1.442695, %v709_v1  ;;  %v723_v37 = vmul.f32 1.442695, %v710_v36 }
 0x549   : > { %v774_v2 = vpop.permute.xlu1 %773  ;;  %v704_v3 = vpop.xlane.xlu0 %703  ;;  %v735_v4 = vsel %vm394_vm2, %v4143_v63, 0.0 }
 0x54a   : > { %3253 = vmatprep.subr.bf16.mxu1 %v774_v2  ;;  %736 = vadd.xlane.f32.xlu1 %v735_v4  ;;  %v712_v7 = vsub.f32 %v3252_v42, %v704_v3  ;;  %3715 = vpow2.f32 %v721_v6 }
 0x54b   : > { %3254 = vmatpush3.bf16.msra.mxu1 %v774_v2 }
 0x54c   : > { %v4147_v5 = vpop.eup %3707  ;;  %v727_v12 = vmul.f32 1.442695, %v712_v7 }
 0x54d   : > { %v778_v8 = vpop.permute.xlu1 %777  ;;  %v776_v9 = vpop.permute.xlu0 %775  ;;  %v729_v10 = vsel %vm394_vm2, %v4147_v5, 0.0 }
 0x54e   : > { %730 = vadd.xlane.f32.xlu1 %v729_v10  ;;  %3255 = vmatprep.subr.bf16.mxu1 %v776_v9  ;;  %3717 = vpow2.f32 %v727_v12 }
 0x54f   : > { %3256 = vmatpush3.bf16.msra.mxu1 %v776_v9  ;;  %3719 = vpow2.f32 %v723_v37 }
 0x550   : > { %3257 = vmatprep.subr.bf16.mxu1 %v778_v8  ;;  %v3710_v11 = vpop.eup %3709 }
 0x551   : > { %v780_v13 = vpop.permute.xlu1 %779  ;;  %v738_v14 = vsel %vm394_vm2, %v3710_v11, 0.0  ;;  %v3712_v15 = vpop.eup %3711 }
 0x552   : > { %739 = vadd.xlane.f32.xlu0 %v738_v14  ;;  %v732_v16 = vsel %vm394_vm2, %v3712_v15, 0.0  ;;  %v4153_v17 = vpop.eup %3713 }
 0x553   : > { %3258 = vmatpush3.bf16.msra.mxu1 %v778_v8  ;;  %v747_v29 = vsel %vm394_vm2, %v4153_v17, 0.0 }
 0x554   : > { %3259 = vmatprep.subr.bf16.mxu1 %v780_v13  ;;  %v4158_v30 = vpop.eup %3715 }
 0x555   : > { %v871_v18 = vpop.permute.xlu1 %870  ;;  %v741_v31 = vsel %vm394_vm2, %v4158_v30, 0.0 }
 0x556   : > { %733 = vadd.xlane.f32.xlu0 %v732_v16  ;;  %v891_v58 = vsel %vm304_vm1, %v871_v18, 0 }
 0x557   : > { %3260 = vmatpush3.bf16.msra.mxu1 %v780_v13 }
 0x558   : > { %3469 = vmatprep.subr.msk.bf16.mxu1 %vm304_vm1, %v871_v18  ;;  %v4162_v32 = vpop.eup %3717 }
 0x559   : > { %v750_v35 = vsel %vm394_vm2, %v4162_v32, 0.0  ;;  %v3720_v38 = vpop.eup %3719 }
 0x55a   : > { %748 = vadd.xlane.f32.xlu0 %v747_v29  ;;  %v744_v39 = vsel %vm394_vm2, %v3720_v38, 0.0 }
 0x55e   : > { %742 = vadd.xlane.f32.xlu0 %v741_v31 }
 0x55f   : > { %874 = vrot.lane.b32.xlu1 %v4020_v34, %s3942_s30 }
 0x562   : > { %751 = vadd.xlane.f32.xlu0 %v750_v35 }
 0x578   : > { %872 = vrot.lane.b32.xlu0 %v4010_v23, %s3942_s30 }
 0x57c   : > { %862 = vrot.lane.b32.xlu0 %v4012_v24, %s3943_s4 }
 0x580   : > { %866 = vrot.lane.b32.xlu0 %v4020_v34, %s3943_s4 }
 0x583   : > { %745 = vadd.xlane.f32.xlu1 %v744_v39 }
 0x594   : > { %876 = vrot.lane.b32.xlu1 %v4018_v33, %s3942_s30  ;;  %s2969_s30 = sshll.u32 %s5065_s16, 2 }
 0x598   : > { %864 = vrot.lane.b32.xlu1 %v4010_v23, %s3943_s4 }
 0x59c   : > { %868 = vrot.lane.b32.xlu1 %v4018_v33, %s3943_s4 }
 0x5d7   : > { %v737_v40 = vpop.xlane.xlu1 %736 }
 0x5db   : > { %v731_v41 = vpop.xlane.xlu1 %730 }
 0x5df   : > { %v740_v42 = vpop.xlane.xlu0 %739  ;;  %v875_v60 = vpop.permute.xlu1 %874 }
 0x5e0   : > { %3721 = vrcp.f32 %v740_v42  ;;  %v897_v61 = vsel %vm304_vm1, %v875_v60, 0 }
 0x5e1   : > { %3723 = vrcp.f32 %v731_v41 }
 0x5e2   : > { %3725 = vrcp.f32 %v737_v40 }
 0x5e3   : > { %v734_v43 = vpop.xlane.xlu0 %733 }
 0x5e4   : > { %3727 = vrcp.f32 %v734_v43 }
 0x5e7   : > { %v749_v44 = vpop.xlane.xlu0 %748 }
 0x5ea   : > { %v3722_v45 = vpop.eup %3721 }
 0x5eb   : > { %v743_v46 = vpop.xlane.xlu0 %742  ;;  %v3724_v47 = vpop.eup %3723  ;;  %v764_v50 = vmul.f32 %v3722_v45, %v3710_v11 }
 0x5ec   : > { %v3726_v48 = vpop.eup %3725  ;;  %v761_v52 = vmul.f32 %v3724_v47, %v4147_v5 }
 0x5ed   : > { %v763_v54 = vmul.f32 %v3726_v48, %v4143_v63 }
 0x5ee   : > { %v3728_v49 = vpop.eup %3727 }
 0x5ef   : > { %v752_v51 = vpop.xlane.xlu0 %751  ;;  %v762_v53 = vmul.f32 %v3728_v49, %v3712_v15  ;;  %v770_v56 = vpack.c.bf16 %v764_v50, %v763_v54 }
 0x5f0   : > { %3729 = vrcp.f32 %v752_v51 }
 0x5f1   : > { %v769_v55 = vpack.c.bf16 %v762_v53, %v761_v52  ;;  %3731 = vrcp.f32 %v743_v46 }
 0x5f2   : > { %3733 = vrcp.f32 %v749_v44 }
 0x5f3   : > { %3261 = vmatprep.mubr.msk.bf16.mxu1 %vm394_vm2, %v769_v55  ;;  %v873_v57 = vpop.permute.xlu0 %872 }
 0x5f4   : > { %3262 = vmatmul.mubr.msk.bf16.vlgmr.msra.gmra.mrb[8].mxu1 %vm394_vm2, %v770_v56  ;;  %v894_v59 = vsel %vm304_vm1, %v873_v57, 0 }
 0x5f5   : > { %3270 = vmatpush3.bf16.xpose.msra.mxu1 %v891_v58 }
 0x5f6   : > { %3470 = vmatprep.subr.msk.bf16.mxu1 %vm304_vm1, %v873_v57 }
 0x5f7   : > { %v863_v11 = vpop.permute.xlu0 %862 }
 0x5fa   : > { %v3730_v1 = vpop.eup %3729 }
 0x5fb   : > { %v3732_v2 = vpop.eup %3731  ;;  %v768_v5 = vmul.f32 %v3730_v1, %v4162_v32  ;;  %v867_v13 = vpop.permute.xlu0 %866 }
 0x5fc   : > { %v3734_v3 = vpop.eup %3733  ;;  %v765_v6 = vmul.f32 %v3732_v2, %v4158_v30 }
 0x5fd   : > { %3272 = vmatpush3.bf16.xpose.msra.mxu1 %v894_v59  ;;  %v767_v8 = vmul.f32 %v3734_v3, %v4153_v17 }
 0x5fe   : > { %3471 = vmatprep.subr.msk.bf16.mxu1 %vm304_vm1, %v875_v60 }
 0x5ff   : > { %v772_v10 = vpack.c.bf16 %v768_v5, %v767_v8 }
 0x605   : > { %3274 = vmatpush3.bf16.xpose.msra.mxu1 %v897_v61 }
 0x610   : > { %v746_v62 = vpop.xlane.xlu1 %745 }
 0x611   : > { %3735 = vrcp.f32 %v746_v62 }
 0x614   : > { %v877_v63 = vpop.permute.xlu1 %876 }
 0x615   : > { %3472 = vmatprep.subr.msk.bf16.mxu1 %vm304_vm1, %v877_v63  ;;  %v900_v0 = vsel %vm304_vm1, %v877_v63, 0 }
 0x616   : > { %3276 = vmatpush3.bf16.xpose.msra.mxu1 %v900_v0 }
 0x618   : > { %v865_v12 = vpop.permute.xlu1 %864 }
 0x61b   : > { %v3736_v4 = vpop.eup %3735 }
 0x61c   : > { %v766_v7 = vmul.f32 %v3736_v4, %v3720_v38  ;;  %v869_v14 = vpop.permute.xlu1 %868 }
 0x61e   : > { %v771_v9 = vpack.c.bf16 %v766_v7, %v765_v6 }
 0x620   : > { %3265 = vmatprep.mubr.msk.bf16.mxu1 %vm394_vm2, %v771_v9 }
 0x621   : > { %3266 = vmatmul.mubr.msk.bf16.gmra.mrb[12].mxu1 %vm394_vm2, %v772_v10 }
 0x622   : > { %3277 = vmatprep.mubr.msk.bf16.mxu1 %vm304_vm1, %v863_v11 }
 0x629   : > { %3278 = vmatmul.mubr.msk.bf16.vlgmr.msra.gmra.mrb[16].mxu1 %vm304_vm1, %v865_v12 }
 0x62a   : > { %3281 = vmatprep.mubr.msk.bf16.mxu1 %vm304_vm1, %v867_v13 }
 0x631   : > { %3282 = vmatmul.mubr.msk.bf16.gmra.mrb[20].mxu1 %vm304_vm1, %v869_v14 }
 0x6c7   : > { %v4198_v15 = vpop.f32.mrb[8].mxu1 }
 0x6c8   : > { %v4200_v16 = vpop.f32.mrb[9].mxu1 }
 0x6c9   : > { %v4202_v17 = vpop.f32.mrb[10].mxu1 }
 0x6ca   : > { %v4206_v29 = vpop.f32.mrb[11].mxu1 }
 0x6f4   : > { %v4210_v31 = vpop.f32.mrb[12].mxu1 }
 0x6f5   : > { %v4212_v32 = vpop.f32.mrb[13].mxu1 }
 0x6f6   : > { %v4214_v35 = vpop.f32.mrb[14].mxu1 }
 0x6f7   : > { %v4218_v37 = vpop.f32.mrb[15].mxu1 }
 0x6fc   : > { %v3279_v39 = vpop.f32.mrb[16].mxu1 }
 0x6fd   : > { %v936_v40 = vpop.f32.mrb[17].mxu1  ;;  %v973_v41 = vsel %vm394_vm2, %v3279_v39, -inf }
 0x6fe   : > { %974 = vmax.xlane.f32.xlu0 %v973_v41  ;;  %v3280_v42 = vpop.f32.mrb[18].mxu1  ;;  %v967_v45 = vsel %vm394_vm2, %v936_v40, -inf }
 0x6ff   : > { %v939_v43 = vpop.f32.mrb[19].mxu1  ;;  %v976_v48 = vsel %vm394_vm2, %v3280_v42, -inf }
 0x700   : > { %v970_v44 = vsel %vm394_vm2, %v939_v43, -inf }
 0x701   : > { %971 = vmax.xlane.f32.xlu1 %v970_v44 }
 0x702   : > { %968 = vmax.xlane.f32.xlu0 %v967_v45 }
 0x704   : > { %v3283_v46 = vpop.f32.mrb[20].mxu1 }
 0x705   : > { %v952_v47 = vpop.f32.mrb[21].mxu1  ;;  %v985_v49 = vsel %vm394_vm2, %v3283_v46, -inf }
 0x706   : > { %977 = vmax.xlane.f32.xlu0 %v976_v48  ;;  %986 = vmax.xlane.f32.xlu1 %v985_v49  ;;  %v3284_v50 = vpop.f32.mrb[22].mxu1  ;;  %v979_v53 = vsel %vm394_vm2, %v952_v47, -inf }
 0x707   : > { %v4227_v51 = vpop.f32.mrb[23].mxu1  ;;  %v988_v54 = vsel %vm394_vm2, %v3284_v50, -inf }
 0x708   : > { %v982_v52 = vsel %vm394_vm2, %v4227_v51, -inf }
 0x70a   : > { %980 = vmax.xlane.f32.xlu1 %v979_v53  ;;  %983 = vmax.xlane.f32.xlu0 %v982_v52 }
 0x70e   : > { %989 = vmax.xlane.f32.xlu0 %v988_v54 }
 0x71b   : > { %1059 = vrot.lane.b32.xlu1 %v4012_v24, %s3944_s5 }
 0x71f   : > { %1063 = vrot.lane.b32.xlu1 %v4020_v34, %s3944_s5 }
 0x723   : > { %1065 = vrot.lane.b32.xlu1 %v4018_v33, %s3944_s5 }
 0x724   : > { %1061 = vrot.lane.b32.xlu0 %v4010_v23, %s3944_s5  ;;  %s4929_s5 = scalar_lea.vmem %s4984_s3, %s2969_s30 }
 0x727   : > { %1156 = vrot.lane.b32.xlu1 %v4012_v24, %s3945_s6 }
 0x78b   : > { %v975_v55 = vpop.xlane.xlu0 %974 }
 0x78c   : > { %v993_v56 = vsub.f32 %v3279_v39, %v975_v55 }
 0x78e   : > { %v1003_v57 = vmul.f32 1.442695, %v993_v56  ;;  %v972_v58 = vpop.xlane.xlu1 %971 }
 0x78f   : > { %v969_v59 = vpop.xlane.xlu0 %968  ;;  %v992_v62 = vsub.f32 %v939_v43, %v972_v58 }
 0x790   : > { %3737 = vpow2.f32 %v1003_v57  ;;  %v991_v60 = vsub.f32 %v936_v40, %v969_v59 }
 0x791   : > { %v1001_v3 = vmul.f32 1.442695, %v992_v62 }
 0x792   : > { %v999_v61 = vmul.f32 1.442695, %v991_v60 }
 0x793   : > { %v987_v63 = vpop.xlane.xlu1 %986  ;;  %v978_v0 = vpop.xlane.xlu0 %977 }
 0x794   : > { %3739 = vpow2.f32 %v999_v61  ;;  %v994_v1 = vsub.f32 %v3280_v42, %v978_v0  ;;  %v997_v4 = vsub.f32 %v3283_v46, %v987_v63 }
 0x796   : > { %v1005_v2 = vmul.f32 1.442695, %v994_v1  ;;  %v1011_v8 = vmul.f32 1.442695, %v997_v4 }
 0x797   : > { %v981_v5 = vpop.xlane.xlu1 %980  ;;  %v984_v6 = vpop.xlane.xlu0 %983 }
 0x798   : > { %3741 = vpow2.f32 %v1005_v2  ;;  %v995_v9 = vsub.f32 %v952_v47, %v981_v5  ;;  %v996_v57 = vsub.f32 %v4227_v51, %v984_v6 }
 0x799   : > { %3743 = vpow2.f32 %v1001_v3 }
 0x79a   : > { %v4239_v7 = vpop.eup %3737  ;;  %3745 = vpow2.f32 %v1011_v8  ;;  %v1007_v14 = vmul.f32 1.442695, %v995_v9  ;;  %v1009_v58 = vmul.f32 1.442695, %v996_v57 }
 0x79b   : > { %v1060_v10 = vpop.permute.xlu1 %1059  ;;  %v990_v11 = vpop.xlane.xlu0 %989  ;;  %v1021_v12 = vsel %vm394_vm2, %v4239_v7, 0.0 }
 0x79c   : > { %3285 = vmatprep.subr.bf16.mxu0 %v1060_v10  ;;  %1022 = vadd.xlane.f32.xlu1 %v1021_v12  ;;  %v998_v39 = vsub.f32 %v3284_v50, %v990_v11  ;;  %3747 = vpow2.f32 %v1007_v14 }
 0x79d   : > { %3286 = vmatpush3.bf16.msra.mxu0 %v1060_v10 }
 0x79e   : > { %v4243_v13 = vpop.eup %3739  ;;  %v1013_v44 = vmul.f32 1.442695, %v998_v39 }
 0x79f   : > { %v1064_v40 = vpop.permute.xlu1 %1063  ;;  %v1062_v41 = vpop.permute.xlu0 %1061  ;;  %v1015_v42 = vsel %vm394_vm2, %v4243_v13, 0.0 }
 0x7a0   : > { %1016 = vadd.xlane.f32.xlu1 %v1015_v42  ;;  %3287 = vmatprep.subr.bf16.mxu0 %v1062_v41  ;;  %3749 = vpow2.f32 %v1013_v44 }
 0x7a1   : > { %3288 = vmatpush3.bf16.msra.mxu0 %v1062_v41  ;;  %3751 = vpow2.f32 %v1009_v58 }
 0x7a2   : > { %3289 = vmatprep.subr.bf16.mxu0 %v1064_v40  ;;  %v3742_v43 = vpop.eup %3741 }
 0x7a3   : > { %v1066_v45 = vpop.permute.xlu1 %1065  ;;  %v1024_v46 = vsel %vm394_vm2, %v3742_v43, 0.0  ;;  %v3744_v47 = vpop.eup %3743 }
 0x7a4   : > { %1025 = vadd.xlane.f32.xlu0 %v1024_v46  ;;  %v1018_v48 = vsel %vm394_vm2, %v3744_v47, 0.0  ;;  %v4249_v49 = vpop.eup %3745 }
 0x7a5   : > { %3290 = vmatpush3.bf16.msra.mxu0 %v1064_v40  ;;  %v1033_v52 = vsel %vm394_vm2, %v4249_v49, 0.0 }
 0x7a6   : > { %3291 = vmatprep.subr.bf16.mxu0 %v1066_v45  ;;  %v4254_v53 = vpop.eup %3747 }
 0x7a7   : > { %v1157_v50 = vpop.permute.xlu1 %1156  ;;  %v1027_v54 = vsel %vm394_vm2, %v4254_v53, 0.0 }
 0x7a8   : > { %1019 = vadd.xlane.f32.xlu0 %v1018_v48  ;;  %v1177_v40 = vsel %vm304_vm1, %v1157_v50, 0 }
 0x7a9   : > { %3292 = vmatpush3.bf16.msra.mxu0 %v1066_v45 }
 0x7aa   : > { %3473 = vmatprep.subr.msk.bf16.mxu0 %vm304_vm1, %v1157_v50  ;;  %v4258_v55 = vpop.eup %3749 }
 0x7ab   : > { %v1036_v56 = vsel %vm394_vm2, %v4258_v55, 0.0  ;;  %v3752_v59 = vpop.eup %3751 }
 0x7ac   : > { %1034 = vadd.xlane.f32.xlu0 %v1033_v52  ;;  %v1030_v60 = vsel %vm394_vm2, %v3752_v59, 0.0 }
 0x7b0   : > { %1028 = vadd.xlane.f32.xlu0 %v1027_v54 }
 0x7b1   : > { %1160 = vrot.lane.b32.xlu1 %v4020_v34, %s3945_s6 }
 0x7b4   : > { %1037 = vadd.xlane.f32.xlu0 %v1036_v56 }
 0x7ca   : > { %1158 = vrot.lane.b32.xlu0 %v4010_v23, %s3945_s6 }
 0x7ce   : > { %1148 = vrot.lane.b32.xlu0 %v4012_v24, %s3946_s7 }
 0x7d2   : > { %1152 = vrot.lane.b32.xlu0 %v4020_v34, %s3946_s7 }
 0x7d5   : > { %1031 = vadd.xlane.f32.xlu1 %v1030_v60 }
 0x7e6   : > { %1162 = vrot.lane.b32.xlu1 %v4018_v33, %s3945_s6 }
 0x7ea   : > { %1150 = vrot.lane.b32.xlu1 %v4010_v23, %s3946_s7 }
 0x7ee   : > { %1154 = vrot.lane.b32.xlu1 %v4018_v33, %s3946_s7 }
 0x829   : > { %v1023_v51 = vpop.xlane.xlu1 %1022 }
 0x82d   : > { %v1017_v61 = vpop.xlane.xlu1 %1016 }
 0x831   : > { %v1026_v62 = vpop.xlane.xlu0 %1025  ;;  %v1161_v42 = vpop.permute.xlu1 %1160 }
 0x832   : > { %3753 = vrcp.f32 %v1026_v62 }
 0x833   : > { %3755 = vrcp.f32 %v1017_v61 }
 0x834   : > { %3757 = vrcp.f32 %v1023_v51 }
 0x835   : > { %v1020_v63 = vpop.xlane.xlu0 %1019 }
 0x836   : > { %3759 = vrcp.f32 %v1020_v63 }
 0x839   : > { %v1035_v0 = vpop.xlane.xlu0 %1034 }
 0x83c   : > { %v3754_v1 = vpop.eup %3753 }
 0x83d   : > { %v1029_v2 = vpop.xlane.xlu0 %1028  ;;  %v3756_v3 = vpop.eup %3755  ;;  %v1050_v6 = vmul.f32 %v3754_v1, %v3742_v43 }
 0x83e   : > { %v3758_v4 = vpop.eup %3757  ;;  %v1047_v9 = vmul.f32 %v3756_v3, %v4243_v13 }
 0x83f   : > { %v1049_v11 = vmul.f32 %v3758_v4, %v4239_v7  ;;  %v1183_v7 = vsel %vm304_vm1, %v1161_v42, 0 }
 0x840   : > { %v3760_v5 = vpop.eup %3759 }
 0x841   : > { %v1038_v8 = vpop.xlane.xlu0 %1037  ;;  %v1048_v10 = vmul.f32 %v3760_v5, %v3744_v47  ;;  %v1056_v14 = vpack.c.bf16 %v1050_v6, %v1049_v11 }
 0x842   : > { %3761 = vrcp.f32 %v1038_v8 }
 0x843   : > { %v1055_v12 = vpack.c.bf16 %v1048_v10, %v1047_v9  ;;  %3763 = vrcp.f32 %v1029_v2 }
 0x844   : > { %3765 = vrcp.f32 %v1035_v0 }
 0x845   : > { %3293 = vmatprep.mubr.msk.bf16.mxu0 %vm394_vm2, %v1055_v12  ;;  %v1159_v39 = vpop.permute.xlu0 %1158 }
 0x846   : > { %3294 = vmatmul.mubr.msk.bf16.vlgmr.msra.gmra.mrb[24].mxu0 %vm394_vm2, %v1056_v14  ;;  %v1180_v41 = vsel %vm304_vm1, %v1159_v39, 0 }
 0x847   : > { %3302 = vmatpush3.bf16.xpose.msra.mxu0 %v1177_v40 }
 0x848   : > { %3474 = vmatprep.subr.msk.bf16.mxu0 %vm304_vm1, %v1159_v39 }
 0x849   : > { %v1149_v60 = vpop.permute.xlu0 %1148 }
 0x84c   : > { %v3762_v45 = vpop.eup %3761 }
 0x84d   : > { %v3764_v46 = vpop.eup %3763  ;;  %v1054_v50 = vmul.f32 %v3762_v45, %v4258_v55  ;;  %v1153_v61 = vpop.permute.xlu0 %1152 }
 0x84e   : > { %v3766_v47 = vpop.eup %3765  ;;  %v1051_v52 = vmul.f32 %v3764_v46, %v4254_v53 }
 0x84f   : > { %3304 = vmatpush3.bf16.xpose.msra.mxu0 %v1180_v41  ;;  %v1053_v56 = vmul.f32 %v3766_v47, %v4249_v49 }
 0x850   : > { %3475 = vmatprep.subr.msk.bf16.mxu0 %vm304_vm1, %v1161_v42 }
 0x851   : > { %v1058_v58 = vpack.c.bf16 %v1054_v50, %v1053_v56 }
 0x857   : > { %3306 = vmatpush3.bf16.xpose.msra.mxu0 %v1183_v7 }
 0x862   : > { %v1032_v13 = vpop.xlane.xlu1 %1031 }
 0x863   : > { %3767 = vrcp.f32 %v1032_v13 }
 0x866   : > { %v1163_v43 = vpop.permute.xlu1 %1162 }
 0x867   : > { %3476 = vmatprep.subr.msk.bf16.mxu0 %vm304_vm1, %v1163_v43  ;;  %v1186_v44 = vsel %vm304_vm1, %v1163_v43, 0 }
 0x868   : > { %3308 = vmatpush3.bf16.xpose.msra.mxu0 %v1186_v44 }
 0x86a   : > { %v1151_v51 = vpop.permute.xlu1 %1150 }
 0x86d   : > { %v3768_v48 = vpop.eup %3767 }
 0x86e   : > { %v1052_v54 = vmul.f32 %v3768_v48, %v3752_v59  ;;  %v1155_v55 = vpop.permute.xlu1 %1154 }
 0x870   : > { %v1057_v57 = vpack.c.bf16 %v1052_v54, %v1051_v52 }
 0x872   : > { %3297 = vmatprep.mubr.msk.bf16.mxu0 %vm394_vm2, %v1057_v57 }
 0x873   : > { %3298 = vmatmul.mubr.msk.bf16.gmra.mrb[28].mxu0 %vm394_vm2, %v1058_v58 }
 0x874   : > { %3309 = vmatprep.mubr.msk.bf16.mxu0 %vm304_vm1, %v1149_v60 }
 0x87b   : > { %3310 = vmatmul.mubr.msk.bf16.vlgmr.msra.gmra.mrb[32].mxu0 %vm304_vm1, %v1151_v51 }
 0x87c   : > { %3313 = vmatprep.mubr.msk.bf16.mxu0 %vm304_vm1, %v1153_v61 }
 0x883   : > { %3314 = vmatmul.mubr.msk.bf16.gmra.mrb[36].mxu0 %vm304_vm1, %v1155_v55 }
 0x919   : > { %v4294_v53 = vpop.f32.mrb[24].mxu0 }
 0x91a   : > { %v4296_v49 = vpop.f32.mrb[25].mxu0 }
 0x91b   : > { %v4298_v59 = vpop.f32.mrb[26].mxu0 }
 0x91c   : > { %v4302_v63 = vpop.f32.mrb[27].mxu0 }
 0x946   : > { %v4306_v1 = vpop.f32.mrb[28].mxu0 }
 0x947   : > { %v4308_v2 = vpop.f32.mrb[29].mxu0 }
 0x948   : > { %v4310_v3 = vpop.f32.mrb[30].mxu0 }
 0x949   : > { %v4314_v5 = vpop.f32.mrb[31].mxu0 }
 0x94e   : > { %v3311_v8 = vpop.f32.mrb[32].mxu0 }
 0x94f   : > { %v1222_v9 = vpop.f32.mrb[33].mxu0  ;;  %v1259_v10 = vsel %vm394_vm2, %v3311_v8, -inf }
 0x950   : > { %1260 = vmax.xlane.f32.xlu0 %v1259_v10  ;;  %v3312_v11 = vpop.f32.mrb[34].mxu0  ;;  %v1253_v39 = vsel %vm394_vm2, %v1222_v9, -inf }
 0x951   : > { %v1225_v12 = vpop.f32.mrb[35].mxu0  ;;  %v1262_v42 = vsel %vm394_vm2, %v3312_v11, -inf }
 0x952   : > { %v1256_v14 = vsel %vm394_vm2, %v1225_v12, -inf }
 0x953   : > { %1257 = vmax.xlane.f32.xlu1 %v1256_v14 }
 0x954   : > { %1254 = vmax.xlane.f32.xlu0 %v1253_v39 }
 0x956   : > { %v3315_v40 = vpop.f32.mrb[36].mxu0 }
 0x957   : > { %v1238_v41 = vpop.f32.mrb[37].mxu0  ;;  %v1271_v7 = vsel %vm394_vm2, %v3315_v40, -inf }
 0x958   : > { %1263 = vmax.xlane.f32.xlu0 %v1262_v42  ;;  %1272 = vmax.xlane.f32.xlu1 %v1271_v7  ;;  %v3316_v13 = vpop.f32.mrb[38].mxu0  ;;  %v1265_v45 = vsel %vm394_vm2, %v1238_v41, -inf }
 0x959   : > { %v4323_v43 = vpop.f32.mrb[39].mxu0  ;;  %v1274_v46 = vsel %vm394_vm2, %v3316_v13, -inf }
 0x95a   : > { %v1268_v44 = vsel %vm394_vm2, %v4323_v43, -inf }
 0x95c   : > { %1266 = vmax.xlane.f32.xlu1 %v1265_v45  ;;  %1269 = vmax.xlane.f32.xlu0 %v1268_v44 }
 0x960   : > { %1275 = vmax.xlane.f32.xlu0 %v1274_v46 }
 0x96d   : > { %1345 = vrot.lane.b32.xlu1 %v4012_v24, %s3947_s8 }
 0x971   : > { %1349 = vrot.lane.b32.xlu1 %v4020_v34, %s3947_s8 }
 0x975   : > { %1351 = vrot.lane.b32.xlu1 %v4018_v33, %s3947_s8 }
 0x976   : > { %1347 = vrot.lane.b32.xlu0 %v4010_v23, %s3947_s8 }
 0x979   : > { %1442 = vrot.lane.b32.xlu1 %v4012_v24, %s3948_s9 }
 0x9dd   : > { %v1261_v47 = vpop.xlane.xlu0 %1260 }
 0x9de   : > { %v1279_v48 = vsub.f32 %v3311_v8, %v1261_v47 }
 0x9e0   : > { %v1289_v50 = vmul.f32 1.442695, %v1279_v48  ;;  %v1258_v52 = vpop.xlane.xlu1 %1257 }
 0x9e1   : > { %v1255_v54 = vpop.xlane.xlu0 %1254  ;;  %v1278_v58 = vsub.f32 %v1225_v12, %v1258_v52 }
 0x9e2   : > { %3769 = vpow2.f32 %v1289_v50  ;;  %v1277_v56 = vsub.f32 %v1222_v9, %v1255_v54 }
 0x9e3   : > { %v1287_v10 = vmul.f32 1.442695, %v1278_v58 }
 0x9e4   : > { %v1285_v57 = vmul.f32 1.442695, %v1277_v56 }
 0x9e5   : > { %v1273_v60 = vpop.xlane.xlu1 %1272  ;;  %v1264_v51 = vpop.xlane.xlu0 %1263 }
 0x9e6   : > { %3771 = vpow2.f32 %v1285_v57  ;;  %v1280_v61 = vsub.f32 %v3312_v11, %v1264_v51  ;;  %v1283_v14 = vsub.f32 %v3315_v40, %v1273_v60 }
 0x9e8   : > { %v1291_v55 = vmul.f32 1.442695, %v1280_v61  ;;  %v1297_v8 = vmul.f32 1.442695, %v1283_v14 }
 0x9e9   : > { %v1267_v39 = vpop.xlane.xlu1 %1266  ;;  %v1270_v42 = vpop.xlane.xlu0 %1269 }
 0x9ea   : > { %3773 = vpow2.f32 %v1291_v55  ;;  %v1281_v44 = vsub.f32 %v1238_v41, %v1267_v39  ;;  %v1282_v39 = vsub.f32 %v4323_v43, %v1270_v42 }
 0x9eb   : > { %3775 = vpow2.f32 %v1287_v10 }
 0x9ec   : > { %v4335_v7 = vpop.eup %3769  ;;  %3777 = vpow2.f32 %v1297_v8  ;;  %v1293_v12 = vmul.f32 1.442695, %v1281_v44  ;;  %v1295_v8 = vmul.f32 1.442695, %v1282_v39 }
 0x9ed   : > { %v1346_v45 = vpop.permute.xlu1 %1345  ;;  %v1276_v46 = vpop.xlane.xlu0 %1275  ;;  %v1307_v9 = vsel %vm394_vm2, %v4335_v7, 0.0 }
 0x9ee   : > { %3317 = vmatprep.subr.bf16.mxu1 %v1346_v45  ;;  %1308 = vadd.xlane.f32.xlu1 %v1307_v9  ;;  %v1284_v40 = vsub.f32 %v3316_v13, %v1276_v46  ;;  %3779 = vpow2.f32 %v1293_v12 }
 0x9ef   : > { %3318 = vmatpush3.bf16.msra.mxu1 %v1346_v45 }
 0x9f0   : > { %v4339_v11 = vpop.eup %3771  ;;  %v1299_v52 = vmul.f32 1.442695, %v1284_v40 }
 0x9f1   : > { %v1350_v47 = vpop.permute.xlu1 %1349  ;;  %v1348_v48 = vpop.permute.xlu0 %1347  ;;  %v1301_v50 = vsel %vm394_vm2, %v4339_v11, 0.0 }
 0x9f2   : > { %1302 = vadd.xlane.f32.xlu1 %v1301_v50  ;;  %3319 = vmatprep.subr.bf16.mxu1 %v1348_v48  ;;  %3781 = vpow2.f32 %v1299_v52 }
 0x9f3   : > { %3320 = vmatpush3.bf16.msra.mxu1 %v1348_v48  ;;  %3783 = vpow2.f32 %v1295_v8 }
 0x9f4   : > { %3321 = vmatprep.subr.bf16.mxu1 %v1350_v47  ;;  %v3774_v41 = vpop.eup %3773 }
 0x9f5   : > { %v1352_v54 = vpop.permute.xlu1 %1351  ;;  %v1310_v56 = vsel %vm394_vm2, %v3774_v41, 0.0  ;;  %v3776_v57 = vpop.eup %3775 }
 0x9f6   : > { %1311 = vadd.xlane.f32.xlu0 %v1310_v56  ;;  %v1304_v13 = vsel %vm394_vm2, %v3776_v57, 0.0  ;;  %v4345_v58 = vpop.eup %3777 }
 0x9f7   : > { %3322 = vmatpush3.bf16.msra.mxu1 %v1350_v47  ;;  %v1319_v51 = vsel %vm394_vm2, %v4345_v58, 0.0 }
 0x9f8   : > { %3323 = vmatprep.subr.bf16.mxu1 %v1352_v54  ;;  %v4350_v61 = vpop.eup %3779 }
 0x9f9   : > { %v1443_v60 = vpop.permute.xlu1 %1442  ;;  %v1313_v55 = vsel %vm394_vm2, %v4350_v61, 0.0 }
 0x9fa   : > { %1305 = vadd.xlane.f32.xlu0 %v1304_v13 }
 0x9fb   : > { %3324 = vmatpush3.bf16.msra.mxu1 %v1352_v54 }
 0x9fc   : > { %3477 = vmatprep.subr.msk.bf16.mxu1 %vm304_vm1, %v1443_v60  ;;  %v4354_v10 = vpop.eup %3781 }
 0x9fd   : > { %v1322_v14 = vsel %vm394_vm2, %v4354_v10, 0.0  ;;  %v3784_v44 = vpop.eup %3783 }
 0x9fe   : > { %1320 = vadd.xlane.f32.xlu0 %v1319_v51  ;;  %v1316_v45 = vsel %vm394_vm2, %v3784_v44, 0.0 }
 0xa02   : > { %1314 = vadd.xlane.f32.xlu0 %v1313_v55 }
 0xa03   : > { %1446 = vrot.lane.b32.xlu1 %v4020_v34, %s3948_s9 }
 0xa06   : > { %1323 = vadd.xlane.f32.xlu0 %v1322_v14 }
 0xa1c   : > { %1444 = vrot.lane.b32.xlu0 %v4010_v23, %s3948_s9 }
 0xa20   : > { %1434 = vrot.lane.b32.xlu0 %v4012_v24, %s3949_s10 }
 0xa24   : > { %1438 = vrot.lane.b32.xlu0 %v4020_v34, %s3949_s10 }
 0xa27   : > { %1317 = vadd.xlane.f32.xlu1 %v1316_v45  ;;  %v1463_v45 = vsel %vm304_vm1, %v1443_v60, 0 }
 0xa38   : > { %1448 = vrot.lane.b32.xlu1 %v4018_v33, %s3948_s9 }
 0xa3c   : > { %1436 = vrot.lane.b32.xlu1 %v4010_v23, %s3949_s10 }
 0xa40   : > { %1440 = vrot.lane.b32.xlu1 %v4018_v33, %s3949_s10 }
 0xa7b   : > { %v1309_v43 = vpop.xlane.xlu1 %1308 }
 0xa7f   : > { %v1303_v42 = vpop.xlane.xlu1 %1302 }
 0xa83   : > { %v1312_v46 = vpop.xlane.xlu0 %1311 }
 0xa84   : > { %3785 = vrcp.f32 %v1312_v46 }
 0xa85   : > { %3787 = vrcp.f32 %v1303_v42 }
 0xa86   : > { %3789 = vrcp.f32 %v1309_v43  ;;  %v1447_v43 = vpop.permute.xlu1 %1446 }
 0xa87   : > { %v1306_v9 = vpop.xlane.xlu0 %1305 }
 0xa88   : > { %3791 = vrcp.f32 %v1306_v9 }
 0xa8b   : > { %v1321_v12 = vpop.xlane.xlu0 %1320 }
 0xa8e   : > { %v3786_v40 = vpop.eup %3785 }
 0xa8f   : > { %v1315_v47 = vpop.xlane.xlu0 %1314  ;;  %v3788_v48 = vpop.eup %3787  ;;  %v1336_v54 = vmul.f32 %v3786_v40, %v3774_v41 }
 0xa90   : > { %v3790_v50 = vpop.eup %3789  ;;  %v1333_v13 = vmul.f32 %v3788_v48, %v4339_v11 }
 0xa91   : > { %v1335_v55 = vmul.f32 %v3790_v50, %v4335_v7  ;;  %v1469_v7 = vsel %vm304_vm1, %v1447_v43, 0 }
 0xa92   : > { %v3792_v52 = vpop.eup %3791 }
 0xa93   : > { %v1324_v56 = vpop.xlane.xlu0 %1323  ;;  %v1334_v51 = vmul.f32 %v3792_v52, %v3776_v57  ;;  %v1342_v39 = vpack.c.bf16 %v1336_v54, %v1335_v55 }
 0xa94   : > { %3793 = vrcp.f32 %v1324_v56 }
 0xa95   : > { %v1341_v14 = vpack.c.bf16 %v1334_v51, %v1333_v13  ;;  %3795 = vrcp.f32 %v1315_v47 }
 0xa96   : > { %3797 = vrcp.f32 %v1321_v12 }
 0xa97   : > { %3325 = vmatprep.mubr.msk.bf16.mxu1 %vm394_vm2, %v1341_v14  ;;  %v1445_v8 = vpop.permute.xlu0 %1444 }
 0xa98   : > { %3326 = vmatmul.mubr.msk.bf16.vlgmr.msra.gmra.mrb[24].mxu1 %vm394_vm2, %v1342_v39  ;;  %v1466_v41 = vsel %vm304_vm1, %v1445_v8, 0 }
 0xa99   : > { %3334 = vmatpush3.bf16.xpose.msra.mxu1 %v1463_v45 }
 0xa9a   : > { %3478 = vmatprep.subr.msk.bf16.mxu1 %vm304_vm1, %v1445_v8 }
 0xa9b   : > { %v1435_v56 = vpop.permute.xlu0 %1434 }
 0xa9e   : > { %v3794_v42 = vpop.eup %3793 }
 0xa9f   : > { %v3796_v46 = vpop.eup %3795  ;;  %v1340_v48 = vmul.f32 %v3794_v42, %v4354_v10  ;;  %v1439_v51 = vpop.permute.xlu0 %1438 }
 0xaa0   : > { %v3798_v9 = vpop.eup %3797  ;;  %v1337_v50 = vmul.f32 %v3796_v46, %v4350_v61 }
 0xaa1   : > { %3336 = vmatpush3.bf16.xpose.msra.mxu1 %v1466_v41  ;;  %v1339_v47 = vmul.f32 %v3798_v9, %v4345_v58 }
 0xaa2   : > { %3479 = vmatprep.subr.msk.bf16.mxu1 %vm304_vm1, %v1447_v43 }
 0xaa3   : > { %v1344_v54 = vpack.c.bf16 %v1340_v48, %v1339_v47 }
 0xaa9   : > { %3338 = vmatpush3.bf16.xpose.msra.mxu1 %v1469_v7 }
 0xab4   : > { %v1318_v11 = vpop.xlane.xlu1 %1317 }
 0xab5   : > { %3799 = vrcp.f32 %v1318_v11 }
 0xab8   : > { %v1449_v57 = vpop.permute.xlu1 %1448 }
 0xab9   : > { %3480 = vmatprep.subr.msk.bf16.mxu1 %vm304_vm1, %v1449_v57  ;;  %v1472_v60 = vsel %vm304_vm1, %v1449_v57, 0 }
 0xaba   : > { %3340 = vmatpush3.bf16.xpose.msra.mxu1 %v1472_v60 }
 0xabc   : > { %v1437_v13 = vpop.permute.xlu1 %1436 }
 0xabf   : > { %v3800_v40 = vpop.eup %3799 }
 0xac0   : > { %v1338_v52 = vmul.f32 %v3800_v40, %v3784_v44  ;;  %v1441_v10 = vpop.permute.xlu1 %1440 }
 0xac2   : > { %v1343_v12 = vpack.c.bf16 %v1338_v52, %v1337_v50 }
 0xac4   : > { %3329 = vmatprep.mubr.msk.bf16.mxu1 %vm394_vm2, %v1343_v12 }
 0xac5   : > { %3330 = vmatmul.mubr.msk.bf16.gmra.mrb[28].mxu1 %vm394_vm2, %v1344_v54 }
 0xac6   : > { %3341 = vmatprep.mubr.msk.bf16.mxu1 %vm304_vm1, %v1435_v56 }
 0xacd   : > { %3342 = vmatmul.mubr.msk.bf16.vlgmr.msra.gmra.mrb[32].mxu1 %vm304_vm1, %v1437_v13 }
 0xace   : > { %3345 = vmatprep.mubr.msk.bf16.mxu1 %vm304_vm1, %v1439_v51 }
 0xad5   : > { %3346 = vmatmul.mubr.msk.bf16.gmra.mrb[36].mxu1 %vm304_vm1, %v1441_v10 }
 0xb6b   : > { %v4390_v61 = vpop.f32.mrb[24].mxu1 }
 0xb6c   : > { %v4392_v58 = vpop.f32.mrb[25].mxu1 }
 0xb6d   : > { %v4394_v44 = vpop.f32.mrb[26].mxu1 }
 0xb6e   : > { %v4398_v14 = vpop.f32.mrb[27].mxu1 }
 0xb98   : > { %v4402_v8 = vpop.f32.mrb[28].mxu1 }
 0xb99   : > { %v4404_v45 = vpop.f32.mrb[29].mxu1 }
 0xb9a   : > { %v4406_v41 = vpop.f32.mrb[30].mxu1 }
 0xb9b   : > { %v4410_v7 = vpop.f32.mrb[31].mxu1 }
 0xba0   : > { %v3343_v57 = vpop.f32.mrb[32].mxu1 }
 0xba1   : > { %v1508_v60 = vpop.f32.mrb[33].mxu1  ;;  %v1545_v42 = vsel %vm394_vm2, %v3343_v57, -inf }
 0xba2   : > { %1546 = vmax.xlane.f32.xlu0 %v1545_v42  ;;  %v3344_v46 = vpop.f32.mrb[34].mxu1  ;;  %v1539_v48 = vsel %vm394_vm2, %v1508_v60, -inf }
 0xba3   : > { %v1511_v9 = vpop.f32.mrb[35].mxu1  ;;  %v1548_v47 = vsel %vm394_vm2, %v3344_v46, -inf }
 0xba4   : > { %v1542_v40 = vsel %vm394_vm2, %v1511_v9, -inf }
 0xba5   : > { %1543 = vmax.xlane.f32.xlu1 %v1542_v40 }
 0xba6   : > { %1540 = vmax.xlane.f32.xlu0 %v1539_v48 }
 0xba8   : > { %v3347_v50 = vpop.f32.mrb[36].mxu1 }
 0xba9   : > { %v1524_v52 = vpop.f32.mrb[37].mxu1  ;;  %v1557_v12 = vsel %vm394_vm2, %v3347_v50, -inf }
 0xbaa   : > { %1549 = vmax.xlane.f32.xlu0 %v1548_v47  ;;  %1558 = vmax.xlane.f32.xlu1 %v1557_v12  ;;  %v3348_v54 = vpop.f32.mrb[38].mxu1  ;;  %v1551_v51 = vsel %vm394_vm2, %v1524_v52, -inf }
 0xbab   : > { %v4419_v56 = vpop.f32.mrb[39].mxu1  ;;  %v1560_v10 = vsel %vm394_vm2, %v3348_v54, -inf }
 0xbac   : > { %v1554_v13 = vsel %vm394_vm2, %v4419_v56, -inf }
 0xbae   : > { %1552 = vmax.xlane.f32.xlu1 %v1551_v51  ;;  %1555 = vmax.xlane.f32.xlu0 %v1554_v13 }
 0xbb2   : > { %1561 = vmax.xlane.f32.xlu0 %v1560_v10 }
 0xbbf   : > { %1631 = vrot.lane.b32.xlu1 %v4012_v24, %s3950_s11 }
 0xbc3   : > { %1635 = vrot.lane.b32.xlu1 %v4020_v34, %s3950_s11 }
 0xbc7   : > { %1637 = vrot.lane.b32.xlu1 %v4018_v33, %s3950_s11 }
 0xbc8   : > { %1633 = vrot.lane.b32.xlu0 %v4010_v23, %s3950_s11 }
 0xbcb   : > { %1728 = vrot.lane.b32.xlu1 %v4012_v24, %s3951_s13 }
 0xc2f   : > { %v1547_v42 = vpop.xlane.xlu0 %1546 }
 0xc30   : > { %v1565_v40 = vsub.f32 %v3343_v57, %v1547_v42 }
 0xc32   : > { %v1575_v48 = vmul.f32 1.442695, %v1565_v40  ;;  %v1544_v47 = vpop.xlane.xlu1 %1543 }
 0xc33   : > { %v1541_v12 = vpop.xlane.xlu0 %1540  ;;  %v1564_v10 = vsub.f32 %v1511_v9, %v1544_v47 }
 0xc34   : > { %3801 = vpow2.f32 %v1575_v48  ;;  %v1563_v13 = vsub.f32 %v1508_v60, %v1541_v12 }
 0xc35   : > { %v1573_v55 = vmul.f32 1.442695, %v1564_v10 }
 0xc36   : > { %v1571_v51 = vmul.f32 1.442695, %v1563_v13 }
 0xc37   : > { %v1559_v11 = vpop.xlane.xlu1 %1558  ;;  %v1550_v39 = vpop.xlane.xlu0 %1549 }
 0xc38   : > { %3803 = vpow2.f32 %v1571_v51  ;;  %v1566_v43 = vsub.f32 %v3344_v46, %v1550_v39  ;;  %v1569_v0 = vsub.f32 %v3347_v50, %v1559_v11 }
 0xc3a   : > { %v1577_v6 = vmul.f32 1.442695, %v1566_v43  ;;  %v1583_v57 = vmul.f32 1.442695, %v1569_v0 }
 0xc3b   : > { %v1553_v4 = vpop.xlane.xlu1 %1552  ;;  %v1556_v38 = vpop.xlane.xlu0 %1555 }
 0xc3c   : > { %3805 = vpow2.f32 %v1577_v6  ;;  %v1567_v42 = vsub.f32 %v1524_v52, %v1553_v4 }
 0xc3d   : > { %3807 = vpow2.f32 %v1573_v55 }
 0xc3e   : > { %v4431_v62 = vpop.eup %3801  ;;  %3809 = vpow2.f32 %v1583_v57  ;;  %v1579_v43 = vmul.f32 1.442695, %v1567_v42 }
 0xc3f   : > { %v1632_v40 = vpop.permute.xlu1 %1631  ;;  %v1562_v48 = vpop.xlane.xlu0 %1561  ;;  %v1593_v60 = vsel %vm394_vm2, %v4431_v62, 0.0 }
 0xc40   : > { %3349 = vmatprep.subr.bf16.mxu0 %v1632_v40  ;;  %1594 = vadd.xlane.f32.xlu1 %v1593_v60  ;;  %v1570_v11 = vsub.f32 %v3348_v54, %v1562_v48  ;;  %3811 = vpow2.f32 %v1579_v43 }
 0xc41   : > { %3350 = vmatpush3.bf16.msra.mxu0 %v1632_v40  ;;  %v1568_v40 = vsub.f32 %v4419_v56, %v1556_v38 }
 0xc42   : > { %v4435_v39 = vpop.eup %3803  ;;  %v1585_v4 = vmul.f32 1.442695, %v1570_v11 }
 0xc43   : > { %v1636_v46 = vpop.permute.xlu1 %1635  ;;  %v1634_v6 = vpop.permute.xlu0 %1633  ;;  %v1587_v55 = vsel %vm394_vm2, %v4435_v39, 0.0  ;;  %v1581_v48 = vmul.f32 1.442695, %v1568_v40 }
 0xc44   : > { %1588 = vadd.xlane.f32.xlu1 %v1587_v55  ;;  %3351 = vmatprep.subr.bf16.mxu0 %v1634_v6  ;;  %3813 = vpow2.f32 %v1585_v4 }
 0xc45   : > { %3352 = vmatpush3.bf16.msra.mxu0 %v1634_v6  ;;  %3815 = vpow2.f32 %v1581_v48 }
 0xc46   : > { %3353 = vmatprep.subr.bf16.mxu0 %v1636_v46  ;;  %v3806_v0 = vpop.eup %3805 }
 0xc47   : > { %v1638_v9 = vpop.permute.xlu1 %1637  ;;  %v1596_v50 = vsel %vm394_vm2, %v3806_v0, 0.0  ;;  %v3808_v52 = vpop.eup %3807 }
 0xc48   : > { %1597 = vadd.xlane.f32.xlu0 %v1596_v50  ;;  %v1590_v54 = vsel %vm394_vm2, %v3808_v52, 0.0  ;;  %v4441_v47 = vpop.eup %3809 }
 0xc49   : > { %3354 = vmatpush3.bf16.msra.mxu0 %v1636_v46  ;;  %v1605_v13 = vsel %vm394_vm2, %v4441_v47, 0.0 }
 0xc4a   : > { %3355 = vmatprep.subr.bf16.mxu0 %v1638_v9  ;;  %v4446_v51 = vpop.eup %3811 }
 0xc4b   : > { %v1729_v12 = vpop.permute.xlu1 %1728  ;;  %v1599_v10 = vsel %vm394_vm2, %v4446_v51, 0.0 }
 0xc4c   : > { %1591 = vadd.xlane.f32.xlu0 %v1590_v54 }
 0xc4d   : > { %3356 = vmatpush3.bf16.msra.mxu0 %v1638_v9 }
 0xc4e   : > { %3481 = vmatprep.subr.msk.bf16.mxu0 %vm304_vm1, %v1729_v12  ;;  %v4450_v57 = vpop.eup %3813 }
 0xc4f   : > { %v1608_v42 = vsel %vm394_vm2, %v4450_v57, 0.0  ;;  %v3816_v60 = vpop.eup %3815 }
 0xc50   : > { %1606 = vadd.xlane.f32.xlu0 %v1605_v13  ;;  %v1602_v43 = vsel %vm394_vm2, %v3816_v60, 0.0 }
 0xc54   : > { %1600 = vadd.xlane.f32.xlu0 %v1599_v10 }
 0xc55   : > { %1732 = vrot.lane.b32.xlu1 %v4020_v34, %s3951_s13 }
 0xc58   : > { %1609 = vadd.xlane.f32.xlu0 %v1608_v42 }
 0xc6e   : > { %1730 = vrot.lane.b32.xlu0 %v4010_v23, %s3951_s13 }
 0xc72   : > { %1720 = vrot.lane.b32.xlu0 %v4012_v24, %s3952_s14 }
 0xc76   : > { %1724 = vrot.lane.b32.xlu0 %v4020_v34, %s3952_s14 }
 0xc79   : > { %1603 = vadd.xlane.f32.xlu1 %v1602_v43 }
 0xc8a   : > { %1734 = vrot.lane.b32.xlu1 %v4018_v33, %s3951_s13 }
 0xc8e   : > { %1722 = vrot.lane.b32.xlu1 %v4010_v23, %s3952_s14 }
 0xc92   : > { %1726 = vrot.lane.b32.xlu1 %v4018_v33, %s3952_s14 }
 0xccd   : > { %v1595_v38 = vpop.xlane.xlu1 %1594 }
 0xcd1   : > { %v1589_v56 = vpop.xlane.xlu1 %1588 }
 0xcd5   : > { %v1598_v11 = vpop.xlane.xlu0 %1597 }
 0xcd6   : > { %3817 = vrcp.f32 %v1598_v11  ;;  %v1733_v11 = vpop.permute.xlu1 %1732 }
 0xcd7   : > { %3819 = vrcp.f32 %v1589_v56  ;;  %v1749_v56 = vsel %vm304_vm1, %v1729_v12, 0 }
 0xcd8   : > { %3821 = vrcp.f32 %v1595_v38 }
 0xcd9   : > { %v1592_v46 = vpop.xlane.xlu0 %1591 }
 0xcda   : > { %3823 = vrcp.f32 %v1592_v46 }
 0xcdd   : > { %v1607_v6 = vpop.xlane.xlu0 %1606 }
 0xce0   : > { %v3818_v55 = vpop.eup %3817 }
 0xce1   : > { %v1601_v4 = vpop.xlane.xlu0 %1600  ;;  %v3820_v9 = vpop.eup %3819  ;;  %v1622_v13 = vmul.f32 %v3818_v55, %v3806_v0 }
 0xce2   : > { %v3822_v50 = vpop.eup %3821  ;;  %v1619_v42 = vmul.f32 %v3820_v9, %v4435_v39 }
 0xce3   : > { %v1621_v48 = vmul.f32 %v3822_v50, %v4431_v62  ;;  %v1755_v62 = vsel %vm304_vm1, %v1733_v11, 0 }
 0xce4   : > { %v3824_v54 = vpop.eup %3823 }
 0xce5   : > { %v1610_v10 = vpop.xlane.xlu0 %1609  ;;  %v1620_v40 = vmul.f32 %v3824_v54, %v3808_v52  ;;  %v1628_v30 = vpack.c.bf16 %v1622_v13, %v1621_v48 }
 0xce6   : > { %3825 = vrcp.f32 %v1610_v10 }
 0xce7   : > { %v1627_v43 = vpack.c.bf16 %v1620_v40, %v1619_v42  ;;  %3827 = vrcp.f32 %v1601_v4 }
 0xce8   : > { %3829 = vrcp.f32 %v1607_v6 }
 0xce9   : > { %3357 = vmatprep.mubr.msk.bf16.mxu0 %vm394_vm2, %v1627_v43  ;;  %v1731_v38 = vpop.permute.xlu0 %1730 }
 0xcea   : > { %3358 = vmatmul.mubr.msk.bf16.vlgmr.msra.gmra.mrb[40].mxu0 %vm394_vm2, %v1628_v30  ;;  %v1752_v0 = vsel %vm304_vm1, %v1731_v38, 0 }
 0xceb   : > { %3366 = vmatpush3.bf16.xpose.msra.mxu0 %v1749_v56 }
 0xcec   : > { %3482 = vmatprep.subr.msk.bf16.mxu0 %vm304_vm1, %v1731_v38 }
 0xced   : > { %v1721_v42 = vpop.permute.xlu0 %1720 }
 0xcf0   : > { %v3826_v12 = vpop.eup %3825 }
 0xcf1   : > { %v3828_v46 = vpop.eup %3827  ;;  %v1626_v50 = vmul.f32 %v3826_v12, %v4450_v57  ;;  %v1725_v48 = vpop.permute.xlu0 %1724 }
 0xcf2   : > { %v3830_v55 = vpop.eup %3829  ;;  %v1623_v54 = vmul.f32 %v3828_v46, %v4446_v51 }
 0xcf3   : > { %3368 = vmatpush3.bf16.xpose.msra.mxu0 %v1752_v0  ;;  %v1625_v4 = vmul.f32 %v3830_v55, %v4441_v47 }
 0xcf4   : > { %3483 = vmatprep.subr.msk.bf16.mxu0 %vm304_vm1, %v1733_v11 }
 0xcf5   : > { %v1630_v10 = vpack.c.bf16 %v1626_v50, %v1625_v4 }
 0xcfb   : > { %3370 = vmatpush3.bf16.xpose.msra.mxu0 %v1755_v62 }
 0xd06   : > { %v1604_v39 = vpop.xlane.xlu1 %1603 }
 0xd07   : > { %3831 = vrcp.f32 %v1604_v39 }
 0xd0a   : > { %v1735_v30 = vpop.permute.xlu1 %1734 }
 0xd0b   : > { %3484 = vmatprep.subr.msk.bf16.mxu0 %vm304_vm1, %v1735_v30  ;;  %v1758_v52 = vsel %vm304_vm1, %v1735_v30, 0 }
 0xd0c   : > { %3372 = vmatpush3.bf16.xpose.msra.mxu0 %v1758_v52 }
 0xd0e   : > { %v1723_v40 = vpop.permute.xlu1 %1722 }
 0xd11   : > { %v3832_v9 = vpop.eup %3831 }
 0xd12   : > { %v1624_v13 = vmul.f32 %v3832_v9, %v3816_v60  ;;  %v1727_v57 = vpop.permute.xlu1 %1726 }
 0xd14   : > { %v1629_v6 = vpack.c.bf16 %v1624_v13, %v1623_v54 }
 0xd16   : > { %3361 = vmatprep.mubr.msk.bf16.mxu0 %vm394_vm2, %v1629_v6 }
 0xd17   : > { %3362 = vmatmul.mubr.msk.bf16.gmra.mrb[44].mxu0 %vm394_vm2, %v1630_v10 }
 0xd18   : > { %3373 = vmatprep.mubr.msk.bf16.mxu0 %vm304_vm1, %v1721_v42 }
 0xd1f   : > { %3374 = vmatmul.mubr.msk.bf16.vlgmr.msra.gmra.mrb[48].mxu0 %vm304_vm1, %v1723_v40 }
 0xd20   : > { %3377 = vmatprep.mubr.msk.bf16.mxu0 %vm304_vm1, %v1725_v48 }
 0xd27   : > { %3378 = vmatmul.mubr.msk.bf16.gmra.mrb[52].mxu0 %vm304_vm1, %v1727_v57 }
 0xdbd   : > { %v4486_v51 = vpop.f32.mrb[40].mxu0 }
 0xdbe   : > { %v4488_v47 = vpop.f32.mrb[41].mxu0 }
 0xdbf   : > { %v4490_v60 = vpop.f32.mrb[42].mxu0 }
 0xdc0   : > { %v4494_v38 = vpop.f32.mrb[43].mxu0 }
 0xdea   : > { %v4498_v0 = vpop.f32.mrb[44].mxu0 }
 0xdeb   : > { %v4500_v11 = vpop.f32.mrb[45].mxu0 }
 0xdec   : > { %v4502_v62 = vpop.f32.mrb[46].mxu0 }
 0xded   : > { %v4506_v30 = vpop.f32.mrb[47].mxu0 }
 0xdf2   : > { %v3375_v12 = vpop.f32.mrb[48].mxu0 }
 0xdf3   : > { %v1794_v46 = vpop.f32.mrb[49].mxu0  ;;  %v1831_v55 = vsel %vm394_vm2, %v3375_v12, -inf }
 0xdf4   : > { %1832 = vmax.xlane.f32.xlu0 %v1831_v55  ;;  %v3376_v9 = vpop.f32.mrb[50].mxu0  ;;  %v1825_v13 = vsel %vm394_vm2, %v1794_v46, -inf }
 0xdf5   : > { %v1797_v50 = vpop.f32.mrb[51].mxu0  ;;  %v1834_v10 = vsel %vm394_vm2, %v3376_v9, -inf }
 0xdf6   : > { %v1828_v54 = vsel %vm394_vm2, %v1797_v50, -inf }
 0xdf7   : > { %1829 = vmax.xlane.f32.xlu1 %v1828_v54 }
 0xdf8   : > { %1826 = vmax.xlane.f32.xlu0 %v1825_v13 }
 0xdfa   : > { %v3379_v4 = vpop.f32.mrb[52].mxu0 }
 0xdfb   : > { %v1810_v6 = vpop.f32.mrb[53].mxu0  ;;  %v1843_v42 = vsel %vm394_vm2, %v3379_v4, -inf }
 0xdfc   : > { %1835 = vmax.xlane.f32.xlu0 %v1834_v10  ;;  %1844 = vmax.xlane.f32.xlu1 %v1843_v42  ;;  %v3380_v40 = vpop.f32.mrb[54].mxu0  ;;  %v1837_v55 = vsel %vm394_vm2, %v1810_v6, -inf }
 0xdfd   : > { %v4515_v48 = vpop.f32.mrb[55].mxu0  ;;  %v1846_v54 = vsel %vm394_vm2, %v3380_v40, -inf }
 0xdfe   : > { %v1840_v57 = vsel %vm394_vm2, %v4515_v48, -inf }
 0xe00   : > { %1838 = vmax.xlane.f32.xlu1 %v1837_v55  ;;  %1841 = vmax.xlane.f32.xlu0 %v1840_v57 }
 0xe04   : > { %1847 = vmax.xlane.f32.xlu0 %v1846_v54 }
 0xe11   : > { %1917 = vrot.lane.b32.xlu1 %v4012_v24, %s3953_s15 }
 0xe15   : > { %1921 = vrot.lane.b32.xlu1 %v4020_v34, %s3953_s15 }
 0xe19   : > { %1923 = vrot.lane.b32.xlu1 %v4018_v33, %s3953_s15 }
 0xe1a   : > { %1919 = vrot.lane.b32.xlu0 %v4010_v23, %s3953_s15 }
 0xe1d   : > { %2014 = vrot.lane.b32.xlu1 %v4012_v24, %s3954_s17 }
 0xe81   : > { %v1833_v13 = vpop.xlane.xlu0 %1832 }
 0xe82   : > { %v1851_v10 = vsub.f32 %v3375_v12, %v1833_v13 }
 0xe84   : > { %v1861_v42 = vmul.f32 1.442695, %v1851_v10  ;;  %v1830_v57 = vpop.xlane.xlu1 %1829 }
 0xe85   : > { %v1827_v55 = vpop.xlane.xlu0 %1826  ;;  %v1850_v56 = vsub.f32 %v1797_v50, %v1830_v57 }
 0xe86   : > { %3833 = vpow2.f32 %v1861_v42  ;;  %v1849_v54 = vsub.f32 %v1794_v46, %v1827_v55 }
 0xe87   : > { %v1859_v26 = vmul.f32 1.442695, %v1850_v56 }
 0xe88   : > { %v1857_v52 = vmul.f32 1.442695, %v1849_v54 }
 0xe89   : > { %v1845_v39 = vpop.xlane.xlu1 %1844  ;;  %v1836_v43 = vpop.xlane.xlu0 %1835 }
 0xe8a   : > { %3835 = vpow2.f32 %v1857_v52  ;;  %v1852_v36 = vsub.f32 %v3376_v9, %v1836_v43  ;;  %v1855_v28 = vsub.f32 %v3379_v4, %v1845_v39 }
 0xe8c   : > { %v1863_v18 = vmul.f32 1.442695, %v1852_v36  ;;  %v1869_v12 = vmul.f32 1.442695, %v1855_v28 }
 0xe8d   : > { %v1839_v25 = vpop.xlane.xlu1 %1838  ;;  %v1842_v27 = vpop.xlane.xlu0 %1841 }
 0xe8e   : > { %3837 = vpow2.f32 %v1863_v18  ;;  %v1853_v13 = vsub.f32 %v1810_v6, %v1839_v25 }
 0xe8f   : > { %3839 = vpow2.f32 %v1859_v26 }
 0xe90   : > { %v4527_v20 = vpop.eup %3833  ;;  %3841 = vpow2.f32 %v1869_v12  ;;  %v1865_v36 = vmul.f32 1.442695, %v1853_v13 }
 0xe91   : > { %v1918_v10 = vpop.permute.xlu1 %1917  ;;  %v1848_v42 = vpop.xlane.xlu0 %1847  ;;  %v1879_v46 = vsel %vm394_vm2, %v4527_v20, 0.0 }
 0xe92   : > { %3381 = vmatprep.subr.bf16.mxu1 %v1918_v10  ;;  %1880 = vadd.xlane.f32.xlu1 %v1879_v46  ;;  %v1856_v56 = vsub.f32 %v3380_v40, %v1848_v42  ;;  %3843 = vpow2.f32 %v1865_v36 }
 0xe93   : > { %3382 = vmatpush3.bf16.msra.mxu1 %v1918_v10  ;;  %v1854_v10 = vsub.f32 %v4515_v48, %v1842_v27 }
 0xe94   : > { %v4531_v43 = vpop.eup %3835  ;;  %v1871_v28 = vmul.f32 1.442695, %v1856_v56 }
 0xe95   : > { %v1922_v39 = vpop.permute.xlu1 %1921  ;;  %v1920_v18 = vpop.permute.xlu0 %1919  ;;  %v1873_v26 = vsel %vm394_vm2, %v4531_v43, 0.0  ;;  %v1867_v42 = vmul.f32 1.442695, %v1854_v10 }
 0xe96   : > { %1874 = vadd.xlane.f32.xlu1 %v1873_v26  ;;  %3383 = vmatprep.subr.bf16.mxu1 %v1920_v18  ;;  %3845 = vpow2.f32 %v1871_v28 }
 0xe97   : > { %3384 = vmatpush3.bf16.msra.mxu1 %v1920_v18  ;;  %3847 = vpow2.f32 %v1867_v42 }
 0xe98   : > { %3385 = vmatprep.subr.bf16.mxu1 %v1922_v39  ;;  %v3838_v25 = vpop.eup %3837 }
 0xe99   : > { %v1924_v52 = vpop.permute.xlu1 %1923  ;;  %v1882_v9 = vsel %vm394_vm2, %v3838_v25, 0.0  ;;  %v3840_v50 = vpop.eup %3839 }
 0xe9a   : > { %1883 = vadd.xlane.f32.xlu0 %v1882_v9  ;;  %v1876_v4 = vsel %vm394_vm2, %v3840_v50, 0.0  ;;  %v4537_v6 = vpop.eup %3841 }
 0xe9b   : > { %3386 = vmatpush3.bf16.msra.mxu1 %v1922_v39  ;;  %v1891_v57 = vsel %vm394_vm2, %v4537_v6, 0.0 }
 0xe9c   : > { %3387 = vmatprep.subr.bf16.mxu1 %v1924_v52  ;;  %v4542_v55 = vpop.eup %3843 }
 0xe9d   : > { %v2015_v40 = vpop.permute.xlu1 %2014  ;;  %v1885_v54 = vsel %vm394_vm2, %v4542_v55, 0.0 }
 0xe9e   : > { %1877 = vadd.xlane.f32.xlu0 %v1876_v4 }
 0xe9f   : > { %3388 = vmatpush3.bf16.msra.mxu1 %v1924_v52 }
 0xea0   : > { %3485 = vmatprep.subr.msk.bf16.mxu1 %vm304_vm1, %v2015_v40  ;;  %v4546_v12 = vpop.eup %3845 }
 0xea1   : > { %v1894_v13 = vsel %vm394_vm2, %v4546_v12, 0.0  ;;  %v3848_v46 = vpop.eup %3847 }
 0xea2   : > { %1892 = vadd.xlane.f32.xlu0 %v1891_v57  ;;  %v1888_v36 = vsel %vm394_vm2, %v3848_v46, 0.0 }
 0xea6   : > { %1886 = vadd.xlane.f32.xlu0 %v1885_v54 }
 0xea7   : > { %2018 = vrot.lane.b32.xlu1 %v4020_v34, %s3954_s17 }
 0xeaa   : > { %1895 = vadd.xlane.f32.xlu0 %v1894_v13 }
 0xec0   : > { %2016 = vrot.lane.b32.xlu0 %v4010_v23, %s3954_s17 }
 0xec4   : > { %2006 = vrot.lane.b32.xlu0 %v4012_v24, %s3955_s18 }
 0xec8   : > { %2010 = vrot.lane.b32.xlu0 %v4020_v34, %s3955_s18 }
 0xecb   : > { %1889 = vadd.xlane.f32.xlu1 %v1888_v36 }
 0xedc   : > { %2020 = vrot.lane.b32.xlu1 %v4018_v33, %s3954_s17 }
 0xee0   : > { %2008 = vrot.lane.b32.xlu1 %v4010_v23, %s3955_s18 }
 0xee4   : > { %2012 = vrot.lane.b32.xlu1 %v4018_v33, %s3955_s18 }
 0xf1f   : > { %v1881_v27 = vpop.xlane.xlu1 %1880 }
 0xf23   : > { %v1875_v48 = vpop.xlane.xlu1 %1874 }
 0xf27   : > { %v1884_v56 = vpop.xlane.xlu0 %1883 }
 0xf28   : > { %3849 = vrcp.f32 %v1884_v56  ;;  %v2019_v56 = vpop.permute.xlu1 %2018 }
 0xf29   : > { %3851 = vrcp.f32 %v1875_v48  ;;  %v2035_v48 = vsel %vm304_vm1, %v2015_v40, 0 }
 0xf2a   : > { %3853 = vrcp.f32 %v1881_v27 }
 0xf2b   : > { %v1878_v39 = vpop.xlane.xlu0 %1877 }
 0xf2c   : > { %3855 = vrcp.f32 %v1878_v39 }
 0xf2f   : > { %v1893_v18 = vpop.xlane.xlu0 %1892 }
 0xf32   : > { %v3850_v26 = vpop.eup %3849 }
 0xf33   : > { %v1887_v28 = vpop.xlane.xlu0 %1886  ;;  %v3852_v52 = vpop.eup %3851  ;;  %v1908_v57 = vmul.f32 %v3850_v26, %v3838_v25 }
 0xf34   : > { %v3854_v9 = vpop.eup %3853  ;;  %v1905_v13 = vmul.f32 %v3852_v52, %v4531_v43 }
 0xf35   : > { %v1907_v42 = vmul.f32 %v3854_v9, %v4527_v20  ;;  %v2041_v20 = vsel %vm304_vm1, %v2019_v56, 0 }
 0xf36   : > { %v3856_v4 = vpop.eup %3855 }
 0xf37   : > { %v1896_v54 = vpop.xlane.xlu0 %1895  ;;  %v1906_v10 = vmul.f32 %v3856_v4, %v3840_v50  ;;  %v1914_v22 = vpack.c.bf16 %v1908_v57, %v1907_v42 }
 0xf38   : > { %3857 = vrcp.f32 %v1896_v54 }
 0xf39   : > { %v1913_v36 = vpack.c.bf16 %v1906_v10, %v1905_v13  ;;  %3859 = vrcp.f32 %v1887_v28 }
 0xf3a   : > { %3861 = vrcp.f32 %v1893_v18 }
 0xf3b   : > { %3389 = vmatprep.mubr.msk.bf16.mxu1 %vm394_vm2, %v1913_v36  ;;  %v2017_v27 = vpop.permute.xlu0 %2016 }
 0xf3c   : > { %3390 = vmatmul.mubr.msk.bf16.vlgmr.msra.gmra.mrb[40].mxu1 %vm394_vm2, %v1914_v22  ;;  %v2038_v25 = vsel %vm304_vm1, %v2017_v27, 0 }
 0xf3d   : > { %3398 = vmatpush3.bf16.xpose.msra.mxu1 %v2035_v48 }
 0xf3e   : > { %3486 = vmatprep.subr.msk.bf16.mxu1 %vm304_vm1, %v2017_v27 }
 0xf3f   : > { %v2007_v13 = vpop.permute.xlu0 %2006 }
 0xf42   : > { %v3858_v40 = vpop.eup %3857 }
 0xf43   : > { %v3860_v39 = vpop.eup %3859  ;;  %v1912_v9 = vmul.f32 %v3858_v40, %v4546_v12  ;;  %v2011_v42 = vpop.permute.xlu0 %2010 }
 0xf44   : > { %v3862_v26 = vpop.eup %3861  ;;  %v1909_v4 = vmul.f32 %v3860_v39, %v4542_v55 }
 0xf45   : > { %3400 = vmatpush3.bf16.xpose.msra.mxu1 %v2038_v25  ;;  %v1911_v28 = vmul.f32 %v3862_v26, %v4537_v6 }
 0xf46   : > { %3487 = vmatprep.subr.msk.bf16.mxu1 %vm304_vm1, %v2019_v56 }
 0xf47   : > { %v1916_v54 = vpack.c.bf16 %v1912_v9, %v1911_v28 }
 0xf4d   : > { %3402 = vmatpush3.bf16.xpose.msra.mxu1 %v2041_v20 }
 0xf58   : > { %v1890_v43 = vpop.xlane.xlu1 %1889 }
 0xf59   : > { %3863 = vrcp.f32 %v1890_v43 }
 0xf5c   : > { %v2021_v50 = vpop.permute.xlu1 %2020 }
 0xf5d   : > { %v2044_v22 = vsel %vm304_vm1, %v2021_v50, 0  ;;  %3488 = vmatprep.subr.msk.bf16.mxu1 %vm304_vm1, %v2021_v50 }
 0xf5e   : > { %3404 = vmatpush3.bf16.xpose.msra.mxu1 %v2044_v22 }
 0xf60   : > { %v2009_v10 = vpop.permute.xlu1 %2008 }
 0xf63   : > { %v3864_v52 = vpop.eup %3863 }
 0xf64   : > { %v1910_v57 = vmul.f32 %v3864_v52, %v3848_v46  ;;  %v2013_v12 = vpop.permute.xlu1 %2012 }
 0xf66   : > { %v1915_v18 = vpack.c.bf16 %v1910_v57, %v1909_v4 }
 0xf68   : > { %3393 = vmatprep.mubr.msk.bf16.mxu1 %vm394_vm2, %v1915_v18 }
 0xf69   : > { %3394 = vmatmul.mubr.msk.bf16.gmra.mrb[44].mxu1 %vm394_vm2, %v1916_v54 }
 0xf6a   : > { %3405 = vmatprep.mubr.msk.bf16.mxu1 %vm304_vm1, %v2007_v13 }
 0xf71   : > { %3406 = vmatmul.mubr.msk.bf16.vlgmr.msra.gmra.mrb[48].mxu1 %vm304_vm1, %v2009_v10 }
 0xf72   : > { %3409 = vmatprep.mubr.msk.bf16.mxu1 %vm304_vm1, %v2011_v42 }
 0xf79   : > { %3410 = vmatmul.mubr.msk.bf16.gmra.mrb[52].mxu1 %vm304_vm1, %v2013_v12 }
0x100f   : > { %v4582_v55 = vpop.f32.mrb[40].mxu1 }
0x1010   : > { %v4584_v6 = vpop.f32.mrb[41].mxu1 }
0x1011   : > { %5006 = vst [vmem:[#allocation10_spill] sm:$0xff] %v4584_v6  ;;  %v4586_v46 = vpop.f32.mrb[42].mxu1 }
0x1012   : > { %v4590_v27 = vpop.f32.mrb[43].mxu1 }
0x1013   : > { %5007 = vst [vmem:[#allocation11_spill] sm:$0xff] %v4590_v27 }
0x103c   : > { %v4594_v25 = vpop.f32.mrb[44].mxu1 }
0x103d   : > { %5008 = vst [vmem:[#allocation12_spill] sm:$0xff] %v4594_v25  ;;  %v4596_v56 = vpop.f32.mrb[45].mxu1 }
0x103e   : > { %5009 = vst [vmem:[#allocation13_spill] sm:$0xff] %v4596_v56  ;;  %v4598_v20 = vpop.f32.mrb[46].mxu1 }
0x103f   : > { %5010 = vst [vmem:[#allocation14_spill] sm:$0xff] %v4598_v20  ;;  %v4602_v50 = vpop.f32.mrb[47].mxu1 }
0x1040   : > { %5011 = vst [vmem:[#allocation15_spill] sm:$0xff] %v4602_v50 }
0x1044   : > { %v3407_v40 = vpop.f32.mrb[48].mxu1 }
0x1045   : > { %v2080_v39 = vpop.f32.mrb[49].mxu1  ;;  %v2117_v26 = vsel %vm394_vm2, %v3407_v40, -inf }
0x1046   : > { %2118 = vmax.xlane.f32.xlu0 %v2117_v26  ;;  %v3408_v52 = vpop.f32.mrb[50].mxu1  ;;  %v2111_v57 = vsel %vm394_vm2, %v2080_v39, -inf }
0x1047   : > { %v2083_v9 = vpop.f32.mrb[51].mxu1  ;;  %v2120_v54 = vsel %vm394_vm2, %v3408_v52, -inf }
0x1048   : > { %v2114_v4 = vsel %vm394_vm2, %v2083_v9, -inf }
0x1049   : > { %2115 = vmax.xlane.f32.xlu1 %v2114_v4 }
0x104a   : > { %2112 = vmax.xlane.f32.xlu0 %v2111_v57 }
0x104c   : > { %v3411_v28 = vpop.f32.mrb[52].mxu1 }
0x104d   : > { %v2096_v18 = vpop.f32.mrb[53].mxu1  ;;  %v2129_v13 = vsel %vm394_vm2, %v3411_v28, -inf }
0x104e   : > { %2121 = vmax.xlane.f32.xlu0 %v2120_v54  ;;  %2130 = vmax.xlane.f32.xlu1 %v2129_v13  ;;  %v3412_v10 = vpop.f32.mrb[54].mxu1  ;;  %v2123_v26 = vsel %vm394_vm2, %v2096_v18, -inf }
0x104f   : > { %v4611_v42 = vpop.f32.mrb[55].mxu1  ;;  %v2132_v4 = vsel %vm394_vm2, %v3412_v10, -inf }
0x1050   : > { %v2126_v12 = vsel %vm394_vm2, %v4611_v42, -inf }
0x1052   : > { %2124 = vmax.xlane.f32.xlu1 %v2123_v26  ;;  %2127 = vmax.xlane.f32.xlu0 %v2126_v12 }
0x1056   : > { %2133 = vmax.xlane.f32.xlu0 %v2132_v4 }
0x1063   : > { %2203 = vrot.lane.b32.xlu1 %v4012_v24, %s3956_s19 }
0x1067   : > { %2207 = vrot.lane.b32.xlu1 %v4020_v34, %s3956_s19 }
0x106b   : > { %2209 = vrot.lane.b32.xlu1 %v4018_v33, %s3956_s19 }
0x106c   : > { %2205 = vrot.lane.b32.xlu0 %v4010_v23, %s3956_s19 }
0x106f   : > { %2300 = vrot.lane.b32.xlu1 %v4012_v24, %s3957_s20 }
0x10d3   : > { %v2119_v57 = vpop.xlane.xlu0 %2118 }
0x10d4   : > { %v2137_v54 = vsub.f32 %v3407_v40, %v2119_v57 }
0x10d6   : > { %v2147_v13 = vmul.f32 1.442695, %v2137_v54  ;;  %v2116_v12 = vpop.xlane.xlu1 %2115 }
0x10d7   : > { %v2113_v26 = vpop.xlane.xlu0 %2112  ;;  %v2136_v48 = vsub.f32 %v2083_v9, %v2116_v12 }
0x10d8   : > { %3865 = vpow2.f32 %v2147_v13  ;;  %v2135_v4 = vsub.f32 %v2080_v39, %v2113_v26 }
0x10d9   : > { %v2145_v56 = vmul.f32 1.442695, %v2136_v48 }
0x10da   : > { %v2143_v22 = vmul.f32 1.442695, %v2135_v4 }
0x10db   : > { %v2131_v43 = vpop.xlane.xlu1 %2130  ;;  %v2122_v36 = vpop.xlane.xlu0 %2121 }
0x10dc   : > { %3867 = vpow2.f32 %v2143_v22  ;;  %v2138_v19 = vsub.f32 %v3408_v52, %v2122_v36  ;;  %v2141_v50 = vsub.f32 %v3411_v28, %v2131_v43 }
0x10de   : > { %v2149_v21 = vmul.f32 1.442695, %v2138_v19  ;;  %v2155_v40 = vmul.f32 1.442695, %v2141_v50 }
0x10df   : > { %v2125_v6 = vpop.xlane.xlu1 %2124  ;;  %v2128_v27 = vpop.xlane.xlu0 %2127 }
0x10e0   : > { %3869 = vpow2.f32 %v2149_v21  ;;  %v2139_v57 = vsub.f32 %v2096_v18, %v2125_v6 }
0x10e1   : > { %3871 = vpow2.f32 %v2145_v56 }
0x10e2   : > { %v4623_v25 = vpop.eup %3865  ;;  %3873 = vpow2.f32 %v2155_v40  ;;  %v2151_v19 = vmul.f32 1.442695, %v2139_v57 }
0x10e3   : > { %v2204_v54 = vpop.permute.xlu1 %2203  ;;  %v2134_v13 = vpop.xlane.xlu0 %2133  ;;  %v2165_v39 = vsel %vm394_vm2, %v4623_v25, 0.0 }
0x10e4   : > { %3413 = vmatprep.subr.bf16.mxu0 %v2204_v54  ;;  %2166 = vadd.xlane.f32.xlu1 %v2165_v39  ;;  %v2142_v48 = vsub.f32 %v3412_v10, %v2134_v13  ;;  %3875 = vpow2.f32 %v2151_v19 }
0x10e5   : > { %3414 = vmatpush3.bf16.msra.mxu0 %v2204_v54  ;;  %v2140_v54 = vsub.f32 %v4611_v42, %v2128_v27 }
0x10e6   : > { %v4627_v36 = vpop.eup %3867  ;;  %v2157_v50 = vmul.f32 1.442695, %v2142_v48 }
0x10e7   : > { %v2208_v43 = vpop.permute.xlu1 %2207  ;;  %v2206_v21 = vpop.permute.xlu0 %2205  ;;  %v2159_v56 = vsel %vm394_vm2, %v4627_v36, 0.0  ;;  %v2153_v13 = vmul.f32 1.442695, %v2140_v54 }
0x10e8   : > { %2160 = vadd.xlane.f32.xlu1 %v2159_v56  ;;  %3415 = vmatprep.subr.bf16.mxu0 %v2206_v21  ;;  %3877 = vpow2.f32 %v2157_v50 }
0x10e9   : > { %3416 = vmatpush3.bf16.msra.mxu0 %v2206_v21  ;;  %3879 = vpow2.f32 %v2153_v13 }
0x10ea   : > { %3417 = vmatprep.subr.bf16.mxu0 %v2208_v43  ;;  %v3870_v6 = vpop.eup %3869 }
0x10eb   : > { %v2210_v22 = vpop.permute.xlu1 %2209  ;;  %v2168_v52 = vsel %vm394_vm2, %v3870_v6, 0.0  ;;  %v3872_v9 = vpop.eup %3871 }
0x10ec   : > { %2169 = vadd.xlane.f32.xlu0 %v2168_v52  ;;  %v2162_v28 = vsel %vm394_vm2, %v3872_v9, 0.0  ;;  %v4633_v18 = vpop.eup %3873 }
0x10ed   : > { %3418 = vmatpush3.bf16.msra.mxu0 %v2208_v43  ;;  %v2177_v12 = vsel %vm394_vm2, %v4633_v18, 0.0 }
0x10ee   : > { %3419 = vmatprep.subr.bf16.mxu0 %v2210_v22  ;;  %v4638_v26 = vpop.eup %3875 }
0x10ef   : > { %v2301_v10 = vpop.permute.xlu1 %2300  ;;  %v2171_v4 = vsel %vm394_vm2, %v4638_v26, 0.0 }
0x10f0   : > { %2163 = vadd.xlane.f32.xlu0 %v2162_v28 }
0x10f1   : > { %3420 = vmatpush3.bf16.msra.mxu0 %v2210_v22 }
0x10f2   : > { %3489 = vmatprep.subr.msk.bf16.mxu0 %vm304_vm1, %v2301_v10  ;;  %v4642_v40 = vpop.eup %3877 }
0x10f3   : > { %v2180_v57 = vsel %vm394_vm2, %v4642_v40, 0.0  ;;  %v3880_v39 = vpop.eup %3879 }
0x10f4   : > { %2178 = vadd.xlane.f32.xlu0 %v2177_v12  ;;  %v2174_v19 = vsel %vm394_vm2, %v3880_v39, 0.0 }
0x10f8   : > { %2172 = vadd.xlane.f32.xlu0 %v2171_v4 }
0x10f9   : > { %2304 = vrot.lane.b32.xlu1 %v4020_v34, %s3957_s20 }
0x10fc   : > { %2181 = vadd.xlane.f32.xlu0 %v2180_v57 }
0x1112   : > { %2302 = vrot.lane.b32.xlu0 %v4010_v23, %s3957_s20 }
0x1116   : > { %2292 = vrot.lane.b32.xlu0 %v4012_v24, %s3958_s21 }
0x111a   : > { %2296 = vrot.lane.b32.xlu0 %v4020_v34, %s3958_s21 }
0x111d   : > { %2175 = vadd.xlane.f32.xlu1 %v2174_v19 }
0x112e   : > { %2306 = vrot.lane.b32.xlu1 %v4018_v33, %s3957_s20 }
0x1132   : > { %2294 = vrot.lane.b32.xlu1 %v4010_v23, %s3958_s21 }
0x1136   : > { %2298 = vrot.lane.b32.xlu1 %v4018_v33, %s3958_s21 }
0x1171   : > { %v2167_v27 = vpop.xlane.xlu1 %2166 }
0x1175   : > { %v2161_v42 = vpop.xlane.xlu1 %2160 }
0x1179   : > { %v2170_v48 = vpop.xlane.xlu0 %2169 }
0x117a   : > { %3881 = vrcp.f32 %v2170_v48  ;;  %v2305_v48 = vpop.permute.xlu1 %2304 }
0x117b   : > { %3883 = vrcp.f32 %v2161_v42  ;;  %v2321_v42 = vsel %vm304_vm1, %v2301_v10, 0 }
0x117c   : > { %3885 = vrcp.f32 %v2167_v27 }
0x117d   : > { %v2164_v43 = vpop.xlane.xlu0 %2163 }
0x117e   : > { %3887 = vrcp.f32 %v2164_v43 }
0x1181   : > { %v2179_v21 = vpop.xlane.xlu0 %2178 }
0x1184   : > { %v3882_v56 = vpop.eup %3881 }
0x1185   : > { %v2173_v50 = vpop.xlane.xlu0 %2172  ;;  %v3884_v22 = vpop.eup %3883  ;;  %v2194_v12 = vmul.f32 %v3882_v56, %v3870_v6 }
0x1186   : > { %v3886_v52 = vpop.eup %3885  ;;  %v2191_v57 = vmul.f32 %v3884_v22, %v4627_v36 }
0x1187   : > { %v2193_v13 = vmul.f32 %v3886_v52, %v4623_v25  ;;  %v2327_v25 = vsel %vm304_vm1, %v2305_v48, 0 }
0x1188   : > { %v3888_v28 = vpop.eup %3887 }
0x1189   : > { %v2182_v4 = vpop.xlane.xlu0 %2181  ;;  %v2192_v54 = vmul.f32 %v3888_v28, %v3872_v9  ;;  %v2200_v20 = vpack.c.bf16 %v2194_v12, %v2193_v13 }
0x118a   : > { %3889 = vrcp.f32 %v2182_v4 }
0x118b   : > { %v2199_v19 = vpack.c.bf16 %v2192_v54, %v2191_v57  ;;  %3891 = vrcp.f32 %v2173_v50 }
0x118c   : > { %3893 = vrcp.f32 %v2179_v21 }
0x118d   : > { %3421 = vmatprep.mubr.msk.bf16.mxu0 %vm394_vm2, %v2199_v19  ;;  %v2303_v27 = vpop.permute.xlu0 %2302 }
0x118e   : > { %3422 = vmatmul.mubr.msk.bf16.vlgmr.msra.gmra.mrb[56].mxu0 %vm394_vm2, %v2200_v20  ;;  %v2324_v6 = vsel %vm304_vm1, %v2303_v27, 0 }
0x118f   : > { %3430 = vmatpush3.bf16.xpose.msra.mxu0 %v2321_v42 }
0x1190   : > { %3490 = vmatprep.subr.msk.bf16.mxu0 %vm304_vm1, %v2303_v27 }
0x1191   : > { %v2293_v57 = vpop.permute.xlu0 %2292 }
0x1194   : > { %v3890_v10 = vpop.eup %3889 }
0x1195   : > { %v3892_v43 = vpop.eup %3891  ;;  %v2198_v52 = vmul.f32 %v3890_v10, %v4642_v40  ;;  %v2297_v13 = vpop.permute.xlu0 %2296 }
0x1196   : > { %v3894_v56 = vpop.eup %3893  ;;  %v2195_v28 = vmul.f32 %v3892_v43, %v4638_v26 }
0x1197   : > { %3432 = vmatpush3.bf16.xpose.msra.mxu0 %v2324_v6  ;;  %v2197_v50 = vmul.f32 %v3894_v56, %v4633_v18 }
0x1198   : > { %3491 = vmatprep.subr.msk.bf16.mxu0 %vm304_vm1, %v2305_v48 }
0x1199   : > { %v2202_v4 = vpack.c.bf16 %v2198_v52, %v2197_v50 }
0x119f   : > { %3434 = vmatpush3.bf16.xpose.msra.mxu0 %v2327_v25 }
0x11aa   : > { %v2176_v36 = vpop.xlane.xlu1 %2175 }
0x11ab   : > { %3895 = vrcp.f32 %v2176_v36 }
0x11ae   : > { %v2307_v9 = vpop.permute.xlu1 %2306 }
0x11af   : > { %v2330_v20 = vsel %vm304_vm1, %v2307_v9, 0  ;;  %3492 = vmatprep.subr.msk.bf16.mxu0 %vm304_vm1, %v2307_v9 }
0x11b0   : > { %3436 = vmatpush3.bf16.xpose.msra.mxu0 %v2330_v20 }
0x11b2   : > { %v2295_v54 = vpop.permute.xlu1 %2294 }
0x11b5   : > { %v3896_v22 = vpop.eup %3895 }
0x11b6   : > { %v2196_v12 = vmul.f32 %v3896_v22, %v3880_v39  ;;  %v2299_v40 = vpop.permute.xlu1 %2298 }
0x11b8   : > { %v2201_v21 = vpack.c.bf16 %v2196_v12, %v2195_v28 }
0x11ba   : > { %3425 = vmatprep.mubr.msk.bf16.mxu0 %vm394_vm2, %v2201_v21 }
0x11bb   : > { %3426 = vmatmul.mubr.msk.bf16.gmra.mrb[60].mxu0 %vm394_vm2, %v2202_v4 }
0x11bc   : > { %3437 = vmatprep.mubr.msk.bf16.mxu0 %vm304_vm1, %v2293_v57 }
0x11c3   : > { %3438 = vmatmul.mubr.msk.bf16.vlgmr.msra.gmra.mrb[64].mxu0 %vm304_vm1, %v2295_v54 }
0x11c4   : > { %3441 = vmatprep.mubr.msk.bf16.mxu0 %vm304_vm1, %v2297_v13 }
0x11cb   : > { %3442 = vmatmul.mubr.msk.bf16.gmra.mrb[68].mxu0 %vm304_vm1, %v2299_v40 }
0x1261   : > { %v4678_v26 = vpop.f32.mrb[56].mxu0 }
0x1262   : > { %5012 = vst [vmem:[#allocation16_spill] sm:$0xff] %v4678_v26  ;;  %v4680_v18 = vpop.f32.mrb[57].mxu0 }
0x1263   : > { %5013 = vst [vmem:[#allocation17_spill] sm:$0xff] %v4680_v18  ;;  %v4682_v39 = vpop.f32.mrb[58].mxu0 }
0x1264   : > { %v4686_v27 = vpop.f32.mrb[59].mxu0 }
0x1265   : > { %5014 = vst [vmem:[#allocation18_spill] sm:$0xff] %v4686_v27 }
0x128e   : > { %v4690_v6 = vpop.f32.mrb[60].mxu0 }
0x128f   : > { %5015 = vst [vmem:[#allocation19_spill] sm:$0xff] %v4690_v6  ;;  %v4692_v48 = vpop.f32.mrb[61].mxu0 }
0x1290   : > { %5016 = vst [vmem:[#allocation20_spill] sm:$0xff] %v4692_v48  ;;  %v4694_v25 = vpop.f32.mrb[62].mxu0 }
0x1291   : > { %5017 = vst [vmem:[#allocation21_spill] sm:$0xff] %v4694_v25  ;;  %v4698_v9 = vpop.f32.mrb[63].mxu0 }
0x1292   : > { %5018 = vst [vmem:[#allocation22_spill] sm:$0xff] %v4698_v9 }
0x1296   : > { %v3439_v10 = vpop.f32.mrb[64].mxu0 }
0x1297   : > { %v2366_v43 = vpop.f32.mrb[65].mxu0  ;;  %v2403_v12 = vsel %vm394_vm2, %v3439_v10, -inf }
0x1298   : > { %v3440_v56 = vpop.f32.mrb[66].mxu0  ;;  %v2397_v22 = vsel %vm394_vm2, %v2366_v43, -inf }
0x1299   : > { %2398 = vmax.xlane.f32.xlu0 %v2397_v22  ;;  %v2369_v52 = vpop.f32.mrb[67].mxu0  ;;  %v2406_v57 = vsel %vm394_vm2, %v3440_v56, -inf }
0x129a   : > { %v2400_v28 = vsel %vm394_vm2, %v2369_v52, -inf }
0x129b   : > { %2401 = vmax.xlane.f32.xlu1 %v2400_v28 }
0x129d   : > { %2404 = vmax.xlane.f32.xlu0 %v2403_v12 }
0x129e   : > { %v3443_v50 = vpop.f32.mrb[68].mxu0 }
0x129f   : > { %v2382_v21 = vpop.f32.mrb[69].mxu0  ;;  %v2415_v22 = vsel %vm394_vm2, %v3443_v50, -inf }
0x12a0   : > { %v3444_v4 = vpop.f32.mrb[70].mxu0  ;;  %v2409_v54 = vsel %vm394_vm2, %v2382_v21, -inf }
0x12a1   : > { %2407 = vmax.xlane.f32.xlu0 %v2406_v57  ;;  %2410 = vmax.xlane.f32.xlu1 %v2409_v54  ;;  %v2385_v13 = vpop.f32.mrb[71].mxu0  ;;  %v2418_v28 = vsel %vm394_vm2, %v3444_v4, -inf }
0x12a2   : > { %v2412_v40 = vsel %vm394_vm2, %v2385_v13, -inf }
0x12a5   : > { %2416 = vmax.xlane.f32.xlu1 %v2415_v22  ;;  %2413 = vmax.xlane.f32.xlu0 %v2412_v40 }
0x12a9   : > { %2419 = vmax.xlane.f32.xlu0 %v2418_v28 }
0x12b6   : > { %2489 = vrot.lane.b32.xlu1 %v4012_v24, %s3959_s22 }
0x1326   : > { %v2399_v12 = vpop.xlane.xlu0 %2398 }
0x1327   : > { %v2421_v20 = vsub.f32 %v2366_v43, %v2399_v12 }
0x1328   : > { %v2402_v42 = vpop.xlane.xlu1 %2401 }
0x1329   : > { %v2429_v54 = vmul.f32 1.442695, %v2421_v20  ;;  %v2422_v48 = vsub.f32 %v2369_v52, %v2402_v42 }
0x132a   : > { %v2405_v36 = vpop.xlane.xlu0 %2404 }
0x132b   : > { %v2423_v57 = vsub.f32 %v3439_v10, %v2405_v36  ;;  %v2431_v28 = vmul.f32 1.442695, %v2422_v48 }
0x132d   : > { %v2433_v19 = vmul.f32 1.442695, %v2423_v57 }
0x132e   : > { %v2411_v9 = vpop.xlane.xlu1 %2410  ;;  %v2408_v18 = vpop.xlane.xlu0 %2407 }
0x132f   : > { %3897 = vpow2.f32 %v2433_v19  ;;  %v2424_v22 = vsub.f32 %v3440_v56, %v2408_v18  ;;  %v2425_v40 = vsub.f32 %v2382_v21, %v2411_v9 }
0x1330   : > { %3899 = vpow2.f32 %v2429_v54 }
0x1331   : > { %v2435_v27 = vmul.f32 1.442695, %v2424_v22  ;;  %v2437_v24 = vmul.f32 1.442695, %v2425_v40  ;;  %v5019_v40 = vpack.i.bf16 %v4202_v17, %v4198_v15  ;;  %v5025_v15 = vpack.i.bf16 %v4302_v63, %v4296_v49  ;;  %v5036_v63 = vld [vmem:[#allocation14_spill] sm:$0xff] }
0x1332   : > { %v2417_v6 = vpop.xlane.xlu1 %2416  ;;  %v2414_v25 = vpop.xlane.xlu0 %2413  ;;  %v5027_v17 = vpack.i.bf16 %v4314_v5, %v4308_v2  ;;  %v5034_v49 = vpack.i.bf16 %v4586_v46, %v4582_v55  ;;  %v5040_v5 = vld [vmem:[#allocation10_spill] sm:$0xff] }
0x1333   : > { %v2427_v26 = vsub.f32 %v3443_v50, %v2417_v6  ;;  %3901 = vpow2.f32 %v2435_v27  ;;  %v2426_v12 = vsub.f32 %v2385_v13, %v2414_v25 }
0x1334   : > { %3903 = vpow2.f32 %v2431_v28  ;;  %v5020_v28 = vpack.i.bf16 %v4214_v35, %v4210_v31  ;;  %v5029_v31 = vpack.i.bf16 %v4398_v14, %v4392_v58  ;;  %v5031_v35 = vpack.i.bf16 %v4410_v7, %v4404_v45  ;;  %v5042_v58 = vld [vmem:[#allocation16_spill] sm:$0xff]  ;;  %v5044_v14 = vld [vmem:[#allocation15_spill] sm:$0xff] }
0x1335   : > { %v2441_v43 = vmul.f32 1.442695, %v2427_v26  ;;  %v2439_v9 = vmul.f32 1.442695, %v2426_v12  ;;  %v5048_v7 = vld [vmem:[#allocation19_spill] sm:$0xff] }
0x1336   : > { %v2490_v36 = vpop.permute.xlu1 %2489  ;;  %v2420_v20 = vpop.xlane.xlu0 %2419 }
0x1337   : > { %3905 = vpow2.f32 %v2441_v43  ;;  %v2428_v42 = vsub.f32 %v3444_v4, %v2420_v20  ;;  %3445 = vmatprep.subr.bf16.mxu1 %v2490_v36 }
0x1338   : > { %3446 = vmatpush3.bf16.msra.mxu1 %v2490_v36  ;;  %3907 = vpow2.f32 %v2437_v24  ;;  %v5021_v24 = vpack.i.bf16 %v4206_v29, %v4200_v16  ;;  %v5026_v16 = vpack.i.bf16 %v4394_v44, %v4390_v61  ;;  %v5028_v29 = vpack.i.bf16 %v4406_v41, %v4402_v8  ;;  %v5045_v8 = vld [vmem:[#allocation13_spill] sm:$0xff] }
0x1339   : > { %v4712_v19 = vpop.eup %3897  ;;  %v2443_v18 = vmul.f32 1.442695, %v2428_v42  ;;  %v5043_v44 = vpack.i.bf16 %v4682_v39, %v5042_v58  ;;  %v5046_v45 = vpack.i.bf16 %v5044_v14, %v5045_v8  ;;  %v5047_v41 = vld [vmem:[#allocation21_spill] sm:$0xff] }
0x133a   : > { %v2451_v48 = vsel %vm394_vm2, %v4712_v19, 0.0  ;;  %v4716_v6 = vpop.eup %3899 }
0x133b   : > { %3909 = vpow2.f32 %v2443_v18  ;;  %2452 = vadd.xlane.f32.xlu1 %v2451_v48  ;;  %v2445_v27 = vsel %vm394_vm2, %v4716_v6, 0.0 }
0x133c   : > { %3911 = vpow2.f32 %v2439_v9 }
0x133d   : > { %v4718_v26 = vpop.eup %3901 }
0x133e   : > { %v2454_v25 = vsel %vm394_vm2, %v4718_v26, 0.0  ;;  %v4724_v10 = vpop.eup %3903 }
0x133f   : > { %2446 = vadd.xlane.f32.xlu1 %v2445_v27  ;;  %2455 = vadd.xlane.f32.xlu0 %v2454_v25  ;;  %v2448_v21 = vsel %vm394_vm2, %v4724_v10, 0.0 }
0x1341   : > { %v4726_v56 = vpop.eup %3905 }
0x1342   : > { %v2463_v52 = vsel %vm394_vm2, %v4726_v56, 0.0  ;;  %v4730_v50 = vpop.eup %3907 }
0x1343   : > { %2464 = vadd.xlane.f32.xlu1 %v2463_v52  ;;  %2449 = vadd.xlane.f32.xlu0 %v2448_v21  ;;  %v2457_v13 = vsel %vm394_vm2, %v4730_v50, 0.0 }
0x1345   : > { %v4734_v4 = vpop.eup %3909 }
0x1346   : > { %v2466_v57 = vsel %vm394_vm2, %v4734_v4, 0.0  ;;  %v4740_v54 = vpop.eup %3911 }
0x1347   : > { %2458 = vadd.xlane.f32.xlu1 %v2457_v13  ;;  %2467 = vadd.xlane.f32.xlu0 %v2466_v57  ;;  %v2460_v22 = vsel %vm394_vm2, %v4740_v54, 0.0 }
0x134b   : > { %2461 = vadd.xlane.f32.xlu0 %v2460_v22 }
0x1358   : > { %2493 = vrot.lane.b32.xlu1 %v4020_v34, %s3959_s22  ;;  %v5023_v34 = vpack.i.bf16 %v4218_v37, %v4212_v32  ;;  %v5030_v32 = vpack.i.bf16 %v4490_v60, %v4486_v51  ;;  %v5032_v37 = vpack.i.bf16 %v4502_v62, %v4498_v0  ;;  %v5049_v51 = vpack.i.bf16 %v5047_v41, %v5048_v7  ;;  %v5051_v60 = vld [vmem:[#allocation17_spill] sm:$0xff]  ;;  %v5053_v0 = vld [vmem:[#allocation22_spill] sm:$0xff] }
0x135c   : > { %2495 = vrot.lane.b32.xlu1 %v4018_v33, %s3959_s22  ;;  %v5022_v33 = vpack.i.bf16 %v4298_v59, %v4294_v53  ;;  %v5033_v53 = vpack.i.bf16 %v4494_v38, %v4488_v47  ;;  %v5035_v59 = vpack.i.bf16 %v4506_v30, %v4500_v11  ;;  %v5050_v47 = vld [vmem:[#allocation18_spill] sm:$0xff]  ;;  %v5054_v11 = vld [vmem:[#allocation20_spill] sm:$0xff] }
0x135d   : > { %v5052_v38 = vpack.i.bf16 %v5050_v47, %v5051_v60  ;;  %v5055_v62 = vpack.i.bf16 %v5053_v0, %v5054_v11 }
0x1360   : > { %3537 = vrot.lane.b32.xlu1 %v5019_v40, %s3960_s23 }
0x1361   : > { %2491 = vrot.lane.b32.xlu0 %v4010_v23, %s3959_s22  ;;  %v5024_v23 = vpack.i.bf16 %v4310_v3, %v4306_v1  ;;  %v5037_v1 = vld [vmem:[#allocation12_spill] sm:$0xff]  ;;  %v5039_v3 = vld [vmem:[#allocation11_spill] sm:$0xff] }
0x1362   : > { %v5038_v2 = vpack.i.bf16 %v5036_v63, %v5037_v1  ;;  %v5041_v61 = vpack.i.bf16 %v5039_v3, %v5040_v5 }
0x1364   : > { %3547 = vrot.lane.b32.xlu1 %v5020_v28, %s3960_s23 }
0x1365   : > { %3532 = vrot.lane.b32.xlu0 %v5021_v24, %s3960_s23 }
0x1368   : > { %3557 = vrot.lane.b32.xlu1 %v5022_v33, %s3961_s24 }
0x1369   : > { %3542 = vrot.lane.b32.xlu0 %v5023_v34, %s3960_s23 }
0x136c   : > { %3567 = vrot.lane.b32.xlu1 %v5024_v23, %s3961_s24 }
0x136d   : > { %3552 = vrot.lane.b32.xlu0 %v5025_v15, %s3961_s24 }
0x1370   : > { %3577 = vrot.lane.b32.xlu1 %v5026_v16, %s3962_s25 }
0x1371   : > { %3562 = vrot.lane.b32.xlu0 %v5027_v17, %s3961_s24 }
0x1374   : > { %3587 = vrot.lane.b32.xlu1 %v5028_v29, %s3962_s25 }
0x1375   : > { %3572 = vrot.lane.b32.xlu0 %v5029_v31, %s3962_s25 }
0x1378   : > { %3597 = vrot.lane.b32.xlu1 %v5030_v32, %s3963_s26 }
0x1379   : > { %3582 = vrot.lane.b32.xlu0 %v5031_v35, %s3962_s25 }
0x137c   : > { %3607 = vrot.lane.b32.xlu1 %v5032_v37, %s3963_s26 }
0x137d   : > { %3592 = vrot.lane.b32.xlu0 %v5033_v53, %s3963_s26 }
0x1380   : > { %3617 = vrot.lane.b32.xlu1 %v5034_v49, %s3964_s27 }
0x1381   : > { %3602 = vrot.lane.b32.xlu0 %v5035_v59, %s3963_s26 }
0x1384   : > { %3627 = vrot.lane.b32.xlu1 %v5038_v2, %s3964_s27 }
0x1385   : > { %3612 = vrot.lane.b32.xlu0 %v5041_v61, %s3964_s27 }
0x1388   : > { %3637 = vrot.lane.b32.xlu1 %v5043_v44, %s3965_s28 }
0x1389   : > { %3622 = vrot.lane.b32.xlu0 %v5046_v45, %s3964_s27 }
0x138c   : > { %3647 = vrot.lane.b32.xlu1 %v5049_v51, %s3965_s28 }
0x138d   : > { %3632 = vrot.lane.b32.xlu0 %v5052_v38, %s3965_s28 }
0x1391   : > { %3642 = vrot.lane.b32.xlu0 %v5055_v62, %s3965_s28 }
0x13c8   : > { %v2453_v30 = vpop.xlane.xlu1 %2452 }
0x13cc   : > { %v2447_v55 = vpop.xlane.xlu1 %2446  ;;  %v2456_v46 = vpop.xlane.xlu0 %2455 }
0x13cd   : > { %3913 = vrcp.f32 %v2447_v55 }
0x13d0   : > { %v2465_v39 = vpop.xlane.xlu1 %2464  ;;  %v2450_v43 = vpop.xlane.xlu0 %2449 }
0x13d1   : > { %3915 = vrcp.f32 %v2450_v43 }
0x13d2   : > { %3917 = vrcp.f32 %v2456_v46 }
0x13d3   : > { %3919 = vrcp.f32 %v2453_v30 }
0x13d4   : > { %v2468_v12 = vpop.xlane.xlu0 %2467  ;;  %v2459_v36 = vpop.xlane.xlu1 %2458 }
0x13d5   : > { %3921 = vrcp.f32 %v2459_v36  ;;  %v5056_v36 = vld [vmem:[#allocation4_spill] sm:$0xff] }
0x13d7   : > { %v3914_v42 = vpop.eup %3913 }
0x13d8   : > { %v2462_v20 = vpop.xlane.xlu0 %2461  ;;  %v2494_v9 = vpop.permute.xlu1 %2493  ;;  %v2477_v27 = vmul.f32 %v3914_v42, %v4716_v6  ;;  %v5057_v42 = vld [vmem:[#allocation2_spill] sm:$0xff] }
0x13d9   : > { %3923 = vrcp.f32 %v2462_v20 }
0x13da   : > { %3925 = vrcp.f32 %v2468_v12 }
0x13db   : > { %v3916_v18 = vpop.eup %3915  ;;  %3927 = vrcp.f32 %v2465_v39 }
0x13dc   : > { %v2492_v48 = vpop.permute.xlu0 %2491  ;;  %v2478_v25 = vmul.f32 %v3916_v18, %v4724_v10  ;;  %v3918_v21 = vpop.eup %3917 }
0x13dd   : > { %3447 = vmatprep.subr.bf16.mxu1 %v2492_v48  ;;  %v3920_v13 = vpop.eup %3919  ;;  %v2496_v22 = vpop.permute.xlu1 %2495  ;;  %v2480_v28 = vmul.f32 %v3918_v21, %v4718_v26  ;;  %v5059_v21 = vld [vmem:[#allocation3_spill] sm:$0xff] }
0x13de   : > { %3448 = vmatpush3.bf16.msra.mxu1 %v2492_v48  ;;  %v2485_v52 = vpack.c.bf16 %v2478_v25, %v2477_v27  ;;  %v2479_v10 = vmul.f32 %v3920_v13, %v4712_v19  ;;  %v5058_v25 = vld [vmem:[#allocation5_spill] sm:$0xff] }
0x13df   : > { %3449 = vmatprep.subr.bf16.mxu1 %v2494_v9  ;;  %v3922_v57 = vpop.eup %3921 }
0x13e0   : > { %3453 = vmatprep.mubr.msk.bf16.mxu1 %vm394_vm2, %v2485_v52  ;;  %v2481_v24 = vmul.f32 %v3922_v57, %v4730_v50  ;;  %v2486_v33 = vpack.c.bf16 %v2480_v28, %v2479_v10  ;;  %v3533_v63 = vpop.permute.xlu0 %3532 }
0x13e1   : > { %v3535_v62 = vunpack.i.h.bf16 %v3533_v63  ;;  %v3534_v30 = vunpack.i.l.bf16 %v3533_v63 }
0x13e2   : > { %3450 = vmatpush3.bf16.msra.mxu1 %v2494_v9 }
0x13e3   : > { %v3924_v40 = vpop.eup %3923  ;;  %3451 = vmatprep.subr.bf16.mxu1 %v2496_v22  ;;  %v2803_v52 = vsel %vm304_vm1, %v5058_v25, %v3535_v62  ;;  %v2802_v13 = vsel %vm304_vm1, %v5059_v21, %v3534_v30 }
0x13e4   : > { %v2482_v6 = vmul.f32 %v3924_v40, %v4740_v54  ;;  %v3926_v34 = vpop.eup %3925  ;;  %v3543_v2 = vpop.permute.xlu0 %3542  ;;  %v5060_v40 = vld [vmem:[#allocation8_spill] sm:$0xff] }
0x13e5   : > { %v3928_v15 = vpop.eup %3927  ;;  %v2484_v16 = vmul.f32 %v3926_v34, %v4734_v4  ;;  %v3545_v39 = vunpack.i.h.bf16 %v3543_v2  ;;  %v3544_v43 = vunpack.i.l.bf16 %v3543_v2  ;;  %v5062_v34 = vld [vmem:[#allocation9_spill] sm:$0xff] }
0x13e6   : > { %3452 = vmatpush3.bf16.msra.mxu1 %v2496_v22  ;;  %v2487_v23 = vpack.c.bf16 %v2482_v6, %v2481_v24  ;;  %v2483_v26 = vmul.f32 %v3928_v15, %v4726_v56  ;;  %v3538_v56 = vpop.permute.xlu1 %3537  ;;  %v5061_v6 = vld [vmem:[#allocation6_spill] sm:$0xff]  ;;  %v5063_v15 = vld [vmem:[#allocation7_spill] sm:$0xff] }
0x13e7   : > { %v3540_v0 = vunpack.i.h.bf16 %v3538_v56  ;;  %v3539_v11 = vunpack.i.l.bf16 %v3538_v56 }
0x13e8   : > { %v2488_v17 = vpack.c.bf16 %v2484_v16, %v2483_v26  ;;  %v3553_v5 = vpop.permute.xlu0 %3552  ;;  %v2806_v16 = vsel %vm304_vm1, %v5063_v15, %v3544_v43 }
0x13e9   : > { %3454 = vmatmul.mubr.msk.bf16.vlgmr.msra.gmra.mrb[56].mxu1 %vm394_vm2, %v2486_v33  ;;  %v2805_v20 = vsel %vm304_vm1, %v5056_v36, %v3540_v0  ;;  %v2804_v18 = vsel %vm304_vm1, %v5057_v42, %v3539_v11  ;;  %v3555_v57 = vunpack.i.h.bf16 %v3553_v5  ;;  %v3554_v22 = vunpack.i.l.bf16 %v3553_v5 }
0x13ea   : > { %3457 = vmatprep.mubr.msk.bf16.mxu1 %vm394_vm2, %v2487_v23  ;;  %v3548_v1 = vpop.permute.xlu1 %3547  ;;  %v2807_v23 = vsel %vm304_vm1, %v5062_v34, %v3545_v39 }
0x13eb   : > { %v3550_v55 = vunpack.i.h.bf16 %v3548_v1  ;;  %v3549_v46 = vunpack.i.l.bf16 %v3548_v1 }
0x13ec   : > { %v3563_v58 = vpop.permute.xlu0 %3562 }
0x13ed   : > { %v2809_v28 = vsel %vm304_vm1, %v5060_v40, %v3550_v55  ;;  %v2808_v10 = vsel %vm304_vm1, %v5061_v6, %v3549_v46  ;;  %v3565_v26 = vunpack.i.h.bf16 %v3563_v58 }
0x13ee   : > { %v3558_v3 = vpop.permute.xlu1 %3557 }
0x13ef   : > { %v3560_v9 = vunpack.i.h.bf16 %v3558_v3  ;;  %v3559_v48 = vunpack.i.l.bf16 %v3558_v3  ;;  %v4886_v2 = vsel %vm2810_vm3, %v2807_v23, %v3565_v26 }
0x13f0   : > { %v4834_v14 = vpop.permute.xlu0 %3572 }
0x13f1   : > { %3458 = vmatmul.mubr.msk.bf16.gmra.mrb[60].mxu1 %vm394_vm2, %v2488_v17  ;;  %v3564_v17 = vunpack.i.l.bf16 %v3563_v58 }
0x13f2   : > { %v3568_v61 = vpop.permute.xlu1 %3567 }
0x13f3   : > { %v3570_v24 = vunpack.i.h.bf16 %v3568_v61  ;;  %v3569_v33 = vunpack.i.l.bf16 %v3568_v61  ;;  %v4883_v1 = vsel %vm2810_vm3, %v2806_v16, %v3564_v17 }
0x13f4   : > { %v4838_v45 = vpop.permute.xlu0 %3582 }
0x13f5   : > { %v3585_v11 = vunpack.i.h.bf16 %v4838_v45  ;;  %v3584_v62 = vunpack.i.l.bf16 %v4838_v45 }
0x13f6   : > { %v3578_v44 = vpop.permute.xlu1 %3577 }
0x13f8   : > { %v4842_v7 = vpop.permute.xlu0 %3592 }
0x13fa   : > { %v4836_v8 = vpop.permute.xlu1 %3587 }
0x13fb   : > { %v3589_v56 = vunpack.i.l.bf16 %v4836_v8 }
0x13fc   : > { %v4846_v47 = vpop.permute.xlu0 %3602 }
0x13fd   : > { %v3605_v25 = vunpack.i.h.bf16 %v4846_v47 }
0x13fe   : > { %v4840_v41 = vpop.permute.xlu1 %3597 }
0x13ff   : > { %v3600_v3 = vunpack.i.h.bf16 %v4840_v41  ;;  %v3599_v5 = vunpack.i.l.bf16 %v4840_v41 }
0x1400   : > { %v4850_v38 = vpop.permute.xlu0 %3612 }
0x1401   : > { %v3615_v43 = vunpack.i.h.bf16 %v4850_v38  ;;  %v3614_v36 = vunpack.i.l.bf16 %v4850_v38 }
0x1402   : > { %v4844_v51 = vpop.permute.xlu1 %3607 }
0x1404   : > { %v4858_v27 = vpop.permute.xlu0 %3622 }
0x1406   : > { %v4848_v60 = vpop.permute.xlu1 %3617 }
0x1407   : > { %v3620_v55 = vunpack.i.h.bf16 %v4848_v60  ;;  %v3619_v46 = vunpack.i.l.bf16 %v4848_v60  ;;  %v3609_v60 = vunpack.i.l.bf16 %v4844_v51 }
0x1408   : > { %v3633_v63 = vpop.permute.xlu0 %3632 }
0x1409   : > { %v3634_v21 = vunpack.i.l.bf16 %v3633_v63 }
0x140a   : > { %v4852_v12 = vpop.permute.xlu1 %3627 }
0x140b   : > { %v3630_v6 = vunpack.i.h.bf16 %v4852_v12 }
0x14bc   : > { %v3455_v54 = vpop.f32.mrb[56].mxu1 }
0x14bd   : > { %v2547_v19 = vpop.f32.mrb[57].mxu1 }
0x14be   : > { %v3456_v29 = vpop.f32.mrb[58].mxu1 }
0x14bf   : > { %v3651_v31 = vpack.i.bf16 %v3456_v29, %v3455_v54  ;;  %v2550_v50 = vpop.f32.mrb[59].mxu1  ;;  %v2813_v54 = vsel %vm2810_vm3, %v2804_v18, %v3559_v48  ;;  %v3580_v29 = vunpack.i.h.bf16 %v3578_v44  ;;  %v3610_v18 = vunpack.i.h.bf16 %v4844_v51  ;;  %v4911_v48 = vpop.permute.xlu0 %3642 }
0x14c0   : > { %v3656_v32 = vpack.i.bf16 %v2550_v50, %v2547_v19  ;;  %v2814_v19 = vsel %vm2810_vm3, %v2805_v20, %v3560_v9  ;;  %v2811_v50 = vsel %vm2810_vm3, %v2802_v13, %v3554_v22  ;;  %v3604_v13 = vunpack.i.l.bf16 %v4846_v47 }
0x14c1   : > { %3652 = vrot.lane.b32.xlu1 %v3651_v31, %s3966_s29  ;;  %v3579_v31 = vunpack.i.l.bf16 %v3578_v44  ;;  %v2823_v58 = vsel %vm2819_vm4, %v2814_v19, %v3580_v29  ;;  %v3595_v44 = vunpack.i.h.bf16 %v4842_v7  ;;  %v3635_v22 = vunpack.i.h.bf16 %v3633_v63 }
0x14c2   : > { %3657 = vrot.lane.b32.xlu0 %v3656_v32, %s3966_s29  ;;  %v2812_v32 = vsel %vm2810_vm3, %v2803_v52, %v3555_v57 }
0x14c3   : > { %v2822_v61 = vsel %vm2819_vm4, %v2813_v54, %v3579_v31 }
0x14c4   : > { %v3459_v35 = vpop.f32.mrb[60].mxu1  ;;  %v2831_v39 = vsel %vm2828_vm5, %v2822_v61, %v3599_v5  ;;  %v3644_v5 = vunpack.i.l.bf16 %v4911_v48 }
0x14c5   : > { %v2563_v37 = vpop.f32.mrb[61].mxu1  ;;  %v2840_v38 = vsel %vm2837_vm6, %v2831_v39, %v3619_v46 }
0x14c6   : > { %v3460_v53 = vpop.f32.mrb[62].mxu1 }
0x14c7   : > { %v3666_v49 = vpack.i.bf16 %v3460_v53, %v3459_v35  ;;  %v2566_v59 = vpop.f32.mrb[63].mxu1  ;;  %v3575_v35 = vunpack.i.h.bf16 %v4834_v14  ;;  %v3638_v53 = vpop.permute.xlu1 %3637 }
0x14c8   : > { %v3661_v4 = vpack.i.bf16 %v2566_v59, %v2563_v37  ;;  %v3574_v37 = vunpack.i.l.bf16 %v4834_v14  ;;  %v2818_v59 = vsel %vm2810_vm3, %v2809_v28, %v3570_v24  ;;  %v3594_v14 = vunpack.i.l.bf16 %v4842_v7 }
0x14c9   : > { %3667 = vrot.lane.b32.xlu1 %v3666_v49, %s3966_s29  ;;  %v2817_v49 = vsel %vm2810_vm3, %v2808_v10, %v3569_v33  ;;  %v2821_v0 = vsel %vm2819_vm4, %v2812_v32, %v3575_v35  ;;  %v2832_v7 = vsel %vm2828_vm5, %v2823_v58, %v3600_v3  ;;  %v3639_v9 = vunpack.i.l.bf16 %v3638_v53 }
0x14ca   : > { %3662 = vrot.lane.b32.xlu0 %v3661_v4, %s3966_s29  ;;  %v3590_v4 = vunpack.i.h.bf16 %v4836_v8  ;;  %v2820_v8 = vsel %vm2819_vm4, %v2811_v50, %v3574_v37  ;;  %v2826_v30 = vsel %vm2819_vm4, %v2817_v49, %v3589_v56  ;;  %v2830_v42 = vsel %vm2828_vm5, %v2821_v0, %v3595_v44 }
0x14cb   : > { %v4906_v20 = vpop.permute.xlu1 %3647  ;;  %v2829_v45 = vsel %vm2828_vm5, %v2820_v8, %v3594_v14  ;;  %v3640_v52 = vunpack.i.h.bf16 %v3638_v53  ;;  %v2841_v57 = vsel %vm2837_vm6, %v2832_v7, %v3620_v55  ;;  %v2839_v28 = vsel %vm2837_vm6, %v2830_v42, %v3615_v43 }
0x14cc   : > { %v2827_v41 = vsel %vm2819_vm4, %v2818_v59, %v3590_v4  ;;  %v2838_v40 = vsel %vm2837_vm6, %v2829_v45, %v3614_v36  ;;  %v3629_v10 = vunpack.i.l.bf16 %v4852_v12  ;;  %v2849_v24 = vsel %vm2846_vm7, %v2840_v38, %v3639_v9 }
0x14cd   : > { %v2850_v23 = vsel %vm2846_vm7, %v2841_v57, %v3640_v52  ;;  %v2847_v15 = vsel %vm2846_vm7, %v2838_v40, %v3634_v21  ;;  %v2848_v17 = vsel %vm2846_vm7, %v2839_v28, %v3635_v22  ;;  %v3625_v32 = vunpack.i.h.bf16 %v4858_v27 }
0x14ce   : > { %v3624_v35 = vunpack.i.l.bf16 %v4858_v27  ;;  %v2824_v49 = vsel %vm2819_vm4, %v4883_v1, %v3584_v62  ;;  %v2825_v59 = vsel %vm2819_vm4, %v4886_v2, %v3585_v11  ;;  %v3650_v4 = vunpack.i.h.bf16 %v4906_v20 }
0x14cf   : > { %v3649_v56 = vunpack.i.l.bf16 %v4906_v20  ;;  %v2835_v63 = vsel %vm2828_vm5, %v2826_v30, %v3609_v60  ;;  %v2836_v27 = vsel %vm2828_vm5, %v2827_v41, %v3610_v18  ;;  %v3645_v3 = vunpack.i.h.bf16 %v4911_v48 }
0x14d0   : > { %v2833_v1 = vsel %vm2828_vm5, %v2824_v49, %v3604_v13  ;;  %v2834_v2 = vsel %vm2828_vm5, %v2825_v59, %v3605_v25  ;;  %v2844_v61 = vsel %vm2837_vm6, %v2835_v63, %v3629_v10  ;;  %v2845_v58 = vsel %vm2837_vm6, %v2836_v27, %v3630_v6 }
0x14d1   : > { %v2842_v14 = vsel %vm2837_vm6, %v2833_v1, %v3624_v35  ;;  %v2843_v8 = vsel %vm2837_vm6, %v2834_v2, %v3625_v32  ;;  %v2853_v30 = vsel %vm2846_vm7, %v2844_v61, %v3649_v56  ;;  %v2854_v41 = vsel %vm2846_vm7, %v2845_v58, %v3650_v4 }
0x14d2   : > { %v2851_v39 = vsel %vm2846_vm7, %v2842_v14, %v3644_v5  ;;  %v2852_v7 = vsel %vm2846_vm7, %v2843_v8, %v3645_v3 }
0x1533   : > { %v3653_v51 = vpop.permute.xlu1 %3652 }
0x1534   : > { %v3655_v33 = vunpack.i.h.bf16 %v3653_v51  ;;  %v3654_v47 = vunpack.i.l.bf16 %v3653_v51  ;;  %v3658_v34 = vpop.permute.xlu0 %3657 }
0x1535   : > { %v3660_v16 = vunpack.i.h.bf16 %v3658_v34  ;;  %v3659_v26 = vunpack.i.l.bf16 %v3658_v34 }
0x1536   : > { %v2859_v12 = vsel %vm2855_vm8, %v2850_v23, %v3655_v33  ;;  %v2858_v54 = vsel %vm2855_vm8, %v2849_v24, %v3654_v47 }
0x1537   : > { %v3054_v19 = vpack.c.bf16 %v2859_v12, %v2859_v12  ;;  %v3053_v29 = vpack.c.bf16 %v2858_v54, %v2858_v54  ;;  %v2856_v31 = vsel %vm2855_vm8, %v2847_v15, %v3659_v26  ;;  %v2857_v50 = vsel %vm2855_vm8, %v2848_v17, %v3660_v16 }
0x1538   : > { %v3051_v37 = vpack.c.bf16 %v2856_v31, %v2856_v31  ;;  %v3052_v53 = vpack.c.bf16 %v2857_v50, %v2857_v50 }
0x1539   : > { %2900 = vst.msk [vmem:[%s4929_s5 + $0xc] sm:$0xf] %vm2896_vm9, %v3054_v19  ;;  %2899 = vst.msk [vmem:[%s4929_s5 + $0x8] sm:$0xf] %vm2896_vm9, %v3053_v29 }
0x153a   : > { %2897 = vst.msk [vmem:[%s4929_s5] sm:$0xf] %vm2896_vm9, %v3051_v37  ;;  %2898 = vst.msk [vmem:[%s4929_s5 + $0x4] sm:$0xf] %vm2896_vm9, %v3052_v53 }
0x153b   : > { %v3668_v44 = vpop.permute.xlu1 %3667 }
0x153c   : > { %v3670_v0 = vunpack.i.h.bf16 %v3668_v44  ;;  %v3669_v11 = vunpack.i.l.bf16 %v3668_v44  ;;  %v3663_v62 = vpop.permute.xlu0 %3662 }
0x153d   : > { %v3665_v55 = vunpack.i.h.bf16 %v3663_v62  ;;  %v3664_v46 = vunpack.i.l.bf16 %v3663_v62 }
0x153e   : > { %v2863_v43 = vsel %vm2855_vm8, %v2854_v41, %v3670_v0  ;;  %v2862_v36 = vsel %vm2855_vm8, %v2853_v30, %v3669_v11 }
0x153f   : > { %v3058_v20 = vpack.c.bf16 %v2863_v43, %v2863_v43  ;;  %v3057_v45 = vpack.c.bf16 %v2862_v36, %v2862_v36  ;;  %v2860_v42 = vsel %vm2855_vm8, %v2851_v39, %v3664_v46  ;;  %v2861_v18 = vsel %vm2855_vm8, %v2852_v7, %v3665_v55 }
0x1540   : > { %v3055_v9 = vpack.c.bf16 %v2860_v42, %v2860_v42  ;;  %v3056_v48 = vpack.c.bf16 %v2861_v18, %v2861_v18 }
0x1541   : > { %2904 = vst.msk [vmem:[%s4929_s5 + $0x1c] sm:$0xf] %vm2896_vm9, %v3058_v20  ;;  %2903 = vst.msk [vmem:[%s4929_s5 + $0x18] sm:$0xf] %vm2896_vm9, %v3057_v45 }
0x1542   : > { %2901 = vst.msk [vmem:[%s4929_s5 + $0x10] sm:$0xf] %vm2896_vm9, %v3055_v9  ;;  %2902 = vst.msk [vmem:[%s4929_s5 + $0x14] sm:$0xf] %vm2896_vm9, %v3056_v48 }
0x1543 PF: > { %s13_s12 = sadd.s32 1, %s3935_s12  }
0x1544   : > { %p10_p4 = scmp.ge.s32.totalorder %s13_s12, 4  }
0x1546   :  { %12 = sbr.rel (!%p10_p4) target bundleno = 1 (0x1), region = 62 }

</bundles_post_ra>
